<compile_context>
chip_gen: v6e
topology: v6e:2x2x1
jax: 0.10.0
libtpu: 0.0.40
codegen_flags: <defaults>
</compile_context>

<pallas_src>
import functools
import math

import jax
import jax.numpy as jnp
from jax.experimental import pallas as pl
from jax.experimental.pallas import tpu as pltpu

LN_EPS = 1e-12  # BertLayerNorm default eps

# Default tile targets (bf16 operands; footprints stay well under the 32 MiB
# scoped-VMEM default on every generation, including v7x's 64 MiB physical).
TM_DEFAULT = 256
TN_DEFAULT = 1024
TK_DEFAULT = 1024
TQ_DEFAULT = 256


def _tile(dim, target, granule):
    """Largest multiple of `granule` dividing `dim`, capped at `target`.

    Falls back to the full dimension (always legal for a BlockSpec) when the
    dimension is small or not granule-divisible.
    """
    if dim <= target or dim % granule != 0:
        return dim
    t = (min(target, dim) // granule) * granule
    while t > granule and dim % t != 0:
        t -= granule
    return t if dim % t == 0 else dim


def _out_itemsize(dtype):
    return 2 if dtype == jnp.bfloat16 else 4


# ----------------------------- dense kernels -----------------------------

def _apply_act(y, activation):
    if activation == "gelu":
        # TODO(synk): original BERT gelu is erf-based; tanh approximation used
        # here since erf lowering is not guaranteed in Mosaic.
        return 0.5 * y * (1.0 + jnp.tanh(
            0.7978845608028654 * (y + 0.044715 * y * y * y)))
    if activation == "tanh":
        return jnp.tanh(y)
    return y


def _dense_kernel_k1(x_ref, w_ref, b_ref, o_ref, *, activation):
    """Single-shot y = x @ w + b (K fits in one tile -> no accumulator)."""
    y = jnp.dot(x_ref[...], w_ref[...], preferred_element_type=jnp.float32)
    y = _apply_act(y + b_ref[...], activation)
    o_ref[...] = y.astype(o_ref.dtype)


def _dense_kernel_kt(x_ref, w_ref, b_ref, o_ref, acc_ref, *, activation):
    """K-tiled y = x @ w + b; K is the last grid axis."""
    @pl.when(pl.program_id(2) == 0)
    def _():
        acc_ref[...] = jnp.zeros_like(acc_ref)

    acc_ref[...] += jnp.dot(x_ref[...], w_ref[...],
                            preferred_element_type=jnp.float32)

    @pl.when(pl.program_id(2) == pl.num_programs(2) - 1)
    def _():
        y = _apply_act(acc_ref[...] + b_ref[...], activation)
        o_ref[...] = y.astype(o_ref.dtype)


def dense(x, w, b, activation="none", out_dtype=jnp.float32,
          tm=TM_DEFAULT, tn=TN_DEFAULT, tk=TK_DEFAULT):
    """y = act(x @ w + b). x: (M, K), w: (K, N), b: (N,). bf16 MXU, fp32 acc."""
    M, K = x.shape
    N = w.shape[1]
    tm = _tile(M, tm, 16)          # bf16 sublane granule
    tn = _tile(N, tn, 128)
    tk = _tile(K, tk, 128)
    nk = K // tk
    xb = x.astype(jnp.bfloat16)
    wb = w.astype(jnp.bfloat16)
    b2 = b.reshape(1, N)
    trans = M * N if activation in ("gelu", "tanh") else 0
    ce = pl.CostEstimate(
        flops=2 * M * N * K,
        transcendentals=trans,
        bytes_accessed=2 * (M * K + K * N) + _out_itemsize(out_dtype) * M * N + 4 * N)

    if nk == 1:
        # K grid axis collapsed: no accumulator scratch, no pl.when flow.
        return pl.pallas_call(
            functools.partial(_dense_kernel_k1, activation=activation),
            grid=(M // tm, N // tn),
            out_shape=jax.ShapeDtypeStruct((M, N), out_dtype),
            in_specs=[
                pl.BlockSpec((tm, K), lambda i, j: (i, 0)),
                pl.BlockSpec((K, tn), lambda i, j: (0, j)),
                pl.BlockSpec((1, tn), lambda i, j: (0, j)),
            ],
            out_specs=pl.BlockSpec((tm, tn), lambda i, j: (i, j)),
            compiler_params=pltpu.CompilerParams(
                dimension_semantics=("parallel", "parallel")),
            cost_estimate=ce,
        )(xb, wb, b2)

    return pl.pallas_call(
        functools.partial(_dense_kernel_kt, activation=activation),
        grid=(M // tm, N // tn, nk),
        out_shape=jax.ShapeDtypeStruct((M, N), out_dtype),
        in_specs=[
            pl.BlockSpec((tm, tk), lambda i, j, k: (i, k)),
            pl.BlockSpec((tk, tn), lambda i, j, k: (k, j)),
            pl.BlockSpec((1, tn), lambda i, j, k: (0, j)),
        ],
        out_specs=pl.BlockSpec((tm, tn), lambda i, j, k: (i, j)),
        scratch_shapes=[pltpu.VMEM((tm, tn), jnp.float32)],
        compiler_params=pltpu.CompilerParams(
            dimension_semantics=("parallel", "parallel", "arbitrary")),
        cost_estimate=ce,
    )(xb, wb, b2)


def _dense_add_ln_kernel_k1(x_ref, w_ref, b_ref, r_ref, g_ref, be_ref, o_ref,
                            *, eps):
    y = jnp.dot(x_ref[...], w_ref[...], preferred_element_type=jnp.float32)
    y = y + b_ref[...] + r_ref[...]
    mu = jnp.mean(y, axis=-1, keepdims=True)
    yc = y - mu
    var = jnp.mean(yc * yc, axis=-1, keepdims=True)
    o_ref[...] = yc * jax.lax.rsqrt(var + eps) * g_ref[...] + be_ref[...]


def _dense_add_ln_kernel_kt(x_ref, w_ref, b_ref, r_ref, g_ref, be_ref, o_ref,
                            acc_ref, *, eps):
    @pl.when(pl.program_id(1) == 0)
    def _():
        acc_ref[...] = jnp.zeros_like(acc_ref)

    acc_ref[...] += jnp.dot(x_ref[...], w_ref[...],
                            preferred_element_type=jnp.float32)

    @pl.when(pl.program_id(1) == pl.num_programs(1) - 1)
    def _():
        y = acc_ref[...] + b_ref[...] + r_ref[...]
        mu = jnp.mean(y, axis=-1, keepdims=True)
        yc = y - mu
        var = jnp.mean(yc * yc, axis=-1, keepdims=True)
        o_ref[...] = yc * jax.lax.rsqrt(var + eps) * g_ref[...] + be_ref[...]


def dense_add_layernorm(x, w, b, residual, gamma, beta, eps=LN_EPS,
                        tm=TM_DEFAULT, tk=TK_DEFAULT):
    """LayerNorm(x @ w + b + residual). Output feature dim kept whole per block."""
    M, K = x.shape
    N = w.shape[1]
    tm = _tile(M, tm, 16)
    tk = _tile(K, tk, 128)
    nk = K // tk
    xb = x.astype(jnp.bfloat16)
    wb = w.astype(jnp.bfloat16)
    args = (xb, wb, b.reshape(1, N), residual,
            gamma.reshape(1, N), beta.reshape(1, N))
    ce = pl.CostEstimate(
        flops=2 * M * N * K,
        transcendentals=0,
        bytes_accessed=2 * (M * K + K * N) + 4 * (2 * M * N + 3 * N))

    if nk == 1:
        return pl.pallas_call(
            functools.partial(_dense_add_ln_kernel_k1, eps=eps),
            grid=(M // tm,),
            out_shape=jax.ShapeDtypeStruct((M, N), jnp.float32),
            in_specs=[
                pl.BlockSpec((tm, K), lambda i: (i, 0)),
                pl.BlockSpec((K, N), lambda i: (0, 0)),
                pl.BlockSpec((1, N), lambda i: (0, 0)),
                pl.BlockSpec((tm, N), lambda i: (i, 0)),
                pl.BlockSpec((1, N), lambda i: (0, 0)),
                pl.BlockSpec((1, N), lambda i: (0, 0)),
            ],
            out_specs=pl.BlockSpec((tm, N), lambda i: (i, 0)),
            compiler_params=pltpu.CompilerParams(
                dimension_semantics=("parallel",)),
            cost_estimate=ce,
        )(*args)

    return pl.pallas_call(
        functools.partial(_dense_add_ln_kernel_kt, eps=eps),
        grid=(M // tm, nk),
        out_shape=jax.ShapeDtypeStruct((M, N), jnp.float32),
        in_specs=[
            pl.BlockSpec((tm, tk), lambda i, k: (i, k)),
            pl.BlockSpec((tk, N), lambda i, k: (k, 0)),
            pl.BlockSpec((1, N), lambda i, k: (0, 0)),
            pl.BlockSpec((tm, N), lambda i, k: (i, 0)),   # residual reused across k
            pl.BlockSpec((1, N), lambda i, k: (0, 0)),
            pl.BlockSpec((1, N), lambda i, k: (0, 0)),
        ],
        out_specs=pl.BlockSpec((tm, N), lambda i, k: (i, 0)),
        scratch_shapes=[pltpu.VMEM((tm, N), jnp.float32)],
        compiler_params=pltpu.CompilerParams(
            dimension_semantics=("parallel", "arbitrary")),
        cost_estimate=ce,
    )(*args)


# ------------------------- embedding sum + LayerNorm -------------------------

def _embed_ln_kernel(we_ref, te_ref, pe_ref, g_ref, b_ref, o_ref, *, eps):
    x = we_ref[0] + te_ref[0] + pe_ref[...]
    mu = jnp.mean(x, axis=-1, keepdims=True)
    xc = x - mu
    var = jnp.mean(xc * xc, axis=-1, keepdims=True)
    o_ref[0] = xc * jax.lax.rsqrt(var + eps) * g_ref[...] + b_ref[...]


def embed_layernorm(we, te, pe, gamma, beta, eps=LN_EPS, ts=512):
    """LayerNorm(word_emb + type_emb + pos_emb); pos_emb stays (S, H) in HBM."""
    B, S, H = we.shape
    ts = _tile(S, ts, 8)
    tok_spec = pl.BlockSpec((1, ts, H), lambda b, s: (b, s, 0))
    vspec = pl.BlockSpec((1, H), lambda b, s: (0, 0))
    return pl.pallas_call(
        functools.partial(_embed_ln_kernel, eps=eps),
        grid=(B, S // ts),
        out_shape=jax.ShapeDtypeStruct((B, S, H), jnp.float32),
        in_specs=[tok_spec, tok_spec,
                  pl.BlockSpec((ts, H), lambda b, s: (s, 0)),  # reused across batches
                  vspec, vspec],
        out_specs=tok_spec,
        compiler_params=pltpu.CompilerParams(
            dimension_semantics=("parallel", "parallel")),
    )(we, te, pe, gamma.reshape(1, H), beta.reshape(1, H))


# ------------------------------- attention -------------------------------

def _attn_blocked_kernel(q_ref, k_ref, v_ref, m_ref, o_ref, *, scale, hp, Dh):
    """hp heads per grid step; 128-lane bf16 Q/K/V blocks, q tiled flash-style."""
    m = m_ref[0]                                      # (1, S) additive mask, f32
    for h in range(hp):                               # tiny static unroll (hp ~ 2)
        q = q_ref[0, :, h * Dh:(h + 1) * Dh] * scale  # (tq, Dh) bf16, scale folded
        k = k_ref[0, :, h * Dh:(h + 1) * Dh]          # (S, Dh) bf16
        v = v_ref[0, :, h * Dh:(h + 1) * Dh]          # (S, Dh) bf16
        # Contract Dh directly (no explicit k.T / XLU transpose).
        s = jax.lax.dot_general(q, k, (((1,), (1,)), ((), ())),
                                preferred_element_type=jnp.float32)   # (tq, S)
        s = s + m
        s = s - jnp.max(s, axis=-1, keepdims=True)
        p = jnp.exp(s)
        p = p * pl.reciprocal(jnp.sum(p, axis=-1, keepdims=True), approx=True)
        o = jnp.dot(p.astype(jnp.bfloat16), v,
                    preferred_element_type=jnp.float32)               # (tq, Dh)
        o_ref[0, :, h * Dh:(h + 1) * Dh] = o.astype(o_ref.dtype)


def _attn_whole_batch_kernel(qkv_ref, m_ref, o_ref, *, scale, nH, Dh, H):
    """Fallback for head widths that cannot tile to 128 lanes (small configs)."""
    m = m_ref[0]
    for h in range(nH):
        q = qkv_ref[0, :, h * Dh:(h + 1) * Dh] * scale
        k = qkv_ref[0, :, H + h * Dh:H + (h + 1) * Dh]
        v = qkv_ref[0, :, 2 * H + h * Dh:2 * H + (h + 1) * Dh]
        s = jax.lax.dot_general(q, k, (((1,), (1,)), ((), ())),
                                preferred_element_type=jnp.float32)
        s = s + m
        s = s - jnp.max(s, axis=-1, keepdims=True)
        p = jnp.exp(s)
        p = p * pl.reciprocal(jnp.sum(p, axis=-1, keepdims=True), approx=True)
        o = jnp.dot(p.astype(jnp.bfloat16), v, preferred_element_type=jnp.float32)
        o_ref[0, :, h * Dh:(h + 1) * Dh] = o.astype(o_ref.dtype)   # incremental store


def attention(qkv, add_mask, num_heads, scale, tq=TQ_DEFAULT):
    """qkv: (B, S, 3H) bf16 fused projections; add_mask: (B, 1, S) additive mask.

    Returns bf16 context (B, S, H) (consumed directly as the out-proj MXU operand).
    """
    B, S, H3 = qkv.shape
    H = H3 // 3
    Dh = H // num_heads

    # Smallest head-group whose lane width is a multiple of 128.
    hp = None
    for cand in range(1, num_heads + 1):
        if num_heads % cand == 0 and (cand * Dh) % 128 == 0:
            hp = cand
            break

    if hp is None:
        # Tiny / unaligned configs: whole batch per step, slice heads in-kernel.
        return pl.pallas_call(
            functools.partial(_attn_whole_batch_kernel, scale=scale,
                              nH=num_heads, Dh=Dh, H=H),
            grid=(B,),
            out_shape=jax.ShapeDtypeStruct((B, S, H), jnp.bfloat16),
            in_specs=[
                pl.BlockSpec((1, S, H3), lambda b: (b, 0, 0)),
                pl.BlockSpec((1, 1, S), lambda b: (b, 0, 0)),
            ],
            out_specs=pl.BlockSpec((1, S, H), lambda b: (b, 0, 0)),
            compiler_params=pltpu.CompilerParams(
                dimension_semantics=("parallel",)),
            cost_estimate=pl.CostEstimate(
                flops=4 * B * num_heads * S * S * Dh,
                transcendentals=B * num_heads * S * S,
                bytes_accessed=2 * B * S * (H3 + H) + 4 * B * S),
        )(qkv, add_mask)

    npairs = num_heads // hp
    hpD = hp * Dh
    tq = _tile(S, tq, 16)
    nq = S // tq

    return pl.pallas_call(
        functools.partial(_attn_blocked_kernel, scale=scale, hp=hp, Dh=Dh),
        grid=(B, npairs, nq),                 # q innermost -> K/V blocks reused
        out_shape=jax.ShapeDtypeStruct((B, S, H), jnp.bfloat16),
        in_specs=[
            pl.BlockSpec((1, tq, hpD), lambda b, p, q: (b, q, p)),              # Q
            pl.BlockSpec((1, S, hpD), lambda b, p, q: (b, 0, npairs + p)),      # K
            pl.BlockSpec((1, S, hpD), lambda b, p, q: (b, 0, 2 * npairs + p)),  # V
            pl.BlockSpec((1, 1, S), lambda b, p, q: (b, 0, 0)),                 # mask
        ],
        out_specs=pl.BlockSpec((1, tq, hpD), lambda b, p, q: (b, q, p)),
        compiler_params=pltpu.CompilerParams(
            dimension_semantics=("parallel", "parallel", "parallel")),
        cost_estimate=pl.CostEstimate(
            flops=4 * B * num_heads * S * S * Dh,
            transcendentals=B * num_heads * S * S,
            bytes_accessed=2 * B * S * (H3 + H) * max(1, nq // 2) + 4 * B * S),
    )(qkv, qkv, qkv, add_mask)


# ----------------------------- parameter init -----------------------------

def init_bert_params(key, cfg):
    std = 0.02
    H = cfg["hidden"]
    I = cfg["intermediate"]
    keys = jax.random.split(key, 4 + cfg["num_layers"])

    def normal(k, shape):
        return std * jax.random.normal(k, shape, jnp.float32)

    params = {
        "word_emb": normal(keys[0], (cfg["vocab_size"], H)),
        "pos_emb": normal(keys[1], (cfg["max_pos"], H)),
        "type_emb": normal(keys[2], (cfg["type_vocab"], H)),
        "emb_ln_g": jnp.ones((H,), jnp.float32),
        "emb_ln_b": jnp.zeros((H,), jnp.float32),
        "pooler_w": normal(keys[3], (H, H)),
        "pooler_b": jnp.zeros((H,), jnp.float32),
        "layers": [],
    }
    for l in range(cfg["num_layers"]):
        lk = jax.random.split(keys[4 + l], 4)
        params["layers"].append({
            # fused Q|K|V projection in (in, out) layout = column-concat [Wq|Wk|Wv].
            # NOTE: PyTorch nn.Linear weights are (out, in); transpose each before
            # concatenating when porting real checkpoints.
            "w_qkv": normal(lk[0], (H, 3 * H)), "b_qkv": jnp.zeros((3 * H,), jnp.float32),
            "wo": normal(lk[1], (H, H)), "bo": jnp.zeros((H,), jnp.float32),
            "ln1_g": jnp.ones((H,), jnp.float32), "ln1_b": jnp.zeros((H,), jnp.float32),
            "wi": normal(lk[2], (H, I)), "bi": jnp.zeros((I,), jnp.float32),
            "wo2": normal(lk[3], (I, H)), "bo2": jnp.zeros((H,), jnp.float32),
            "ln2_g": jnp.ones((H,), jnp.float32), "ln2_b": jnp.zeros((H,), jnp.float32),
        })
    return params


# ----------------------------- forward pass -----------------------------

def bert_for_pass_embedding(params, cfg, input_ids, token_type_ids=None,
                            attention_mask=None, embed_type="last_layer"):
    if embed_type is None:
        raise ValueError("embed_type must be specified!")

    S = input_ids.shape[-1]
    flat_ids = input_ids.reshape(-1, S)                       # view(-1, size(-1))
    B = flat_ids.shape[0]
    H = cfg["hidden"]
    nH = cfg["num_heads"]
    Dh = H // nH

    if token_type_ids is None:
        flat_tt = jnp.zeros_like(flat_ids)
    else:
        flat_tt = token_type_ids.reshape(-1, S)
    if attention_mask is None:
        flat_mask = jnp.ones_like(flat_ids)
    else:
        flat_mask = attention_mask.reshape(-1, S)

    # --- embeddings (gathers are glue; sum + LayerNorm fused in a Pallas kernel) ---
    # TODO(synk): the word/type gathers could be fused into embed_layernorm via
    # PrefetchScalarGridSpec + pl.Element row gather; kept as jnp.take for robustness.
    we = jnp.take(params["word_emb"], flat_ids, axis=0)                 # (B,S,H)
    te = jnp.take(params["type_emb"], flat_tt, axis=0)                  # (B,S,H)
    pe = params["pos_emb"][:S]                                          # (S,H), no bcast
    h = embed_layernorm(we, te, pe, params["emb_ln_g"], params["emb_ln_b"])
    h2d = h.reshape(B * S, H)

    # extended attention mask: (1 - mask) * -10000, shared across heads in-kernel
    add_mask = ((1.0 - flat_mask.astype(jnp.float32)) * -10000.0).reshape(B, 1, S)

    scale = 1.0 / math.sqrt(Dh)

    encoded_layers = []
    for lp in params["layers"]:
        # fused QKV projection: one MXU matmul, bf16 output feeds attention directly
        qkv = dense(h2d, lp["w_qkv"], lp["b_qkv"], out_dtype=jnp.bfloat16)  # (B*S,3H)
        ctx = attention(qkv.reshape(B, S, 3 * H), add_mask, nH, scale)      # (B,S,H) bf16
        # attention output projection + residual + LayerNorm fused
        h1 = dense_add_layernorm(ctx.reshape(B * S, H), lp["wo"], lp["bo"],
                                 h2d, lp["ln1_g"], lp["ln1_b"])
        # FFN up-projection + GELU, bf16 output feeds the down-projection directly
        inter = dense(h1, lp["wi"], lp["bi"], activation="gelu",
                      out_dtype=jnp.bfloat16)                                # (B*S, I)
        # FFN output projection + residual + LayerNorm fused
        h2d = dense_add_layernorm(inter, lp["wo2"], lp["bo2"],
                                  h1, lp["ln2_g"], lp["ln2_b"])
        encoded_layers.append(h2d.reshape(B, S, H))

    if embed_type == "last_layer":
        return encoded_layers[-1]
    elif embed_type == "pooled_output":
        # pooler: tanh(dense(first token of last layer)) — only when requested
        return dense(encoded_layers[-1][:, 0, :],
                     params["pooler_w"], params["pooler_b"], activation="tanh")
    elif embed_type == "last_four_layers":
        return jnp.concatenate(encoded_layers[-4:], axis=-1)
    elif embed_type == "sixth_layer":
        return encoded_layers[5]
    elif embed_type == "second_layer":
        return encoded_layers[1]
    elif embed_type == "first_and_last_layer":
        return jnp.concatenate((encoded_layers[0], encoded_layers[-1]), axis=-1)
    else:
        raise ValueError("embed_type must be one of [pooled_output, last_layer, "
                         "last_four_layers, sixth_layer, second_layer, "
                         "first_and_last_layer]")


# ----------------------------- demo / smoke test -----------------------------

if __name__ == "__main__":
    # hidden=256 / 4 heads gives Dh=64, so the 128-lane head-pair attention
    # path (2 heads per grid step) is exercised, matching real BERT geometry.
    cfg = dict(vocab_size=50, hidden=256, num_heads=4, num_layers=4,
               intermediate=512, max_pos=32, type_vocab=2)

    key = jax.random.PRNGKey(0)
    pkey, ikey, tkey = jax.random.split(key, 3)
    params = init_bert_params(pkey, cfg)

    B, S = 2, 16
    input_ids = jax.random.randint(ikey, (B, S), 0, cfg["vocab_size"], dtype=jnp.int32)
    token_type_ids = jax.random.randint(tkey, (B, S), 0, cfg["type_vocab"], dtype=jnp.int32)
    attention_mask = jnp.ones((B, S), dtype=jnp.int32)

    fwd_last4 = jax.jit(lambda p, ids, tt, am: bert_for_pass_embedding(
        p, cfg, ids, tt, am, embed_type="last_four_layers"))
    fwd_pooled = jax.jit(lambda p, ids, tt, am: bert_for_pass_embedding(
        p, cfg, ids, tt, am, embed_type="pooled_output"))

    out_last4 = jax.block_until_ready(
        fwd_last4(params, input_ids, token_type_ids, attention_mask))
    out_pooled = jax.block_until_ready(
        fwd_pooled(params, input_ids, token_type_ids, attention_mask))

    assert out_last4.shape == (B, S, 4 * cfg["hidden"])
    assert out_pooled.shape == (B, cfg["hidden"])
    assert bool(jnp.all(jnp.isfinite(out_last4)))
    assert bool(jnp.all(jnp.isfinite(out_pooled)))

    print("KERNEL_OK")
</pallas_src>

<mosaic_0001>
module attributes {stable_mosaic.version = 11 : i64} {
  func.func @_embed_ln_kernel(%arg0: i32, %arg1: i32, %arg2: memref<1x16x256xf32, #tpu.memory_space<vmem>>, %arg3: memref<1x16x256xf32, #tpu.memory_space<vmem>>, %arg4: memref<16x256xf32, #tpu.memory_space<vmem>>, %arg5: memref<1x256xf32, #tpu.memory_space<vmem>>, %arg6: memref<1x256xf32, #tpu.memory_space<vmem>>, %arg7: memref<1x16x256xf32, #tpu.memory_space<vmem>>) attributes {dimension_semantics = [#tpu.dimension_semantics<parallel>, #tpu.dimension_semantics<parallel>], iteration_bounds = array<i64: 2, 1>, scalar_prefetch = 0 : i64, scratch_operands = 0 : i64, tpu.core_type = #tpu.core_type<tc>, window_params = [{transform_indices = @transform_0, window_bounds = array<i64: 1, 16, 256>}, {transform_indices = @transform_1, window_bounds = array<i64: 1, 16, 256>}, {transform_indices = @transform_2, window_bounds = array<i64: 16, 256>}, {pipeline_mode = #tpu.pipeline_mode<synchronous>, transform_indices = @transform_3, window_bounds = array<i64: 1, 256>}, {pipeline_mode = #tpu.pipeline_mode<synchronous>, transform_indices = @transform_4, window_bounds = array<i64: 1, 256>}, {transform_indices = @transform_5, window_bounds = array<i64: 1, 16, 256>}]} {
    %c0 = arith.constant 0 : index
    %c0_0 = arith.constant 0 : index
    %c0_1 = arith.constant 0 : index
    %0 = vector.load %arg2[%c0, %c0_0, %c0_1] : memref<1x16x256xf32, #tpu.memory_space<vmem>>, vector<1x16x256xf32>
    %1 = vector.shape_cast %0 : vector<1x16x256xf32> to vector<16x256xf32>
    %c0_2 = arith.constant 0 : index
    %c0_3 = arith.constant 0 : index
    %c0_4 = arith.constant 0 : index
    %2 = vector.load %arg3[%c0_2, %c0_3, %c0_4] : memref<1x16x256xf32, #tpu.memory_space<vmem>>, vector<1x16x256xf32>
    %3 = vector.shape_cast %2 : vector<1x16x256xf32> to vector<16x256xf32>
    %4 = arith.addf %1, %3 : vector<16x256xf32>
    %c0_5 = arith.constant 0 : index
    %c0_6 = arith.constant 0 : index
    %5 = vector.load %arg4[%c0_5, %c0_6] : memref<16x256xf32, #tpu.memory_space<vmem>>, vector<16x256xf32>
    %6 = arith.addf %4, %5 : vector<16x256xf32>
    %cst = arith.constant dense<0.000000e+00> : vector<16xf32>
    %7 = vector.multi_reduction <add>, %6, %cst [1] : vector<16x256xf32> to vector<16xf32>
    %8 = vector.shape_cast %7 : vector<16xf32> to vector<16x1xf32>
    %cst_7 = arith.constant 2.560000e+02 : f32
    %9 = vector.broadcast %cst_7 : f32 to vector<16x1xf32>
    %10 = arith.divf %8, %9 : vector<16x1xf32>
    %11 = vector.broadcast %10 : vector<16x1xf32> to vector<16x256xf32>
    %12 = arith.subf %6, %11 : vector<16x256xf32>
    %13 = arith.mulf %12, %12 : vector<16x256xf32>
    %cst_8 = arith.constant dense<0.000000e+00> : vector<16xf32>
    %14 = vector.multi_reduction <add>, %13, %cst_8 [1] : vector<16x256xf32> to vector<16xf32>
    %15 = vector.shape_cast %14 : vector<16xf32> to vector<16x1xf32>
    %cst_9 = arith.constant 2.560000e+02 : f32
    %16 = vector.broadcast %cst_9 : f32 to vector<16x1xf32>
    %17 = arith.divf %15, %16 : vector<16x1xf32>
    %cst_10 = arith.constant 9.99999996E-13 : f32
    %18 = vector.broadcast %cst_10 : f32 to vector<16x1xf32>
    %19 = arith.addf %17, %18 : vector<16x1xf32>
    %20 = math.rsqrt %19 : vector<16x1xf32>
    %21 = vector.broadcast %20 : vector<16x1xf32> to vector<16x256xf32>
    %22 = arith.mulf %12, %21 : vector<16x256xf32>
    %c0_11 = arith.constant 0 : index
    %c0_12 = arith.constant 0 : index
    %23 = vector.load %arg5[%c0_11, %c0_12] : memref<1x256xf32, #tpu.memory_space<vmem>>, vector<1x256xf32>
    %24 = vector.broadcast %23 : vector<1x256xf32> to vector<16x256xf32>
    %25 = arith.mulf %22, %24 : vector<16x256xf32>
    %c0_13 = arith.constant 0 : index
    %c0_14 = arith.constant 0 : index
    %26 = vector.load %arg6[%c0_13, %c0_14] : memref<1x256xf32, #tpu.memory_space<vmem>>, vector<1x256xf32>
    %27 = vector.broadcast %26 : vector<1x256xf32> to vector<16x256xf32>
    %28 = arith.addf %25, %27 : vector<16x256xf32>
    %c0_15 = arith.constant 0 : index
    %c0_16 = arith.constant 0 : index
    %c0_17 = arith.constant 0 : index
    %29 = vector.load %arg7[%c0_15, %c0_16, %c0_17] : memref<1x16x256xf32, #tpu.memory_space<vmem>>, vector<1x16x256xf32>
    %30 = vector.shape_cast %29 : vector<1x16x256xf32> to vector<16x256xf32>
    %31 = vector.shape_cast %28 : vector<16x256xf32> to vector<1x16x256xf32>
    tpu.vector_store %arg7[%c0_15, %c0_16, %c0_17], %31 {strides = array<i32>} : memref<1x16x256xf32, #tpu.memory_space<vmem>>, vector<1x16x256xf32>,
    return
  }
  func.func @transform_0(%arg0: i32, %arg1: i32) -> (i32, i32, i32) {
    %c0_i32 = arith.constant 0 : i32
    %c0_i32_0 = arith.constant 0 : i32
    return %arg0, %arg1, %c0_i32 : i32, i32, i32
  }
  func.func @transform_1(%arg0: i32, %arg1: i32) -> (i32, i32, i32) {
    %c0_i32 = arith.constant 0 : i32
    %c0_i32_0 = arith.constant 0 : i32
    return %arg0, %arg1, %c0_i32 : i32, i32, i32
  }
  func.func @transform_2(%arg0: i32, %arg1: i32) -> (i32, i32) {
    %c0_i32 = arith.constant 0 : i32
    %c0_i32_0 = arith.constant 0 : i32
    return %arg1, %c0_i32 : i32, i32
  }
  func.func @transform_3(%arg0: i32, %arg1: i32) -> (i32, i32) {
    %c0_i32 = arith.constant 0 : i32
    %c0_i32_0 = arith.constant 0 : i32
    %c0_i32_1 = arith.constant 0 : i32
    return %c0_i32, %c0_i32_0 : i32, i32
  }
  func.func @transform_4(%arg0: i32, %arg1: i32) -> (i32, i32) {
    %c0_i32 = arith.constant 0 : i32
    %c0_i32_0 = arith.constant 0 : i32
    %c0_i32_1 = arith.constant 0 : i32
    return %c0_i32, %c0_i32_0 : i32, i32
  }
  func.func @transform_5(%arg0: i32, %arg1: i32) -> (i32, i32, i32) {
    %c0_i32 = arith.constant 0 : i32
    %c0_i32_0 = arith.constant 0 : i32
    return %arg0, %arg1, %c0_i32 : i32, i32, i32
  }
}

module attributes {stable_mosaic.version = 11 : i64} {
  func.func @_dense_kernel_k1(%arg0: i32, %arg1: i32, %arg2: memref<32x256xbf16, #tpu.memory_space<vmem>>, %arg3: memref<256x768xbf16, #tpu.memory_space<vmem>>, %arg4: memref<1x768xf32, #tpu.memory_space<vmem>>, %arg5: memref<32x768xbf16, #tpu.memory_space<vmem>>) attributes {dimension_semantics = [#tpu.dimension_semantics<parallel>, #tpu.dimension_semantics<parallel>], iteration_bounds = array<i64: 1, 1>, scalar_prefetch = 0 : i64, scratch_operands = 0 : i64, tpu.core_type = #tpu.core_type<tc>, window_params = [{transform_indices = @transform_0, window_bounds = array<i64: 32, 256>}, {transform_indices = @transform_1, window_bounds = array<i64: 256, 768>}, {transform_indices = @transform_2, window_bounds = array<i64: 1, 768>}, {transform_indices = @transform_3, window_bounds = array<i64: 32, 768>}]} {
    %c0 = arith.constant 0 : index
    %c0_0 = arith.constant 0 : index
    %0 = vector.load %arg2[%c0, %c0_0] : memref<32x256xbf16, #tpu.memory_space<vmem>>, vector<32x256xbf16>
    %c0_1 = arith.constant 0 : index
    %c0_2 = arith.constant 0 : index
    %1 = vector.load %arg3[%c0_1, %c0_2] : memref<256x768xbf16, #tpu.memory_space<vmem>>, vector<256x768xbf16>
    %cst = arith.constant dense<0.000000e+00> : vector<32x768xf32>
    %2 = tpu.matmul %0, %1, %cst {dimension_numbers = #tpu.dot_dimension_numbers<[1], [0], [0], [1], [0, 0, 1, 1], [], []>} : vector<32x256xbf16>, vector<256x768xbf16>, vector<32x768xf32> -> vector<32x768xf32>
    %c0_3 = arith.constant 0 : index
    %c0_4 = arith.constant 0 : index
    %3 = vector.load %arg4[%c0_3, %c0_4] : memref<1x768xf32, #tpu.memory_space<vmem>>, vector<1x768xf32>
    %4 = vector.broadcast %3 : vector<1x768xf32> to vector<32x768xf32>
    %5 = arith.addf %2, %4 : vector<32x768xf32>
    %6 = arith.truncf %5 : vector<32x768xf32> to vector<32x768xbf16>
    %c0_5 = arith.constant 0 : index
    %c0_6 = arith.constant 0 : index
    %7 = vector.load %arg5[%c0_5, %c0_6] : memref<32x768xbf16, #tpu.memory_space<vmem>>, vector<32x768xbf16>
    tpu.vector_store %arg5[%c0_5, %c0_6], %6 {strides = array<i32>} : memref<32x768xbf16, #tpu.memory_space<vmem>>, vector<32x768xbf16>,
    return
  }
  func.func @transform_0(%arg0: i32, %arg1: i32) -> (i32, i32) {
    %c0_i32 = arith.constant 0 : i32
    %c0_i32_0 = arith.constant 0 : i32
    return %arg0, %c0_i32 : i32, i32
  }
  func.func @transform_1(%arg0: i32, %arg1: i32) -> (i32, i32) {
    %c0_i32 = arith.constant 0 : i32
    %c0_i32_0 = arith.constant 0 : i32
    return %c0_i32, %arg1 : i32, i32
  }
  func.func @transform_2(%arg0: i32, %arg1: i32) -> (i32, i32) {
    %c0_i32 = arith.constant 0 : i32
    %c0_i32_0 = arith.constant 0 : i32
    return %c0_i32, %arg1 : i32, i32
  }
  func.func @transform_3(%arg0: i32, %arg1: i32) -> (i32, i32) {
    %c0_i32 = arith.constant 0 : i32
    return %arg0, %arg1 : i32, i32
  }
}

module attributes {stable_mosaic.version = 11 : i64} {
  func.func @_attn_blocked_kernel(%arg0: i32, %arg1: i32, %arg2: i32, %arg3: memref<1x16x128xbf16, #tpu.memory_space<vmem>>, %arg4: memref<1x16x128xbf16, #tpu.memory_space<vmem>>, %arg5: memref<1x16x128xbf16, #tpu.memory_space<vmem>>, %arg6: memref<1x1x16xf32, #tpu.memory_space<vmem>>, %arg7: memref<1x16x128xbf16, #tpu.memory_space<vmem>>) attributes {dimension_semantics = [#tpu.dimension_semantics<parallel>, #tpu.dimension_semantics<parallel>, #tpu.dimension_semantics<parallel>], iteration_bounds = array<i64: 2, 2, 1>, scalar_prefetch = 0 : i64, scratch_operands = 0 : i64, tpu.core_type = #tpu.core_type<tc>, window_params = [{transform_indices = @transform_0, window_bounds = array<i64: 1, 16, 128>}, {transform_indices = @transform_1, window_bounds = array<i64: 1, 16, 128>}, {transform_indices = @transform_2, window_bounds = array<i64: 1, 16, 128>}, {transform_indices = @transform_3, window_bounds = array<i64: 1, 1, 16>}, {transform_indices = @transform_4, window_bounds = array<i64: 1, 16, 128>}]} {
    %c0 = arith.constant 0 : index
    %c0_0 = arith.constant 0 : index
    %c0_1 = arith.constant 0 : index
    %0 = vector.load %arg6[%c0, %c0_0, %c0_1] : memref<1x1x16xf32, #tpu.memory_space<vmem>>, vector<1x1x16xf32>
    %1 = vector.shape_cast %0 : vector<1x1x16xf32> to vector<1x16xf32>
    %c0_2 = arith.constant 0 : index
    %c0_3 = arith.constant 0 : index
    %c0_4 = arith.constant 0 : index
    %2 = vector.load %arg3[%c0_2, %c0_3, %c0_4] : memref<1x16x128xbf16, #tpu.memory_space<vmem>>, vector<1x16x64xbf16>
    %3 = vector.shape_cast %2 : vector<1x16x64xbf16> to vector<16x64xbf16>
    %cst = arith.constant 1.250000e-01 : bf16
    %4 = vector.broadcast %cst : bf16 to vector<16x64xbf16>
    %5 = arith.mulf %3, %4 : vector<16x64xbf16>
    %c0_5 = arith.constant 0 : index
    %c0_6 = arith.constant 0 : index
    %c0_7 = arith.constant 0 : index
    %6 = vector.load %arg4[%c0_5, %c0_6, %c0_7] : memref<1x16x128xbf16, #tpu.memory_space<vmem>>, vector<1x16x64xbf16>
    %7 = vector.shape_cast %6 : vector<1x16x64xbf16> to vector<16x64xbf16>
    %c0_8 = arith.constant 0 : index
    %c0_9 = arith.constant 0 : index
    %c0_10 = arith.constant 0 : index
    %8 = vector.load %arg5[%c0_8, %c0_9, %c0_10] : memref<1x16x128xbf16, #tpu.memory_space<vmem>>, vector<1x16x64xbf16>
    %9 = vector.shape_cast %8 : vector<1x16x64xbf16> to vector<16x64xbf16>
    %cst_11 = arith.constant dense<0.000000e+00> : vector<16x16xf32>
    %10 = tpu.matmul %5, %7, %cst_11 {dimension_numbers = #tpu.dot_dimension_numbers<[1], [1], [0], [0], [0, 0, 1, 0], [], []>} : vector<16x64xbf16>, vector<16x64xbf16>, vector<16x16xf32> -> vector<16x16xf32>
    %11 = vector.broadcast %1 : vector<1x16xf32> to vector<16x16xf32>
    %12 = arith.addf %10, %11 : vector<16x16xf32>
    %cst_12 = arith.constant dense<0xFF800000> : vector<16xf32>
    %13 = vector.multi_reduction <maximumf>, %12, %cst_12 [1] : vector<16x16xf32> to vector<16xf32>
    %14 = vector.shape_cast %13 : vector<16xf32> to vector<16x1xf32>
    %15 = vector.broadcast %14 : vector<16x1xf32> to vector<16x16xf32>
    %16 = arith.subf %12, %15 : vector<16x16xf32>
    %17 = math.exp %16 : vector<16x16xf32>
    %cst_13 = arith.constant dense<0.000000e+00> : vector<16xf32>
    %18 = vector.multi_reduction <add>, %17, %cst_13 [1] : vector<16x16xf32> to vector<16xf32>
    %19 = vector.shape_cast %18 : vector<16xf32> to vector<16x1xf32>
    %20 = tpu.reciprocal %19 {approx = true} : vector<16x1xf32> -> vector<16x1xf32>
    %21 = vector.broadcast %20 : vector<16x1xf32> to vector<16x16xf32>
    %22 = arith.mulf %17, %21 : vector<16x16xf32>
    %23 = arith.truncf %22 : vector<16x16xf32> to vector<16x16xbf16>
    %cst_14 = arith.constant dense<0.000000e+00> : vector<16x64xf32>
    %24 = tpu.matmul %23, %9, %cst_14 {dimension_numbers = #tpu.dot_dimension_numbers<[1], [0], [0], [1], [0, 0, 1, 1], [], []>} : vector<16x16xbf16>, vector<16x64xbf16>, vector<16x64xf32> -> vector<16x64xf32>
    %25 = arith.truncf %24 : vector<16x64xf32> to vector<16x64xbf16>
    %c0_15 = arith.constant 0 : index
    %c0_16 = arith.constant 0 : index
    %c0_17 = arith.constant 0 : index
    %26 = vector.load %arg7[%c0_15, %c0_16, %c0_17] : memref<1x16x128xbf16, #tpu.memory_space<vmem>>, vector<1x16x64xbf16>
    %27 = vector.shape_cast %26 : vector<1x16x64xbf16> to vector<16x64xbf16>
    %28 = vector.shape_cast %25 : vector<16x64xbf16> to vector<1x16x64xbf16>
    tpu.vector_store %arg7[%c0_15, %c0_16, %c0_17], %28 {strides = array<i32>} : memref<1x16x128xbf16, #tpu.memory_space<vmem>>, vector<1x16x64xbf16>,
    %c0_18 = arith.constant 0 : index
    %c0_19 = arith.constant 0 : index
    %c64 = arith.constant 64 : index
    %29 = vector.load %arg3[%c0_18, %c0_19, %c64] : memref<1x16x128xbf16, #tpu.memory_space<vmem>>, vector<1x16x64xbf16>
    %30 = vector.shape_cast %29 : vector<1x16x64xbf16> to vector<16x64xbf16>
    %cst_20 = arith.constant 1.250000e-01 : bf16
    %31 = vector.broadcast %cst_20 : bf16 to vector<16x64xbf16>
    %32 = arith.mulf %30, %31 : vector<16x64xbf16>
    %c0_21 = arith.constant 0 : index
    %c0_22 = arith.constant 0 : index
    %c64_23 = arith.constant 64 : index
    %33 = vector.load %arg4[%c0_21, %c0_22, %c64_23] : memref<1x16x128xbf16, #tpu.memory_space<vmem>>, vector<1x16x64xbf16>
    %34 = vector.shape_cast %33 : vector<1x16x64xbf16> to vector<16x64xbf16>
    %c0_24 = arith.constant 0 : index
    %c0_25 = arith.constant 0 : index
    %c64_26 = arith.constant 64 : index
    %35 = vector.load %arg5[%c0_24, %c0_25, %c64_26] : memref<1x16x128xbf16, #tpu.memory_space<vmem>>, vector<1x16x64xbf16>
    %36 = vector.shape_cast %35 : vector<1x16x64xbf16> to vector<16x64xbf16>
    %cst_27 = arith.constant dense<0.000000e+00> : vector<16x16xf32>
    %37 = tpu.matmul %32, %34, %cst_27 {dimension_numbers = #tpu.dot_dimension_numbers<[1], [1], [0], [0], [0, 0, 1, 0], [], []>} : vector<16x64xbf16>, vector<16x64xbf16>, vector<16x16xf32> -> vector<16x16xf32>
    %38 = vector.broadcast %1 : vector<1x16xf32> to vector<16x16xf32>
    %39 = arith.addf %37, %38 : vector<16x16xf32>
    %cst_28 = arith.constant dense<0xFF800000> : vector<16xf32>
    %40 = vector.multi_reduction <maximumf>, %39, %cst_28 [1] : vector<16x16xf32> to vector<16xf32>
    %41 = vector.shape_cast %40 : vector<16xf32> to vector<16x1xf32>
    %42 = vector.broadcast %41 : vector<16x1xf32> to vector<16x16xf32>
    %43 = arith.subf %39, %42 : vector<16x16xf32>
    %44 = math.exp %43 : vector<16x16xf32>
    %cst_29 = arith.constant dense<0.000000e+00> : vector<16xf32>
    %45 = vector.multi_reduction <add>, %44, %cst_29 [1] : vector<16x16xf32> to vector<16xf32>
    %46 = vector.shape_cast %45 : vector<16xf32> to vector<16x1xf32>
    %47 = tpu.reciprocal %46 {approx = true} : vector<16x1xf32> -> vector<16x1xf32>
    %48 = vector.broadcast %47 : vector<16x1xf32> to vector<16x16xf32>
    %49 = arith.mulf %44, %48 : vector<16x16xf32>
    %50 = arith.truncf %49 : vector<16x16xf32> to vector<16x16xbf16>
    %cst_30 = arith.constant dense<0.000000e+00> : vector<16x64xf32>
    %51 = tpu.matmul %50, %36, %cst_30 {dimension_numbers = #tpu.dot_dimension_numbers<[1], [0], [0], [1], [0, 0, 1, 1], [], []>} : vector<16x16xbf16>, vector<16x64xbf16>, vector<16x64xf32> -> vector<16x64xf32>
    %52 = arith.truncf %51 : vector<16x64xf32> to vector<16x64xbf16>
    %c0_31 = arith.constant 0 : index
    %c0_32 = arith.constant 0 : index
    %c64_33 = arith.constant 64 : index
    %53 = vector.load %arg7[%c0_31, %c0_32, %c64_33] : memref<1x16x128xbf16, #tpu.memory_space<vmem>>, vector<1x16x64xbf16>
    %54 = vector.shape_cast %53 : vector<1x16x64xbf16> to vector<16x64xbf16>
    %55 = vector.shape_cast %52 : vector<16x64xbf16> to vector<1x16x64xbf16>
    tpu.vector_store %arg7[%c0_31, %c0_32, %c64_33], %55 {strides = array<i32>} : memref<1x16x128xbf16, #tpu.memory_space<vmem>>, vector<1x16x64xbf16>,
    return
  }
  func.func @transform_0(%arg0: i32, %arg1: i32, %arg2: i32) -> (i32, i32, i32) {
    %c0_i32 = arith.constant 0 : i32
    return %arg0, %arg2, %arg1 : i32, i32, i32
  }
  func.func @transform_1(%arg0: i32, %arg1: i32, %arg2: i32) -> (i32, i32, i32) {
    %c2_i32 = arith.constant 2 : i32
    %0 = arith.addi %c2_i32, %arg1 : i32
    %c0_i32 = arith.constant 0 : i32
    %c0_i32_0 = arith.constant 0 : i32
    return %arg0, %c0_i32, %0 : i32, i32, i32
  }
  func.func @transform_2(%arg0: i32, %arg1: i32, %arg2: i32) -> (i32, i32, i32) {
    %c4_i32 = arith.constant 4 : i32
    %0 = arith.addi %c4_i32, %arg1 : i32
    %c0_i32 = arith.constant 0 : i32
    %c0_i32_0 = arith.constant 0 : i32
    return %arg0, %c0_i32, %0 : i32, i32, i32
  }
  func.func @transform_3(%arg0: i32, %arg1: i32, %arg2: i32) -> (i32, i32, i32) {
    %c0_i32 = arith.constant 0 : i32
    %c0_i32_0 = arith.constant 0 : i32
    %c0_i32_1 = arith.constant 0 : i32
    return %arg0, %c0_i32, %c0_i32_0 : i32, i32, i32
  }
  func.func @transform_4(%arg0: i32, %arg1: i32, %arg2: i32) -> (i32, i32, i32) {
    %c0_i32 = arith.constant 0 : i32
    return %arg0, %arg2, %arg1 : i32, i32, i32
  }
}

module attributes {stable_mosaic.version = 11 : i64} {
  func.func @_dense_add_ln_kernel_k1(%arg0: i32, %arg1: memref<32x256xbf16, #tpu.memory_space<vmem>>, %arg2: memref<256x256xbf16, #tpu.memory_space<vmem>>, %arg3: memref<1x256xf32, #tpu.memory_space<vmem>>, %arg4: memref<32x256xf32, #tpu.memory_space<vmem>>, %arg5: memref<1x256xf32, #tpu.memory_space<vmem>>, %arg6: memref<1x256xf32, #tpu.memory_space<vmem>>, %arg7: memref<32x256xf32, #tpu.memory_space<vmem>>) attributes {dimension_semantics = [#tpu.dimension_semantics<parallel>], iteration_bounds = array<i64: 1>, scalar_prefetch = 0 : i64, scratch_operands = 0 : i64, tpu.core_type = #tpu.core_type<tc>, window_params = [{transform_indices = @transform_0, window_bounds = array<i64: 32, 256>}, {pipeline_mode = #tpu.pipeline_mode<synchronous>, transform_indices = @transform_1, window_bounds = array<i64: 256, 256>}, {pipeline_mode = #tpu.pipeline_mode<synchronous>, transform_indices = @transform_2, window_bounds = array<i64: 1, 256>}, {transform_indices = @transform_3, window_bounds = array<i64: 32, 256>}, {pipeline_mode = #tpu.pipeline_mode<synchronous>, transform_indices = @transform_4, window_bounds = array<i64: 1, 256>}, {pipeline_mode = #tpu.pipeline_mode<synchronous>, transform_indices = @transform_5, window_bounds = array<i64: 1, 256>}, {transform_indices = @transform_6, window_bounds = array<i64: 32, 256>}]} {
    %c0 = arith.constant 0 : index
    %c0_0 = arith.constant 0 : index
    %0 = vector.load %arg1[%c0, %c0_0] : memref<32x256xbf16, #tpu.memory_space<vmem>>, vector<32x256xbf16>
    %c0_1 = arith.constant 0 : index
    %c0_2 = arith.constant 0 : index
    %1 = vector.load %arg2[%c0_1, %c0_2] : memref<256x256xbf16, #tpu.memory_space<vmem>>, vector<256x256xbf16>
    %cst = arith.constant dense<0.000000e+00> : vector<32x256xf32>
    %2 = tpu.matmul %0, %1, %cst {dimension_numbers = #tpu.dot_dimension_numbers<[1], [0], [0], [1], [0, 0, 1, 1], [], []>} : vector<32x256xbf16>, vector<256x256xbf16>, vector<32x256xf32> -> vector<32x256xf32>
    %c0_3 = arith.constant 0 : index
    %c0_4 = arith.constant 0 : index
    %3 = vector.load %arg3[%c0_3, %c0_4] : memref<1x256xf32, #tpu.memory_space<vmem>>, vector<1x256xf32>
    %4 = vector.broadcast %3 : vector<1x256xf32> to vector<32x256xf32>
    %5 = arith.addf %2, %4 : vector<32x256xf32>
    %c0_5 = arith.constant 0 : index
    %c0_6 = arith.constant 0 : index
    %6 = vector.load %arg4[%c0_5, %c0_6] : memref<32x256xf32, #tpu.memory_space<vmem>>, vector<32x256xf32>
    %7 = arith.addf %5, %6 : vector<32x256xf32>
    %cst_7 = arith.constant dense<0.000000e+00> : vector<32xf32>
    %8 = vector.multi_reduction <add>, %7, %cst_7 [1] : vector<32x256xf32> to vector<32xf32>
    %9 = vector.shape_cast %8 : vector<32xf32> to vector<32x1xf32>
    %cst_8 = arith.constant 2.560000e+02 : f32
    %10 = vector.broadcast %cst_8 : f32 to vector<32x1xf32>
    %11 = arith.divf %9, %10 : vector<32x1xf32>
    %12 = vector.broadcast %11 : vector<32x1xf32> to vector<32x256xf32>
    %13 = arith.subf %7, %12 : vector<32x256xf32>
    %14 = arith.mulf %13, %13 : vector<32x256xf32>
    %cst_9 = arith.constant dense<0.000000e+00> : vector<32xf32>
    %15 = vector.multi_reduction <add>, %14, %cst_9 [1] : vector<32x256xf32> to vector<32xf32>
    %16 = vector.shape_cast %15 : vector<32xf32> to vector<32x1xf32>
    %cst_10 = arith.constant 2.560000e+02 : f32
    %17 = vector.broadcast %cst_10 : f32 to vector<32x1xf32>
    %18 = arith.divf %16, %17 : vector<32x1xf32>
    %cst_11 = arith.constant 9.99999996E-13 : f32
    %19 = vector.broadcast %cst_11 : f32 to vector<32x1xf32>
    %20 = arith.addf %18, %19 : vector<32x1xf32>
    %21 = math.rsqrt %20 : vector<32x1xf32>
    %22 = vector.broadcast %21 : vector<32x1xf32> to vector<32x256xf32>
    %23 = arith.mulf %13, %22 : vector<32x256xf32>
    %c0_12 = arith.constant 0 : index
    %c0_13 = arith.constant 0 : index
    %24 = vector.load %arg5[%c0_12, %c0_13] : memref<1x256xf32, #tpu.memory_space<vmem>>, vector<1x256xf32>
    %25 = vector.broadcast %24 : vector<1x256xf32> to vector<32x256xf32>
    %26 = arith.mulf %23, %25 : vector<32x256xf32>
    %c0_14 = arith.constant 0 : index
    %c0_15 = arith.constant 0 : index
    %27 = vector.load %arg6[%c0_14, %c0_15] : memref<1x256xf32, #tpu.memory_space<vmem>>, vector<1x256xf32>
    %28 = vector.broadcast %27 : vector<1x256xf32> to vector<32x256xf32>
    %29 = arith.addf %26, %28 : vector<32x256xf32>
    %c0_16 = arith.constant 0 : index
    %c0_17 = arith.constant 0 : index
    %30 = vector.load %arg7[%c0_16, %c0_17] : memref<32x256xf32, #tpu.memory_space<vmem>>, vector<32x256xf32>
    tpu.vector_store %arg7[%c0_16, %c0_17], %29 {strides = array<i32>} : memref<32x256xf32, #tpu.memory_space<vmem>>, vector<32x256xf32>,
    return
  }
  func.func @transform_0(%arg0: i32) -> (i32, i32) {
    %c0_i32 = arith.constant 0 : i32
    %c0_i32_0 = arith.constant 0 : i32
    return %arg0, %c0_i32 : i32, i32
  }
  func.func @transform_1(%arg0: i32) -> (i32, i32) {
    %c0_i32 = arith.constant 0 : i32
    %c0_i32_0 = arith.constant 0 : i32
    %c0_i32_1 = arith.constant 0 : i32
    return %c0_i32, %c0_i32_0 : i32, i32
  }
  func.func @transform_2(%arg0: i32) -> (i32, i32) {
    %c0_i32 = arith.constant 0 : i32
    %c0_i32_0 = arith.constant 0 : i32
    %c0_i32_1 = arith.constant 0 : i32
    return %c0_i32, %c0_i32_0 : i32, i32
  }
  func.func @transform_3(%arg0: i32) -> (i32, i32) {
    %c0_i32 = arith.constant 0 : i32
    %c0_i32_0 = arith.constant 0 : i32
    return %arg0, %c0_i32 : i32, i32
  }
  func.func @transform_4(%arg0: i32) -> (i32, i32) {
    %c0_i32 = arith.constant 0 : i32
    %c0_i32_0 = arith.constant 0 : i32
    %c0_i32_1 = arith.constant 0 : i32
    return %c0_i32, %c0_i32_0 : i32, i32
  }
  func.func @transform_5(%arg0: i32) -> (i32, i32) {
    %c0_i32 = arith.constant 0 : i32
    %c0_i32_0 = arith.constant 0 : i32
    %c0_i32_1 = arith.constant 0 : i32
    return %c0_i32, %c0_i32_0 : i32, i32
  }
  func.func @transform_6(%arg0: i32) -> (i32, i32) {
    %c0_i32 = arith.constant 0 : i32
    %c0_i32_0 = arith.constant 0 : i32
    return %arg0, %c0_i32 : i32, i32
  }
}

module attributes {stable_mosaic.version = 11 : i64} {
  func.func @_dense_kernel_k1(%arg0: i32, %arg1: i32, %arg2: memref<32x256xbf16, #tpu.memory_space<vmem>>, %arg3: memref<256x512xbf16, #tpu.memory_space<vmem>>, %arg4: memref<1x512xf32, #tpu.memory_space<vmem>>, %arg5: memref<32x512xbf16, #tpu.memory_space<vmem>>) attributes {dimension_semantics = [#tpu.dimension_semantics<parallel>, #tpu.dimension_semantics<parallel>], iteration_bounds = array<i64: 1, 1>, scalar_prefetch = 0 : i64, scratch_operands = 0 : i64, tpu.core_type = #tpu.core_type<tc>, window_params = [{transform_indices = @transform_0, window_bounds = array<i64: 32, 256>}, {transform_indices = @transform_1, window_bounds = array<i64: 256, 512>}, {transform_indices = @transform_2, window_bounds = array<i64: 1, 512>}, {transform_indices = @transform_3, window_bounds = array<i64: 32, 512>}]} {
    %c0 = arith.constant 0 : index
    %c0_0 = arith.constant 0 : index
    %0 = vector.load %arg2[%c0, %c0_0] : memref<32x256xbf16, #tpu.memory_space<vmem>>, vector<32x256xbf16>
    %c0_1 = arith.constant 0 : index
    %c0_2 = arith.constant 0 : index
    %1 = vector.load %arg3[%c0_1, %c0_2] : memref<256x512xbf16, #tpu.memory_space<vmem>>, vector<256x512xbf16>
    %cst = arith.constant dense<0.000000e+00> : vector<32x512xf32>
    %2 = tpu.matmul %0, %1, %cst {dimension_numbers = #tpu.dot_dimension_numbers<[1], [0], [0], [1], [0, 0, 1, 1], [], []>} : vector<32x256xbf16>, vector<256x512xbf16>, vector<32x512xf32> -> vector<32x512xf32>
    %c0_3 = arith.constant 0 : index
    %c0_4 = arith.constant 0 : index
    %3 = vector.load %arg4[%c0_3, %c0_4] : memref<1x512xf32, #tpu.memory_space<vmem>>, vector<1x512xf32>
    %4 = vector.broadcast %3 : vector<1x512xf32> to vector<32x512xf32>
    %5 = arith.addf %2, %4 : vector<32x512xf32>
    %cst_5 = arith.constant 5.000000e-01 : f32
    %6 = vector.broadcast %cst_5 : f32 to vector<32x512xf32>
    %7 = arith.mulf %6, %5 : vector<32x512xf32>
    %cst_6 = arith.constant 4.471500e-02 : f32
    %8 = vector.broadcast %cst_6 : f32 to vector<32x512xf32>
    %9 = arith.mulf %8, %5 : vector<32x512xf32>
    %10 = arith.mulf %9, %5 : vector<32x512xf32>
    %11 = arith.mulf %10, %5 : vector<32x512xf32>
    %12 = arith.addf %5, %11 : vector<32x512xf32>
    %cst_7 = arith.constant 0.797884583 : f32
    %13 = vector.broadcast %cst_7 : f32 to vector<32x512xf32>
    %14 = arith.mulf %13, %12 : vector<32x512xf32>
    %15 = math.tanh %14 : vector<32x512xf32>
    %cst_8 = arith.constant 1.000000e+00 : f32
    %16 = vector.broadcast %cst_8 : f32 to vector<32x512xf32>
    %17 = arith.addf %16, %15 : vector<32x512xf32>
    %18 = arith.mulf %7, %17 : vector<32x512xf32>
    %19 = arith.truncf %18 : vector<32x512xf32> to vector<32x512xbf16>
    %c0_9 = arith.constant 0 : index
    %c0_10 = arith.constant 0 : index
    %20 = vector.load %arg5[%c0_9, %c0_10] : memref<32x512xbf16, #tpu.memory_space<vmem>>, vector<32x512xbf16>
    tpu.vector_store %arg5[%c0_9, %c0_10], %19 {strides = array<i32>} : memref<32x512xbf16, #tpu.memory_space<vmem>>, vector<32x512xbf16>,
    return
  }
  func.func @transform_0(%arg0: i32, %arg1: i32) -> (i32, i32) {
    %c0_i32 = arith.constant 0 : i32
    %c0_i32_0 = arith.constant 0 : i32
    return %arg0, %c0_i32 : i32, i32
  }
  func.func @transform_1(%arg0: i32, %arg1: i32) -> (i32, i32) {
    %c0_i32 = arith.constant 0 : i32
    %c0_i32_0 = arith.constant 0 : i32
    return %c0_i32, %arg1 : i32, i32
  }
  func.func @transform_2(%arg0: i32, %arg1: i32) -> (i32, i32) {
    %c0_i32 = arith.constant 0 : i32
    %c0_i32_0 = arith.constant 0 : i32
    return %c0_i32, %arg1 : i32, i32
  }
  func.func @transform_3(%arg0: i32, %arg1: i32) -> (i32, i32) {
    %c0_i32 = arith.constant 0 : i32
    return %arg0, %arg1 : i32, i32
  }
}

module attributes {stable_mosaic.version = 11 : i64} {
  func.func @_dense_add_ln_kernel_k1(%arg0: i32, %arg1: memref<32x512xbf16, #tpu.memory_space<vmem>>, %arg2: memref<512x256xbf16, #tpu.memory_space<vmem>>, %arg3: memref<1x256xf32, #tpu.memory_space<vmem>>, %arg4: memref<32x256xf32, #tpu.memory_space<vmem>>, %arg5: memref<1x256xf32, #tpu.memory_space<vmem>>, %arg6: memref<1x256xf32, #tpu.memory_space<vmem>>, %arg7: memref<32x256xf32, #tpu.memory_space<vmem>>) attributes {dimension_semantics = [#tpu.dimension_semantics<parallel>], iteration_bounds = array<i64: 1>, scalar_prefetch = 0 : i64, scratch_operands = 0 : i64, tpu.core_type = #tpu.core_type<tc>, window_params = [{transform_indices = @transform_0, window_bounds = array<i64: 32, 512>}, {pipeline_mode = #tpu.pipeline_mode<synchronous>, transform_indices = @transform_1, window_bounds = array<i64: 512, 256>}, {pipeline_mode = #tpu.pipeline_mode<synchronous>, transform_indices = @transform_2, window_bounds = array<i64: 1, 256>}, {transform_indices = @transform_3, window_bounds = array<i64: 32, 256>}, {pipeline_mode = #tpu.pipeline_mode<synchronous>, transform_indices = @transform_4, window_bounds = array<i64: 1, 256>}, {pipeline_mode = #tpu.pipeline_mode<synchronous>, transform_indices = @transform_5, window_bounds = array<i64: 1, 256>}, {transform_indices = @transform_6, window_bounds = array<i64: 32, 256>}]} {
    %c0 = arith.constant 0 : index
    %c0_0 = arith.constant 0 : index
    %0 = vector.load %arg1[%c0, %c0_0] : memref<32x512xbf16, #tpu.memory_space<vmem>>, vector<32x512xbf16>
    %c0_1 = arith.constant 0 : index
    %c0_2 = arith.constant 0 : index
    %1 = vector.load %arg2[%c0_1, %c0_2] : memref<512x256xbf16, #tpu.memory_space<vmem>>, vector<512x256xbf16>
    %cst = arith.constant dense<0.000000e+00> : vector<32x256xf32>
    %2 = tpu.matmul %0, %1, %cst {dimension_numbers = #tpu.dot_dimension_numbers<[1], [0], [0], [1], [0, 0, 1, 1], [], []>} : vector<32x512xbf16>, vector<512x256xbf16>, vector<32x256xf32> -> vector<32x256xf32>
    %c0_3 = arith.constant 0 : index
    %c0_4 = arith.constant 0 : index
    %3 = vector.load %arg3[%c0_3, %c0_4] : memref<1x256xf32, #tpu.memory_space<vmem>>, vector<1x256xf32>
    %4 = vector.broadcast %3 : vector<1x256xf32> to vector<32x256xf32>
    %5 = arith.addf %2, %4 : vector<32x256xf32>
    %c0_5 = arith.constant 0 : index
    %c0_6 = arith.constant 0 : index
    %6 = vector.load %arg4[%c0_5, %c0_6] : memref<32x256xf32, #tpu.memory_space<vmem>>, vector<32x256xf32>
    %7 = arith.addf %5, %6 : vector<32x256xf32>
    %cst_7 = arith.constant dense<0.000000e+00> : vector<32xf32>
    %8 = vector.multi_reduction <add>, %7, %cst_7 [1] : vector<32x256xf32> to vector<32xf32>
    %9 = vector.shape_cast %8 : vector<32xf32> to vector<32x1xf32>
    %cst_8 = arith.constant 2.560000e+02 : f32
    %10 = vector.broadcast %cst_8 : f32 to vector<32x1xf32>
    %11 = arith.divf %9, %10 : vector<32x1xf32>
    %12 = vector.broadcast %11 : vector<32x1xf32> to vector<32x256xf32>
    %13 = arith.subf %7, %12 : vector<32x256xf32>
    %14 = arith.mulf %13, %13 : vector<32x256xf32>
    %cst_9 = arith.constant dense<0.000000e+00> : vector<32xf32>
    %15 = vector.multi_reduction <add>, %14, %cst_9 [1] : vector<32x256xf32> to vector<32xf32>
    %16 = vector.shape_cast %15 : vector<32xf32> to vector<32x1xf32>
    %cst_10 = arith.constant 2.560000e+02 : f32
    %17 = vector.broadcast %cst_10 : f32 to vector<32x1xf32>
    %18 = arith.divf %16, %17 : vector<32x1xf32>
    %cst_11 = arith.constant 9.99999996E-13 : f32
    %19 = vector.broadcast %cst_11 : f32 to vector<32x1xf32>
    %20 = arith.addf %18, %19 : vector<32x1xf32>
    %21 = math.rsqrt %20 : vector<32x1xf32>
    %22 = vector.broadcast %21 : vector<32x1xf32> to vector<32x256xf32>
    %23 = arith.mulf %13, %22 : vector<32x256xf32>
    %c0_12 = arith.constant 0 : index
    %c0_13 = arith.constant 0 : index
    %24 = vector.load %arg5[%c0_12, %c0_13] : memref<1x256xf32, #tpu.memory_space<vmem>>, vector<1x256xf32>
    %25 = vector.broadcast %24 : vector<1x256xf32> to vector<32x256xf32>
    %26 = arith.mulf %23, %25 : vector<32x256xf32>
    %c0_14 = arith.constant 0 : index
    %c0_15 = arith.constant 0 : index
    %27 = vector.load %arg6[%c0_14, %c0_15] : memref<1x256xf32, #tpu.memory_space<vmem>>, vector<1x256xf32>
    %28 = vector.broadcast %27 : vector<1x256xf32> to vector<32x256xf32>
    %29 = arith.addf %26, %28 : vector<32x256xf32>
    %c0_16 = arith.constant 0 : index
    %c0_17 = arith.constant 0 : index
    %30 = vector.load %arg7[%c0_16, %c0_17] : memref<32x256xf32, #tpu.memory_space<vmem>>, vector<32x256xf32>
    tpu.vector_store %arg7[%c0_16, %c0_17], %29 {strides = array<i32>} : memref<32x256xf32, #tpu.memory_space<vmem>>, vector<32x256xf32>,
    return
  }
  func.func @transform_0(%arg0: i32) -> (i32, i32) {
    %c0_i32 = arith.constant 0 : i32
    %c0_i32_0 = arith.constant 0 : i32
    return %arg0, %c0_i32 : i32, i32
  }
  func.func @transform_1(%arg0: i32) -> (i32, i32) {
    %c0_i32 = arith.constant 0 : i32
    %c0_i32_0 = arith.constant 0 : i32
    %c0_i32_1 = arith.constant 0 : i32
    return %c0_i32, %c0_i32_0 : i32, i32
  }
  func.func @transform_2(%arg0: i32) -> (i32, i32) {
    %c0_i32 = arith.constant 0 : i32
    %c0_i32_0 = arith.constant 0 : i32
    %c0_i32_1 = arith.constant 0 : i32
    return %c0_i32, %c0_i32_0 : i32, i32
  }
  func.func @transform_3(%arg0: i32) -> (i32, i32) {
    %c0_i32 = arith.constant 0 : i32
    %c0_i32_0 = arith.constant 0 : i32
    return %arg0, %c0_i32 : i32, i32
  }
  func.func @transform_4(%arg0: i32) -> (i32, i32) {
    %c0_i32 = arith.constant 0 : i32
    %c0_i32_0 = arith.constant 0 : i32
    %c0_i32_1 = arith.constant 0 : i32
    return %c0_i32, %c0_i32_0 : i32, i32
  }
  func.func @transform_5(%arg0: i32) -> (i32, i32) {
    %c0_i32 = arith.constant 0 : i32
    %c0_i32_0 = arith.constant 0 : i32
    %c0_i32_1 = arith.constant 0 : i32
    return %c0_i32, %c0_i32_0 : i32, i32
  }
  func.func @transform_6(%arg0: i32) -> (i32, i32) {
    %c0_i32 = arith.constant 0 : i32
    %c0_i32_0 = arith.constant 0 : i32
    return %arg0, %c0_i32 : i32, i32
  }
}

</mosaic_0001>

<bundles_post_ra>
// kernel: _lambda_.21
= control target key start
LH: loop header
LB: loop body
LE: loop exit
PB: predicated region body
PF: predicated region fallthrough
CT: control target
= control target key end

     0   :  { %s653_s18 = smov 0   ;;  %s655_s19 = smov 0   ;;  %s712_s0 = inlined_call_operand.vmem [shape: f32[2,16,256], index: 0, kind: input, shape index: {}]   ;;  %s713_s1 = inlined_call_operand.vmem [shape: f32[2,16,256], index: 1, kind: input, shape index: {}]   ;;  %s714_s2 = inlined_call_operand.vmem [shape: f32[16,256], index: 2, kind: input, shape index: {}]   ;;  %s715_s3 = inlined_call_operand.vmem [shape: f32[1,256], index: 3, kind: input, shape index: {}]   ;;  %s716_s4 = inlined_call_operand.vmem [shape: f32[1,256], index: 4, kind: input, shape index: {}]   ;;  %s717_s5 = inlined_call_operand.vmem [shape: f32[2,16,256], index: 5, kind: output, shape index: {}]  }
   0x1   :  { %s657_s20 = smov 0  }
   0x2 LB: > { %s27_s21 = sadd.s32 1, %s617_s19  ;;  %p559_p0 = scmp.ge.s32.totalorder %s621_s20, 1  ;;  %s621_s20 = sphi %s657_s20, %s15_s20   ;;  %s617_s19 = sphi %s655_s19, %s719_s19   ;;  %s613_s18 = sphi %s653_s18, %s718_s18  }
   0x3   : > { %p29_p1 = scmp.ge.s32.totalorder %s27_s21, 2  ;;  %p239_p2 = scmp.lt.s32.totalorder %s621_s20, 3 }
   0x5   : > { %s721_s21 = smov (%p29_p1, %s27_s21), 0  ;;  %p240_p3 = pnand %p559_p0, %p239_p2 }
   0x6   : > { %p294_p4 = scmp.lt.s32.totalorder (!%p240_p3), %s613_s18, 1 }
   0x7   : > { %243 = sbr.rel (%p240_p3) target bundleno = 336 (0x150), region = 40 }
   0xc   : > { %s723_s18 = smov (!%p294_p4, %s613_s18), 1  ;;  %v345_v0 = vld [vmem:[%s714_s2] sm:$0xff]  ;;  %v346_v1 = vld [vmem:[%s714_s2 + $0x8] sm:$0xff]  ;;  %v347_v5 = vld [vmem:[%s714_s2 + $0x10] sm:$0xff]  ;;  %v388_v40 = vlaneseq }
   0xd   : > { %s671_s22 = sshll.u32 %s723_s18, 5  ;;  %v348_v13 = vld [vmem:[%s714_s2 + $0x18] sm:$0xff]  ;;  %v386_v46 = vld [vmem:[%s715_s3] sm:$0x3] }
   0xe   : > { %s302_s25 = scalar_lea.vmem %s712_s0, %s671_s22  ;;  %s313_s28 = scalar_lea.vmem %s713_s1, %s671_s22  ;;  %v389_v43 = vshrl.u32 %v388_v40, 7  ;;  %v402_v47 = vld [vmem:[%s716_s4] sm:$0x3] }
   0xf   : > { %v333_v2 = vld [vmem:[%s302_s25] sm:$0xff]  ;;  %v334_v3 = vld [vmem:[%s302_s25 + $0x8] sm:$0xff]  ;;  %v335_v8 = vld [vmem:[%s302_s25 + $0x10] sm:$0xff]  ;;  %s331_s18 = scalar_lea.vmem %s717_s5, %s671_s22 }
  0x10   : > { %v337_v4 = vld [vmem:[%s313_s28] sm:$0xff]  ;;  %v338_v6 = vld [vmem:[%s313_s28 + $0x8] sm:$0xff]  ;;  %v336_v9 = vld [vmem:[%s302_s25 + $0x18] sm:$0xff]  ;;  %v390_v44 = vsub.s32 0, %v389_v43  ;;  %v394_v45 = vsub.s32 1, %v389_v43 }
  0x11   : > { %v341_v7 = vadd.f32 %v337_v4, %v333_v2  ;;  %v342_v10 = vadd.f32 %v338_v6, %v334_v3  ;;  %v339_v11 = vld [vmem:[%s313_s28 + $0x10] sm:$0xff]  ;;  %v340_v12 = vld [vmem:[%s313_s28 + $0x18] sm:$0xff] }
  0x12   : > { %v343_v15 = vadd.f32 %v339_v11, %v335_v8  ;;  %v344_v16 = vadd.f32 %v340_v12, %v336_v9  ;;  %v391_v48 = vrot.slane %v386_v46, %v390_v44  ;;  %v395_v49 = vrot.slane %v386_v46, %v394_v45 }
  0x13   : > { %v349_v14 = vadd.f32 %v345_v0, %v341_v7  ;;  %v350_v17 = vadd.f32 %v346_v1, %v342_v10  ;;  %v407_v51 = vrot.slane %v402_v47, %v390_v44  ;;  %v411_v52 = vrot.slane %v402_v47, %v394_v45 }
  0x14   : > { %v351_v18 = vadd.f32 %v347_v5, %v343_v15  ;;  %v352_v19 = vadd.f32 %v348_v13, %v344_v16 }
  0x15   : > { %v353_v20 = vadd.f32 %v350_v17, %v349_v14 }
  0x16   : > { %v356_v21 = vadd.f32 %v352_v19, %v351_v18 }
  0x17   : > { %354 = vadd.xlane.f32.xlu0 %v353_v20 }
  0x1b   : > { %357 = vadd.xlane.f32.xlu0 %v356_v21 }
  0xa0   : > { %v355_v22 = vpop.xlane.xlu0 %354 }
  0xa1   : > { %v360_v23 = vmul.f32 0.00390625, %v355_v22 }
  0xa3   : > { %v362_v24 = vsub.f32 %v349_v14, %v360_v23  ;;  %v363_v25 = vsub.f32 %v350_v17, %v360_v23 }
  0xa4   : > { %v358_v26 = vpop.xlane.xlu0 %357 }
  0xa5   : > { %v361_v27 = vmul.f32 0.00390625, %v358_v26  ;;  %v366_v28 = vmul.f32 %v362_v24, %v362_v24  ;;  %v367_v29 = vmul.f32 %v363_v25, %v363_v25 }
  0xa7   : > { %v364_v30 = vsub.f32 %v351_v18, %v361_v27  ;;  %v365_v31 = vsub.f32 %v352_v19, %v361_v27  ;;  %v370_v32 = vadd.f32 %v367_v29, %v366_v28 }
  0xa9   : > { %371 = vadd.xlane.f32.xlu1 %v370_v32  ;;  %v368_v33 = vmul.f32 %v364_v30, %v364_v30  ;;  %v369_v34 = vmul.f32 %v365_v31, %v365_v31 }
  0xab   : > { %v373_v35 = vadd.f32 %v369_v34, %v368_v33 }
  0xad   : > { %374 = vadd.xlane.f32.xlu1 %v373_v35 }
 0x132   : > { %v372_v36 = vpop.xlane.xlu1 %371 }
 0x133   : > { %v376_v37 = vmul.f32 0.00390625, %v372_v36 }
 0x135   : > { %v378_v38 = vadd.f32 1e-12, %v376_v37 }
 0x136   : > { %v375_v39 = vpop.xlane.xlu1 %374 }
 0x137   : > { %595 = vrsqrt.f32 %v378_v38  ;;  %v377_v41 = vmul.f32 0.00390625, %v375_v39 }
 0x139   : > { %v379_v42 = vadd.f32 1e-12, %v377_v41 }
 0x13b   : > { %597 = vrsqrt.f32 %v379_v42 }
 0x144   : > { %v596_v50 = vpop.eup %595 }
 0x145   : > { %v382_v53 = vmul.f32 %v596_v50, %v362_v24  ;;  %v383_v54 = vmul.f32 %v596_v50, %v363_v25 }
 0x147   : > { %v398_v55 = vmul.f32 %v391_v48, %v382_v53  ;;  %v399_v56 = vmul.f32 %v395_v49, %v383_v54 }
 0x148   : > { %v598_v57 = vpop.eup %597 }
 0x149   : > { %v414_v58 = vadd.f32 %v407_v51, %v398_v55  ;;  %v415_v59 = vadd.f32 %v411_v52, %v399_v56  ;;  %v384_v60 = vmul.f32 %v598_v57, %v364_v30  ;;  %v385_v61 = vmul.f32 %v598_v57, %v365_v31 }
 0x14b   : > { %418 = vst [vmem:[%s331_s18] sm:$0xff] %v414_v58  ;;  %419 = vst [vmem:[%s331_s18 + $0x8] sm:$0xff] %v415_v59  ;;  %v400_v62 = vmul.f32 %v391_v48, %v384_v60  ;;  %v401_v63 = vmul.f32 %v395_v49, %v385_v61 }
 0x14d   : > { %v416_v0 = vadd.f32 %v407_v51, %v400_v62  ;;  %v417_v1 = vadd.f32 %v411_v52, %v401_v63 }
 0x14f   : > { %420 = vst [vmem:[%s331_s18 + $0x10] sm:$0xff] %v416_v0  ;;  %421 = vst [vmem:[%s331_s18 + $0x18] sm:$0xff] %v417_v1 }
 0x150 PF: > { %s15_s20 = sadd.s32 1, %s621_s20   ;;  %s718_s18 = smov %s617_s19 }
 0x151   : > { %p12_p5 = scmp.ge.s32.totalorder %s15_s20, 4   ;;  %s719_s19 = smov %s721_s21 }
 0x153   :  { %14 = sbr.rel (!%p12_p5) target bundleno = 2 (0x2), region = 76 }

// kernel: _lambda_.23
= control target key start
LH: loop header
LB: loop body
LE: loop exit
PB: predicated region body
PF: predicated region fallthrough
CT: control target
= control target key end

     0   :  { %s1508_s0 = inlined_call_operand.vmem [shape: bf16[2,16,768], index: 0, kind: input, shape index: {}, may-alias: {0,1,2}]   ;;  %s1509_s1 = inlined_call_operand.vmem [shape: bf16[2,16,768], index: 1, kind: input, shape index: {}, may-alias: {0,1,2}]   ;;  %s1510_s2 = inlined_call_operand.vmem [shape: bf16[2,16,768], index: 2, kind: input, shape index: {}, may-alias: {0,1,2}]   ;;  %s1511_s3 = inlined_call_operand.vmem [shape: f32[2,1,16], index: 3, kind: input, shape index: {}]   ;;  %s1512_s4 = inlined_call_operand.vmem [shape: bf16[2,16,256], index: 4, kind: output, shape index: {}]  }
   0x1   :  { %1515 = sst [smem:[#allocation10_spill]] %s1512_s4 }
   0x2   :  { %s1248_s15 = smov 0   ;;  %s1250_s16 = smov 0  }
   0x3   :  { %s1252_s17 = smov 0   ;;  %s1254_s18 = smov 0  }
   0x4   :  { %s1256_s19 = smov 0   ;;  %s1258_s20 = smov 0  }
   0x5   :  { %s1260_s21 = smov 0   ;;  %s1262_s22 = smov 0  }
   0x6   :  { %s1264_s23 = smov 0   ;;  %s1266_s24 = smov 0  }
   0x7   :  { %s1268_s25 = smov 0  }
   0x8 LB: > { %1516 = sst [smem:[#allocation6_spill]] %s1202_s21  ;;  %s29_s27 = sadd.s32 1, %s1210_s23  ;;  %s1218_s25 = sphi %s1268_s25, %s14_s25   ;;  %s1214_s24 = sphi %s1266_s24, %s1539_s24   ;;  %s1210_s23 = sphi %s1264_s23, %s1538_s23   ;;  %s1206_s22 = sphi %s1262_s22, %s1537_s22   ;;  %s1202_s21 = sphi %s1260_s21, %s1536_s21   ;;  %s1198_s20 = sphi %s1258_s20, %s1535_s20   ;;  %s1194_s19 = sphi %s1256_s19, %s1534_s19   ;;  %s1190_s18 = sphi %s1254_s18, %s1533_s18   ;;  %s1186_s17 = sphi %s1252_s17, %s1532_s17   ;;  %s1182_s16 = sphi %s1250_s16, %s1531_s16   ;;  %s1178_s15 = sphi %s1248_s15, %s1530_s15  }
   0x9   : > { %p31_p0 = scmp.ge.s32.totalorder %s29_s27, 2  ;;  %s33_s28 = sadd.s32 1, %s1214_s24 }
   0xa   : > { %s44_s29 = sadd.s32 1, %s1198_s20  ;;  %p51_p1 = scmp.ne.s32.totalorder %s1198_s20, %s1194_s19 }
   0xb   : > { %s1541_s27 = smov (%p31_p0, %s29_s27), 0  ;;  %s1543_s28 = smov (!%p31_p0, %s33_s28), %s1214_s24 }
   0xc   : > { %1517 = sst [smem:[#allocation7_spill]] %s1541_s27  ;;  %s40_s30 = ssub.s32 %s1210_s23, %s1541_s27 }
   0xd   : > { %p52_p2 = scmp.eq.s32.totalorder %s1218_s25, 0  ;;  %p35_p3 = scmp.ge.s32.totalorder %s1543_s28, 2 }
   0xe   : > { %s67_s5 = sadd.s32 2, %s1210_s23  ;;  %s68_s7 = sadd.s32 2, %s1541_s27 }
   0xf   : > { %p1321_p4 = por %p52_p2, %p51_p1  ;;  %s1545_s28 = smov (%p35_p3, %s1543_s28), 0 }
  0x10   : > { %1519 = sst [smem:[#allocation8_spill]] %s1545_s28  ;;  %s70_s8 = ssub.s32 %s67_s5, %s68_s7 }
  0x11   : > { %s74_s9 = sadd.s32 1, %s1190_s18  ;;  %s37_s10 = ssub.s32 %s1214_s24, %s1545_s28 }
  0x12   : > { %p81_p5 = scmp.ne.s32.totalorder %s1190_s18, %s1186_s17  ;;  %s41_s11 = sor.u32 %s40_s30, %s37_s10 }
  0x13   : > { %s71_s12 = sor.u32 %s70_s8, %s37_s10  ;;  %p42_p6 = scmp.eq.s32.totalorder %s41_s11, 0 }
  0x14   : > { %p72_p7 = scmp.eq.s32.totalorder %s71_s12, 0  ;;  %p1335_p8 = por %p81_p5, %p52_p2 }
  0x15   : > { %s97_s14 = sadd.s32 4, %s1210_s23  ;;  %s98_s7 = sadd.s32 4, %s1541_s27 }
  0x16   : > { %s1341_s26 = scalar_select %p42_p6, %s1198_s20, %s44_s29  }
  0x17   : > { %s1344_s5 = scalar_select %p72_p7, %s1190_s18, %s74_s9  }
  0x18   : > { %1521 = sst [smem:[#allocation9_spill]] %s1341_s26  ;;  %s104_s28 = sadd.s32 1, %s1182_s16 }
  0x19   : > { %s100_s4 = ssub.s32 %s97_s14, %s98_s7  ;;  %p111_p9 = scmp.ne.s32.totalorder %s1182_s16, %s1178_s15 }
  0x1a   : > { %s101_s30 = sor.u32 %s100_s4, %s37_s10  ;;  %s1522_s21 = sadd.s32 4294967295, %s1218_s25  }
  0x1b   : > { %p171_p10 = scmp.eq.s32.totalorder %s1522_s21, 3  ;;  %p102_p11 = scmp.eq.s32.totalorder %s101_s30, 0 }
  0x1c   : > { %p1354_p12 = por %p111_p9, %p52_p2  ;;  %p948_p0 = scmp.ge.s32.totalorder %s1218_s25, 4 }
  0x1d   : > { %p1361_p13 = por %p171_p10, %p51_p1 }
  0x1e   : > { %s1366_s29 = scalar_select %p102_p11, %s1182_s16, %s104_s28  }
  0x1f   : > { %193 = sbr.rel (%p948_p0) target bundleno = 60 (0x3c), region = 16 }
  0x24   : > { %196 = sbr.rel (!%p1321_p4) target bundleno = 44 (0x2c), region = 20  ;;  %s198_s4 = sand.u32 (%p1321_p4), 1, %s1198_s20  }
  0x25   : > { %s1020_s21 = smul.u32 (%p1321_p4), 12, %s1214_s24  ;;  %s949_s9 = sshll.u32 (%p1321_p4), %s198_s4, 3 }
  0x26   : > { %s200_s28 = scalar_lea.vmem (%p1321_p4), [#allocation2], %s949_s9 }
  0x27   : > { %s205_s10 = sadd.s32 (%p1321_p4), %s1210_s23, %s1020_s21 }
  0x28   : > { %s950_s12 = sshll.u32 (%p1321_p4), %s205_s10, 2 }
  0x29   : > { %s207_s30 = scalar_lea.vmem %s1508_s0, %s950_s12 }
  0x2a   : > { %v224_v0 = vld [vmem:[%s207_s30] sm:$0xf]  ;;  %v226_v1 = vld [vmem:[%s207_s30 + $0x18] sm:$0xf] }
  0x2b   : > { %225 = vst [vmem:[%s200_s28] sm:$0xf] %v224_v0  ;;  %227 = vst [vmem:[%s200_s28 + $0x4] sm:$0xf] %v226_v1 }
  0x2c PF: > { %255 = sbr.rel (!%p1335_p8) target bundleno = 52 (0x34), region = 61  ;;  %s257_s6 = sand.u32 (%p1335_p8), 1, %s1190_s18  }
  0x2d   : > { %s837_s4 = smul.u32 (%p1335_p8), 12, %s1214_s24  ;;  %s951_s21 = sshll.u32 (%p1335_p8), %s257_s6, 3 }
  0x2e   : > { %s259_s9 = scalar_lea.vmem (%p1335_p8), [#allocation3], %s951_s21 }
  0x2f   : > { %s838_s10 = sadd.s32 (%p1335_p8), %s1210_s23, %s837_s4 }
  0x30   : > { %s952_s27 = sshll.u32 (%p1335_p8), %s838_s10, 2 }
  0x31   : > { %s840_s12 = scalar_lea.vmem %s1509_s1, %s952_s27 }
  0x32   : > { %v953_v2 = vld [vmem:[%s840_s12 + $0x8] sm:$0xf]  ;;  %v954_v3 = vld [vmem:[%s840_s12 + $0x20] sm:$0xf] }
  0x33   : > { %282 = vst [vmem:[%s259_s9] sm:$0xf] %v953_v2  ;;  %284 = vst [vmem:[%s259_s9 + $0x4] sm:$0xf] %v954_v3 }
  0x34 PF: > { %312 = sbr.rel (!%p1354_p12) target bundleno = 60 (0x3c), region = 102  ;;  %s314_s13 = sand.u32 (%p1354_p12), 1, %s1182_s16  }
  0x35   : > { %s844_s7 = smul.u32 (%p1354_p12), 12, %s1214_s24  ;;  %s955_s30 = sshll.u32 (%p1354_p12), %s314_s13, 3 }
  0x36   : > { %s316_s21 = scalar_lea.vmem (%p1354_p12), [#allocation4], %s955_s30 }
  0x37   : > { %s845_s28 = sadd.s32 (%p1354_p12), %s1210_s23, %s844_s7 }
  0x38   : > { %s956_s6 = sshll.u32 (%p1354_p12), %s845_s28, 2 }
  0x39   : > { %s847_s27 = scalar_lea.vmem %s1510_s2, %s956_s6 }
  0x3a   : > { %v957_v4 = vld [vmem:[%s847_s27 + $0x10] sm:$0xf]  ;;  %v958_v5 = vld [vmem:[%s847_s27 + $0x28] sm:$0xf] }
  0x3b   : > { %339 = vst [vmem:[%s316_s21] sm:$0xf] %v957_v4  ;;  %341 = vst [vmem:[%s316_s21 + $0x4] sm:$0xf] %v958_v5 }
  0x3c PF: > { %p959_p1 = scmp.ge.s32.totalorder %s1218_s25, 1  ;;  %p374_p2 = scmp.lt.s32.totalorder %s1218_s25, 5 }
  0x3e   : > { %p375_p3 = pnand %p959_p1, %p374_p2 }
  0x3f   : > { %s388_s8 = sand.u32 (!%p375_p3), 1, %s1186_s17   ;;  %s381_s10 = sand.u32 (!%p375_p3), 1, %s1194_s19  }
  0x40   : > { %378 = sbr.rel (%p375_p3) target bundleno = 1436 (0x59c), region = 147  ;;  %s1398_s14 = sshll.u32 (!%p375_p3), %s388_s8, 3 }
  0x41   : > { %s1402_s12 = sshll.u32 (!%p375_p3), %s381_s10, 3  ;;  %s390_s17 = scalar_lea.vmem (!%p375_p3), [#allocation3], %s1398_s14 }
  0x42   : > { %s1409_s19 = scalar_lea.vmem (!%p375_p3), [#allocation2], %s1402_s12  ;;  %p433_p4 = scmp.lt.s32.totalorder (!%p375_p3), %s1206_s22, 1 }
  0x43   : > { %s1222_s28 = smov (!%p375_p3), 64   ;;  %s395_s6 = sand.u32 (!%p375_p3), 1, %s1178_s15  }
  0x44   : > { %s1435_s4 = sshll.u32 (!%p375_p3), %s395_s6, 3  ;;  %s1448_s15 = scalar_lea.vmem (!%p375_p3), [#allocation5], %s1402_s12 }
  0x45   : > { %v1220_v6 = vmov 0.0   ;;  %vm1221_vm0 = vmmov 0   ;;  %vm464_vm1 = vcmask 523264   ;;  %v1112_v7 = vld [vmem:[%s390_s17] sm:$0xff]   ;;  %v440_v8 = vld [vmem:[%s1409_s19] sm:$0xf] }
  0x46   : > { %996 = vmatprep.subr.bf16.mxu0 %v1220_v6  ;;  %998 = vmatprep.mubr.msk.bf16.mxu0 %vm1221_vm0, %v1220_v6  ;;  %v441_v9 = vld [vmem:[%s1409_s19 + $0x4] sm:$0xf]  ;;  %v469_v10 = vsel %vm464_vm1, %v1112_v7, 0  ;;  %v442_v11 = vmul.bf16 1040203264, %v440_v8  ;;  %s434_s9 = scalar_select %p433_p4, %s1206_s22, 1 }
  0x47   : > { %1002 = vmatprep.subr.bf16.mxu1 %v1220_v6  ;;  %1004 = vmatprep.mubr.msk.bf16.mxu1 %vm1221_vm0, %v1220_v6  ;;  %v443_v12 = vmul.bf16 1040203264, %v441_v9  ;;  %vm512_vm2 = vcmask 130048   ;;  %v1113_v23 = vld [vmem:[%s390_s17] sm:$0xff]   ;;  %v597_v34 = vld [vmem:[%s1409_s19] sm:$0xf] }
  0x48   : > { %997 = vmatpush3.bf16.xpose.msra.mxu0 %v469_v10  ;;  %s435_s30 = scalar_lea.vmem %s1511_s3, %s434_s9  ;;  %v598_v35 = vld [vmem:[%s1409_s19 + $0x4] sm:$0xf]  ;;  %v599_v36 = vmul.bf16 1040203264, %v597_v34  ;;  %s397_s26 = scalar_lea.vmem [#allocation4], %s1435_s4  ;;  %vm594_vm3 = vcmask 519168  }
  0x49   : > { %1014 = vmatprep.subr.bf16.mxu0 %v1220_v6  ;;  %v965_v13 = vcombine.low %v442_v11, %v443_v12  ;;  %v1423_v14 = vld [vmem:[%s435_s30] ss:$0 sm:$0xff]  ;;  %v600_v37 = vmul.bf16 1040203264, %v598_v35  ;;  %vm753_vm4 = vcmask 1043968   ;;  %s1525_s27 = sld [smem:[#allocation6_spill]] (%p1361_p13) }
  0x4a   : > { %v1114_v39 = vld [vmem:[%s397_s26] sm:$0xff]   ;;  %s980_s21 = sshll.u32 (%p1361_p13), %s1206_s22, 2  ;;  %s1526_s17 = sld [smem:[#allocation10_spill]] (%p1361_p13) }
  0x4b   : > { %v972_v38 = vcombine.low %v599_v36, %v600_v37  ;;  %1003 = vmatpush3.bf16.msra.mxu1 %v1114_v39  ;;  %v1115_v10 = vld [vmem:[%s397_s26] sm:$0xff]  }
  0x4c   : > { %1008 = vmatprep.subr.bf16.mxu1 %v1220_v6 }
  0x4f   : > { %999 = vmatmul.mubr.msk.bf16.vlgmr.msra.gmra.mxu0 %vm464_vm1, %v965_v13  ;;  %s767_s8 = sadd.s32 (%p1361_p13), %s1525_s27, %s980_s21 }
  0x50   : > { %1016 = vmatprep.mubr.msk.bf16.mxu0 %vm1221_vm0, %v1220_v6  ;;  %s981_s10 = sshll.u32 (%p1361_p13), %s767_s8, 2 }
  0x51   : > { %s769_s19 = scalar_lea.vmem (%p1361_p13), %s1526_s17, %s981_s10 }
 0x10f   : > { %v505_v15 = vpop.f32.mrf.mxu0 }
 0x110   : > { %v506_v16 = vadd.f32 %v1423_v14, %v505_v15 }
 0x111   : > { %v1000_v17 = vpop.f32.mrf.mxu0 }
 0x112   : > { %v513_v18 = vsel %vm512_vm2, %v506_v16, -inf }
 0x113   : > { %514 = vmax.xlane.f32.xlu0 %v513_v18  ;;  %v508_v19 = vpop.f32.mrf.mxu0 }
 0x114   : > { %v509_v20 = vadd.f32 %v1423_v14, %v508_v19 }
 0x115   : > { %v1001_v21 = vpop.f32.mrf.mxu0 }
 0x116   : > { %v516_v22 = vsel %vm512_vm2, %v509_v20, -inf }
 0x117   : > { %517 = vmax.xlane.f32.xlu0 %v516_v22 }
 0x12d   : > { %617 = vrot.lane.b32.xlu0 %v1113_v23, %s1222_s28 }
 0x19c   : > { %v515_v24 = vpop.xlane.xlu0 %514 }
 0x19d   : > { %v519_v25 = vsub.f32 %v506_v16, %v515_v24 }
 0x19f   : > { %v521_v26 = vmul.f32 1.442695, %v519_v25 }
 0x1a0   : > { %v518_v27 = vpop.xlane.xlu0 %517 }
 0x1a1   : > { %1116 = vpow2.f32 %v521_v26  ;;  %v520_v28 = vsub.f32 %v509_v20, %v518_v27 }
 0x1a3   : > { %v523_v29 = vmul.f32 1.442695, %v520_v28 }
 0x1a4   : > { %v618_v44 = vpop.permute.xlu0 %617 }
 0x1a5   : > { %1118 = vpow2.f32 %v523_v29  ;;  %v623_v47 = vsel %vm464_vm1, %v618_v44, 0 }
 0x1ae   : > { %v1117_v30 = vpop.eup %1116 }
 0x1af   : > { %v525_v31 = vsel %vm512_vm2, %v1117_v30, 0.0 }
 0x1b0   : > { %526 = vadd.xlane.f32.xlu1 %v525_v31 }
 0x1b2   : > { %v1119_v32 = vpop.eup %1118 }
 0x1b3   : > { %v528_v33 = vsel %vm512_vm2, %v1119_v32, 0.0 }
 0x1b4   : > { %529 = vadd.xlane.f32.xlu1 %v528_v33 }
 0x1c5   : > { %610 = vrot.lane.b32.xlu1 %v972_v38, %s1222_s28 }
 0x239   : > { %v527_v40 = vpop.xlane.xlu1 %526 }
 0x23a   : > { %1120 = vrcp.f32 %v527_v40 }
 0x23d   : > { %v530_v41 = vpop.xlane.xlu1 %529 }
 0x23e   : > { %1122 = vrcp.f32 %v530_v41 }
 0x241   : > { %v611_v49 = vpop.permute.xlu1 %610 }
 0x247   : > { %v1121_v42 = vpop.eup %1120 }
 0x248   : > { %v533_v45 = vmul.f32 %v1121_v42, %v1117_v30 }
 0x24b   : > { %v1123_v43 = vpop.eup %1122 }
 0x24c   : > { %v534_v46 = vmul.f32 %v1123_v43, %v1119_v32 }
 0x24e   : > { %v535_v48 = vpack.c.bf16 %v534_v46, %v533_v45 }
 0x250   : > { %1005 = vmatmul.mubr.msk.bf16.vlgmr.msra.gmra.mxu1 %vm512_vm2, %v535_v48 }
 0x251   : > { %1009 = vmatpush3.bf16.xpose.msra.mxu1 %v623_v47  ;;  %1010 = vmatprep.mubr.msk.bf16.mxu1 %vm1221_vm0, %v1220_v6 }
 0x258   : > { %1011 = vmatmul.mubr.msk.bf16.vlgmr.msra.gmra.mxu1 %vm464_vm1, %v611_v49 }
 0x310   : > { %v579_v50 = vpop.f32.mrf.mxu1 }
 0x311   : > { %v984_v51 = vpack.c.bf16 %v579_v50, %v579_v50 }
 0x312   : > { %v1006_v52 = vpop.f32.mrf.mxu1 }
 0x313   : > { %595 = vst.msk [vmem:[%s1448_s15] sm:$0xf] %vm594_vm3, %v984_v51 }
 0x314   : > { %v582_v53 = vpop.f32.mrf.mxu1 }
 0x315   : > { %v985_v54 = vpack.c.bf16 %v582_v53, %v582_v53 }
 0x316   : > { %v1007_v55 = vpop.f32.mrf.mxu1 }
 0x317   : > { %596 = vst.msk [vmem:[%s1448_s15 + $0x4] sm:$0xf] %vm594_vm3, %v985_v54 }
 0x318   : > { %v659_v56 = vpop.f32.mrf.mxu1 }
 0x319   : > { %v660_v57 = vadd.f32 %v1423_v14, %v659_v56 }
 0x31a   : > { %v1012_v58 = vpop.f32.mrf.mxu1 }
 0x31b   : > { %v666_v59 = vsel %vm512_vm2, %v660_v57, -inf }
 0x31c   : > { %667 = vmax.xlane.f32.xlu1 %v666_v59  ;;  %v662_v60 = vpop.f32.mrf.mxu1 }
 0x31d   : > { %v663_v61 = vadd.f32 %v1423_v14, %v662_v60 }
 0x31e   : > { %v1013_v62 = vpop.f32.mrf.mxu1 }
 0x31f   : > { %v669_v63 = vsel %vm512_vm2, %v663_v61, -inf }
 0x320   : > { %670 = vmax.xlane.f32.xlu0 %v669_v63 }
 0x3a5   : > { %v668_v0 = vpop.xlane.xlu1 %667 }
 0x3a6   : > { %v672_v1 = vsub.f32 %v660_v57, %v668_v0 }
 0x3a8   : > { %v674_v2 = vmul.f32 1.442695, %v672_v1 }
 0x3a9   : > { %v671_v3 = vpop.xlane.xlu0 %670 }
 0x3aa   : > { %1124 = vpow2.f32 %v674_v2  ;;  %v673_v4 = vsub.f32 %v663_v61, %v671_v3 }
 0x3ac   : > { %v676_v5 = vmul.f32 1.442695, %v673_v4 }
 0x3ae   : > { %1126 = vpow2.f32 %v676_v5 }
 0x3b7   : > { %v1125_v6 = vpop.eup %1124 }
 0x3b8   : > { %v678_v7 = vsel %vm512_vm2, %v1125_v6, 0.0 }
 0x3b9   : > { %679 = vadd.xlane.f32.xlu0 %v678_v7 }
 0x3bb   : > { %v1127_v8 = vpop.eup %1126 }
 0x3bc   : > { %v681_v9 = vsel %vm512_vm2, %v1127_v8, 0.0 }
 0x3bd   : > { %682 = vadd.xlane.f32.xlu1 %v681_v9 }
 0x3cf   : > { %694 = vrot.lane.b32.xlu0 %v1115_v10, %s1222_s28 }
 0x442   : > { %v680_v11 = vpop.xlane.xlu0 %679 }
 0x443   : > { %1128 = vrcp.f32 %v680_v11 }
 0x446   : > { %v683_v12 = vpop.xlane.xlu1 %682  ;;  %v695_v13 = vpop.permute.xlu0 %694 }
 0x447   : > { %1130 = vrcp.f32 %v683_v12  ;;  %1015 = vmatpush3.bf16.msra.mxu0 %v695_v13 }
 0x450   : > { %v1129_v14 = vpop.eup %1128 }
 0x451   : > { %v686_v16 = vmul.f32 %v1129_v14, %v1125_v6 }
 0x454   : > { %v1131_v15 = vpop.eup %1130 }
 0x455   : > { %v687_v17 = vmul.f32 %v1131_v15, %v1127_v8 }
 0x457   : > { %v688_v18 = vpack.c.bf16 %v687_v17, %v686_v16 }
 0x459   : > { %1017 = vmatmul.mubr.msk.bf16.vlgmr.msra.gmra.mxu0 %vm512_vm2, %v688_v18 }
 0x519   : > { %v734_v19 = vpop.f32.mrf.mxu0 }
 0x51a   : > { %v986_v20 = vpack.c.bf16 %v734_v19, %v734_v19 }
 0x51b   : > { %v1018_v21 = vpop.f32.mrf.mxu0 }
 0x51c   : > { %747 = vrot.lane.b32.xlu1 %v986_v20, %s1222_s28 }
 0x51d   : > { %v737_v22 = vpop.f32.mrf.mxu0 }
 0x51e   : > { %v987_v23 = vpack.c.bf16 %v737_v22, %v737_v22 }
 0x51f   : > { %v1019_v24 = vpop.f32.mrf.mxu0 }
 0x520   : > { %749 = vrot.lane.b32.xlu1 %v987_v23, %s1222_s28 }
 0x58e   : > { %v748_v25 = vpop.permute.xlu1 %747 }
 0x58f   : > { %754 = vst.msk [vmem:[%s1448_s15] sm:$0xf] %vm753_vm4, %v748_v25  ;;  %762 = sbr.rel (!%p1361_p13) target bundleno = 1436 (0x59c), region = 163 }
 0x592   : > { %v750_v26 = vpop.permute.xlu1 %749 }
 0x593   : > { %755 = vst.msk [vmem:[%s1448_s15 + $0x4] sm:$0xf] %vm753_vm4, %v750_v26 }
 0x596   : > { %v786_v27 = vld [vmem:[%s1448_s15] sm:$0xf] }
 0x597   : > { %787 = vst [vmem:[%s769_s19] sm:$0xf] %v786_v27 }
 0x59a   : > { %v788_v28 = vld [vmem:[%s1448_s15 + $0x4] sm:$0xf] }
 0x59b   : > { %789 = vst [vmem:[%s769_s19 + $0x8] sm:$0xf] %v788_v28 }
 0x59c PF: > { %s14_s25 = sadd.s32 1, %s1218_s25   ;;  %s1527_s22 = sld [smem:[#allocation9_spill]] }
 0x59d   : > { %p11_p5 = scmp.ge.s32.totalorder %s14_s25, 6   ;;  %s1528_s11 = sld [smem:[#allocation7_spill]] }
 0x59e   : > { %s1529_s9 = sld [smem:[#allocation8_spill]]  ;;  %s1530_s15 = smov %s1182_s16 }
 0x59f   : > { %s1531_s16 = smov %s1366_s29  ;;  %s1532_s17 = smov %s1190_s18 }
 0x5a0   : > { %s1533_s18 = smov %s1344_s5  ;;  %s1534_s19 = smov %s1198_s20 }
 0x5a1   : > { %s1536_s21 = smov %s1210_s23  ;;  %13 = sbr.rel (!%p11_p5) target bundleno = 8 (0x8), region = 254 }
 0x5a2   : > { %s1535_s20 = smov %s1527_s22  ;;  %s1537_s22 = smov %s1214_s24 }
 0x5a3   : > { %s1538_s23 = smov %s1528_s11 }
 0x5a4   : > { %s1539_s24 = smov %s1529_s9 }

// kernel: _lambda_.22
= control target key start
LH: loop header
LB: loop body
LE: loop exit
PB: predicated region body
PF: predicated region fallthrough
CT: control target
= control target key end

     0   :  { %s1585_s1 = inlined_call_operand.vmem [shape: bf16[256,768], index: 1, kind: input, shape index: {}]   ;;  %s1586_s0 = inlined_call_operand.vmem [shape: bf16[32,256], index: 0, kind: input, shape index: {}]   ;;  %s1587_s2 = inlined_call_operand.vmem [shape: f32[1,768], index: 2, kind: input, shape index: {}]   ;;  %s1588_s3 = inlined_call_operand.vmem [shape: bf16[32,768], index: 3, kind: output, shape index: {}]  }
   0x1   :  { %v1049_v0 = vld [vmem:[%s1585_s1 + $0x154] ss:$24 sps:$4 sm:$0xff]   ;;  %v1053_v2 = vld [vmem:[%s1585_s1 + $0x150] ss:$24 sps:$4 sm:$0xff]   ;;  %v1055_v4 = vld [vmem:[%s1585_s1 + $0x124] ss:$24 sps:$4 sm:$0xff]  }
   0x2   :  { %v1051_v1 = vld [vmem:[%s1585_s1 + $0x15c] ss:$24 sps:$4 sm:$0xff]   ;;  %646 = vmatprep.subr.bf16.mxu0 %v1049_v0  ;;  %v1054_v3 = vld [vmem:[%s1585_s1 + $0x158] ss:$24 sps:$4 sm:$0xff]   ;;  %v1057_v5 = vld [vmem:[%s1585_s1 + $0x12c] ss:$24 sps:$4 sm:$0xff]  }
   0x3   :  { %699 = vmatprep.subr.bf16.mxu1 %v1051_v1  ;;  %647 = vmatpush1.bf16.msra.mxu0 %v1053_v2  ;;  %v1059_v6 = vld [vmem:[%s1585_s1 + $0x120] ss:$24 sps:$4 sm:$0xff]   ;;  %v1061_v8 = vld [vmem:[%s1585_s1 + $0xf4] ss:$24 sps:$4 sm:$0xff]   ;;  %v1065_v10 = vld [vmem:[%s1585_s1 + $0xf0] ss:$24 sps:$4 sm:$0xff]  }
   0x4   :  { %700 = vmatpush1.bf16.msra.mxu1 %v1054_v3  ;;  %648 = vmatprep.subr.bf16.mxu0 %v1055_v4  ;;  %v1060_v7 = vld [vmem:[%s1585_s1 + $0x128] ss:$24 sps:$4 sm:$0xff]   ;;  %v1063_v9 = vld [vmem:[%s1585_s1 + $0xfc] ss:$24 sps:$4 sm:$0xff]   ;;  %v1066_v11 = vld [vmem:[%s1585_s1 + $0xf8] ss:$24 sps:$4 sm:$0xff]  }
   0x5   :  { %701 = vmatprep.subr.bf16.mxu1 %v1057_v5  ;;  %v1067_v12 = vld [vmem:[%s1585_s1 + $0xc4] ss:$24 sps:$4 sm:$0xff]   ;;  %v1071_v14 = vld [vmem:[%s1585_s1 + $0xc0] ss:$24 sps:$4 sm:$0xff]   ;;  %v1073_v16 = vld [vmem:[%s1585_s1 + $0x94] ss:$24 sps:$4 sm:$0xff]  }
   0x6   :  { %v1069_v13 = vld [vmem:[%s1585_s1 + $0xcc] ss:$24 sps:$4 sm:$0xff]   ;;  %v1072_v15 = vld [vmem:[%s1585_s1 + $0xc8] ss:$24 sps:$4 sm:$0xff]   ;;  %v1075_v17 = vld [vmem:[%s1585_s1 + $0x9c] ss:$24 sps:$4 sm:$0xff]  }
   0x7   :  { %649 = vmatpush1.bf16.msra.mxu0 %v1059_v6  ;;  %v1077_v18 = vld [vmem:[%s1585_s1 + $0x90] ss:$24 sps:$4 sm:$0xff]   ;;  %v1079_v20 = vld [vmem:[%s1585_s1 + $0x64] ss:$24 sps:$4 sm:$0xff]   ;;  %v1083_v22 = vld [vmem:[%s1585_s1 + $0x60] ss:$24 sps:$4 sm:$0xff]  }
   0x8   :  { %702 = vmatpush1.bf16.msra.mxu1 %v1060_v7  ;;  %650 = vmatprep.subr.bf16.mxu0 %v1061_v8  ;;  %v1078_v19 = vld [vmem:[%s1585_s1 + $0x98] ss:$24 sps:$4 sm:$0xff]   ;;  %v1081_v21 = vld [vmem:[%s1585_s1 + $0x6c] ss:$24 sps:$4 sm:$0xff]   ;;  %v1084_v23 = vld [vmem:[%s1585_s1 + $0x68] ss:$24 sps:$4 sm:$0xff]  }
   0x9   :  { %703 = vmatprep.subr.bf16.mxu1 %v1063_v9  ;;  %v1085_v24 = vld [vmem:[%s1585_s1 + $0x34] ss:$24 sps:$4 sm:$0xff]   ;;  %v1089_v26 = vld [vmem:[%s1585_s1 + $0x30] ss:$24 sps:$4 sm:$0xff]   ;;  %v1091_v28 = vld [vmem:[%s1585_s1 + $0x4] ss:$24 sps:$4 sm:$0xff]  }
   0xa   :  { %v1087_v25 = vld [vmem:[%s1585_s1 + $0x3c] ss:$24 sps:$4 sm:$0xff]   ;;  %v1090_v27 = vld [vmem:[%s1585_s1 + $0x38] ss:$24 sps:$4 sm:$0xff]   ;;  %v1093_v29 = vld [vmem:[%s1585_s1 + $0xc] ss:$24 sps:$4 sm:$0xff]  }
   0xb   :  { %651 = vmatpush1.bf16.msra.mxu0 %v1065_v10  ;;  %v1095_v30 = vld [vmem:[%s1585_s1] ss:$24 sps:$4 sm:$0xff]   ;;  %v1097_v32 = vld [vmem:[%s1585_s1 + $0x2d4] ss:$24 sps:$4 sm:$0xff]   ;;  %v1101_v34 = vld [vmem:[%s1585_s1 + $0x2d0] ss:$24 sps:$4 sm:$0xff]  }
   0xc   :  { %704 = vmatpush1.bf16.msra.mxu1 %v1066_v11  ;;  %652 = vmatprep.subr.bf16.mxu0 %v1067_v12  ;;  %v1096_v31 = vld [vmem:[%s1585_s1 + $0x8] ss:$24 sps:$4 sm:$0xff]   ;;  %v1099_v33 = vld [vmem:[%s1585_s1 + $0x2dc] ss:$24 sps:$4 sm:$0xff]   ;;  %v1102_v35 = vld [vmem:[%s1585_s1 + $0x2d8] ss:$24 sps:$4 sm:$0xff]  }
   0xd   :  { %705 = vmatprep.subr.bf16.mxu1 %v1069_v13  ;;  %v1103_v36 = vld [vmem:[%s1585_s1 + $0x2a4] ss:$24 sps:$4 sm:$0xff]   ;;  %v1107_v38 = vld [vmem:[%s1585_s1 + $0x2a0] ss:$24 sps:$4 sm:$0xff]   ;;  %v1109_v40 = vld [vmem:[%s1585_s1 + $0x274] ss:$24 sps:$4 sm:$0xff]  }
   0xe   :  { %v1105_v37 = vld [vmem:[%s1585_s1 + $0x2ac] ss:$24 sps:$4 sm:$0xff]   ;;  %v1108_v39 = vld [vmem:[%s1585_s1 + $0x2a8] ss:$24 sps:$4 sm:$0xff]   ;;  %v1111_v41 = vld [vmem:[%s1585_s1 + $0x27c] ss:$24 sps:$4 sm:$0xff]  }
   0xf   :  { %653 = vmatpush1.bf16.msra.mxu0 %v1071_v14  ;;  %v1113_v42 = vld [vmem:[%s1585_s1 + $0x270] ss:$24 sps:$4 sm:$0xff]   ;;  %v1115_v44 = vld [vmem:[%s1585_s1 + $0x244] ss:$24 sps:$4 sm:$0xff]   ;;  %v1119_v46 = vld [vmem:[%s1585_s1 + $0x240] ss:$24 sps:$4 sm:$0xff]  }
  0x10   :  { %706 = vmatpush1.bf16.msra.mxu1 %v1072_v15  ;;  %654 = vmatprep.subr.bf16.mxu0 %v1073_v16  ;;  %v1114_v43 = vld [vmem:[%s1585_s1 + $0x278] ss:$24 sps:$4 sm:$0xff]   ;;  %v1117_v45 = vld [vmem:[%s1585_s1 + $0x24c] ss:$24 sps:$4 sm:$0xff]   ;;  %v1120_v47 = vld [vmem:[%s1585_s1 + $0x248] ss:$24 sps:$4 sm:$0xff]  }
  0x11   :  { %707 = vmatprep.subr.bf16.mxu1 %v1075_v17  ;;  %v1366_v48 = vld [vmem:[%s1586_s0 + $0x4] ss:$8 sps:$4 sm:$0xff]   ;;  %v1123_v50 = vld [vmem:[%s1585_s1 + $0x21c] ss:$24 sps:$4 sm:$0xff]   ;;  %v1125_v51 = vld [vmem:[%s1585_s1 + $0x210] ss:$24 sps:$4 sm:$0xff]  }
  0x12   :  { %v1121_v49 = vld [vmem:[%s1585_s1 + $0x214] ss:$24 sps:$4 sm:$0xff]   ;;  %678 = vmatprep.mubr.bf16.mxu0 %v1366_v48  ;;  %731 = vmatprep.mubr.bf16.mxu1 %v1366_v48  ;;  %v1126_v52 = vld [vmem:[%s1585_s1 + $0x218] ss:$24 sps:$4 sm:$0xff]   ;;  %v1127_v53 = vld [vmem:[%s1585_s1 + $0x1e4] ss:$24 sps:$4 sm:$0xff]  }
  0x13   :  { %655 = vmatpush1.bf16.msra.mxu0 %v1077_v18  ;;  %v1129_v54 = vld [vmem:[%s1585_s1 + $0x1ec] ss:$24 sps:$4 sm:$0xff]   ;;  %v1131_v55 = vld [vmem:[%s1585_s1 + $0x1e0] ss:$24 sps:$4 sm:$0xff]   ;;  %v1135_v58 = vld [vmem:[%s1585_s1 + $0x1bc] ss:$24 sps:$4 sm:$0xff]  }
  0x14   :  { %708 = vmatpush1.bf16.msra.mxu1 %v1078_v19  ;;  %656 = vmatprep.subr.bf16.mxu0 %v1079_v20  ;;  %v1132_v56 = vld [vmem:[%s1585_s1 + $0x1e8] ss:$24 sps:$4 sm:$0xff]   ;;  %v1133_v57 = vld [vmem:[%s1585_s1 + $0x1b4] ss:$24 sps:$4 sm:$0xff]   ;;  %v1138_v60 = vld [vmem:[%s1585_s1 + $0x1b8] ss:$24 sps:$4 sm:$0xff]  }
  0x15   :  { %709 = vmatprep.subr.bf16.mxu1 %v1081_v21  ;;  %v1137_v59 = vld [vmem:[%s1585_s1 + $0x1b0] ss:$24 sps:$4 sm:$0xff]   ;;  %v1139_v61 = vld [vmem:[%s1585_s1 + $0x184] ss:$24 sps:$4 sm:$0xff]   ;;  %v1143_v63 = vld [vmem:[%s1585_s1 + $0x180] ss:$24 sps:$4 sm:$0xff]  }
  0x16   :  { %v1141_v62 = vld [vmem:[%s1585_s1 + $0x18c] ss:$24 sps:$4 sm:$0xff]   ;;  %v1144_v0 = vld [vmem:[%s1585_s1 + $0x188] ss:$24 sps:$4 sm:$0xff]   ;;  %v1187_v5 = vld [vmem:[%s1586_s0 + $0x14] ss:$8 sps:$4 sm:$0xff]  }
  0x17   :  { %657 = vmatpush1.bf16.msra.mxu0 %v1083_v22  ;;  %v1150_v1 = vld [vmem:[%s1585_s1 + $0x164] ss:$24 sps:$4 sm:$0xff]   ;;  %v1424_v2 = vld [vmem:[%s1586_s0] ss:$8 sps:$4 sm:$0xff]   ;;  %v1153_v4 = vld [vmem:[%s1585_s1 + $0x134] ss:$24 sps:$4 sm:$0xff]  }
  0x18   :  { %710 = vmatpush1.bf16.msra.mxu1 %v1084_v23  ;;  %658 = vmatprep.subr.bf16.mxu0 %v1085_v24  ;;  %v1148_v3 = vld [vmem:[%s1585_s1 + $0x160] ss:$24 sps:$4 sm:$0xff]   ;;  %v1151_v6 = vld [vmem:[%s1585_s1 + $0x130] ss:$24 sps:$4 sm:$0xff]   ;;  %v1156_v7 = vld [vmem:[%s1585_s1 + $0x104] ss:$24 sps:$4 sm:$0xff]  }
  0x19   :  { %711 = vmatprep.subr.bf16.mxu1 %v1087_v25  ;;  %v1446_v8 = vld [vmem:[%s1586_s0 + $0x10] ss:$8 sps:$4 sm:$0xff]   ;;  %v1159_v10 = vld [vmem:[%s1585_s1 + $0xd4] ss:$24 sps:$4 sm:$0xff]   ;;  %v1162_v12 = vld [vmem:[%s1585_s1 + $0xa4] ss:$24 sps:$4 sm:$0xff]  }
  0x1a   :  { %v1154_v9 = vld [vmem:[%s1585_s1 + $0x100] ss:$24 sps:$4 sm:$0xff]   ;;  %v1157_v11 = vld [vmem:[%s1585_s1 + $0xd0] ss:$24 sps:$4 sm:$0xff]   ;;  %v1165_v14 = vld [vmem:[%s1585_s1 + $0x74] ss:$24 sps:$4 sm:$0xff]  }
  0x1b   :  { %659 = vmatpush1.bf16.msra.mxu0 %v1089_v26  ;;  %v1160_v13 = vld [vmem:[%s1585_s1 + $0xa0] ss:$24 sps:$4 sm:$0xff]   ;;  %v1163_v15 = vld [vmem:[%s1585_s1 + $0x70] ss:$24 sps:$4 sm:$0xff]   ;;  %v1168_v16 = vld [vmem:[%s1585_s1 + $0x44] ss:$24 sps:$4 sm:$0xff]  }
  0x1c   :  { %712 = vmatpush1.bf16.msra.mxu1 %v1090_v27  ;;  %660 = vmatprep.subr.bf16.mxu0 %v1091_v28  ;;  %v1166_v17 = vld [vmem:[%s1585_s1 + $0x40] ss:$24 sps:$4 sm:$0xff]   ;;  %v1171_v18 = vld [vmem:[%s1585_s1 + $0x14] ss:$24 sps:$4 sm:$0xff]   ;;  %v1169_v19 = vld [vmem:[%s1585_s1 + $0x10] ss:$24 sps:$4 sm:$0xff]  }
  0x1d   :  { %713 = vmatprep.subr.bf16.mxu1 %v1093_v29  ;;  %v1174_v20 = vld [vmem:[%s1585_s1 + $0x2e4] ss:$24 sps:$4 sm:$0xff]   ;;  %v1172_v21 = vld [vmem:[%s1585_s1 + $0x2e0] ss:$24 sps:$4 sm:$0xff]   ;;  %v1177_v22 = vld [vmem:[%s1585_s1 + $0x2b4] ss:$24 sps:$4 sm:$0xff]  }
  0x1e   :  { %v1175_v23 = vld [vmem:[%s1585_s1 + $0x2b0] ss:$24 sps:$4 sm:$0xff]   ;;  %v1180_v24 = vld [vmem:[%s1585_s1 + $0x284] ss:$24 sps:$4 sm:$0xff]   ;;  %v1178_v25 = vld [vmem:[%s1585_s1 + $0x280] ss:$24 sps:$4 sm:$0xff]  }
  0x1f   :  { %661 = vmatpush1.bf16.msra.mxu0 %v1095_v30  ;;  %v1183_v26 = vld [vmem:[%s1585_s1 + $0x254] ss:$24 sps:$4 sm:$0xff]   ;;  %v1181_v27 = vld [vmem:[%s1585_s1 + $0x250] ss:$24 sps:$4 sm:$0xff]   ;;  %v1186_v28 = vld [vmem:[%s1585_s1 + $0x224] ss:$24 sps:$4 sm:$0xff]  }
  0x20   :  { %714 = vmatpush1.bf16.msra.mxu1 %v1096_v31  ;;  %662 = vmatprep.subr.bf16.mxu0 %v1097_v32  ;;  %v1184_v29 = vld [vmem:[%s1585_s1 + $0x220] ss:$24 sps:$4 sm:$0xff]   ;;  %v1192_v30 = vld [vmem:[%s1585_s1 + $0x1f4] ss:$24 sps:$4 sm:$0xff]   ;;  %v1190_v31 = vld [vmem:[%s1585_s1 + $0x1f0] ss:$24 sps:$4 sm:$0xff]  }
  0x21   :  { %715 = vmatprep.subr.bf16.mxu1 %v1099_v33  ;;  %v1195_v32 = vld [vmem:[%s1585_s1 + $0x1c4] ss:$24 sps:$4 sm:$0xff]   ;;  %v1193_v33 = vld [vmem:[%s1585_s1 + $0x1c0] ss:$24 sps:$4 sm:$0xff]  }
  0x23   :  { %663 = vmatpush2.bf16.msra.mxu0 %v1101_v34  ;;  %v1198_v34 = vld [vmem:[%s1585_s1 + $0x194] ss:$24 sps:$4 sm:$0xff]  }
  0x24   :  { %716 = vmatpush2.bf16.msra.mxu1 %v1102_v35  ;;  %664 = vmatprep.subr.bf16.mxu0 %v1103_v36  ;;  %v1196_v35 = vld [vmem:[%s1585_s1 + $0x190] ss:$24 sps:$4 sm:$0xff]   ;;  %v116_v36 = vlaneseq }
  0x25   :  { %717 = vmatprep.subr.bf16.mxu1 %v1105_v37 }
  0x26   :  { %v117_v37 = vshrl.u32 %v116_v36, 7 }
  0x27   :  { %665 = vmatpush2.bf16.msra.mxu0 %v1107_v38 }
  0x28   :  { %718 = vmatpush2.bf16.msra.mxu1 %v1108_v39  ;;  %666 = vmatprep.subr.bf16.mxu0 %v1109_v40  ;;  %v134_v38 = vsub.s32 4, %v117_v37  ;;  %v114_v39 = vld [vmem:[%s1587_s2] sm:$0x3f] }
  0x29   :  { %719 = vmatprep.subr.bf16.mxu1 %v1111_v41  ;;  %v138_v41 = vsub.s32 5, %v117_v37 }
  0x2a   :  { %v1537_v40 = vrot.slane %v114_v39, %v134_v38 }
  0x2b   :  { %667 = vmatpush2.bf16.msra.mxu0 %v1113_v42  ;;  %v1539_v42 = vrot.slane %v114_v39, %v138_v41 }
  0x2c   :  { %720 = vmatpush2.bf16.msra.mxu1 %v1114_v43  ;;  %668 = vmatprep.subr.bf16.mxu0 %v1115_v44  ;;  %v118_v43 = vsub.s32 0, %v117_v37  ;;  %v126_v44 = vsub.s32 2, %v117_v37 }
  0x2d   :  { %721 = vmatprep.subr.bf16.mxu1 %v1117_v45  ;;  %v122_v45 = vsub.s32 1, %v117_v37 }
  0x2f   :  { %669 = vmatpush2.bf16.msra.mxu0 %v1119_v46  ;;  %v130_v46 = vsub.s32 3, %v117_v37 }
  0x30   :  { %722 = vmatpush2.bf16.msra.mxu1 %v1120_v47  ;;  %670 = vmatprep.subr.bf16.mxu0 %v1121_v49  ;;  %v119_v47 = vrot.slane %v114_v39, %v118_v43  ;;  %v123_v49 = vrot.slane %v114_v39, %v122_v45 }
  0x31   :  { %723 = vmatprep.subr.bf16.mxu1 %v1123_v50  ;;  %v131_v50 = vrot.slane %v114_v39, %v130_v46 }
  0x33   :  { %671 = vmatpush2.bf16.msra.mxu0 %v1125_v51 }
  0x34   :  { %724 = vmatpush2.bf16.msra.mxu1 %v1126_v52  ;;  %672 = vmatprep.subr.bf16.mxu0 %v1127_v53 }
  0x35   :  { %725 = vmatprep.subr.bf16.mxu1 %v1129_v54 }
  0x37   :  { %673 = vmatpush2.bf16.msra.mxu0 %v1131_v55 }
  0x38   :  { %726 = vmatpush2.bf16.msra.mxu1 %v1132_v56  ;;  %674 = vmatprep.subr.bf16.mxu0 %v1133_v57 }
  0x39   :  { %727 = vmatprep.subr.bf16.mxu1 %v1135_v58 }
  0x3b   :  { %675 = vmatpush2.bf16.msra.mxu0 %v1137_v59 }
  0x3c   :  { %728 = vmatpush2.bf16.msra.mxu1 %v1138_v60  ;;  %676 = vmatprep.subr.bf16.mxu0 %v1139_v61 }
  0x3d   :  { %729 = vmatprep.subr.bf16.mxu1 %v1141_v62 }
  0x3f   :  { %677 = vmatpush2.bf16.msra.mxu0 %v1143_v63 }
  0x40   :  { %730 = vmatpush2.bf16.msra.mxu1 %v1144_v0  ;;  %752 = vmatprep.subr.bf16.mxu0 %v1150_v1 }
  0x41   :  { %1017 = vmatprep.subr.bf16.mxu1 %v1150_v1 }
  0x42   :  { %679 = vmatmul.mubr.bf16.vlgmr.msra.gmra.mxu0 %v1424_v2 }
  0x43   :  { %732 = vmatmul.mubr.bf16.vlgmr.msra.gmra.mxu1 %v1424_v2  ;;  %753 = vmatpush1.bf16.msra.mxu0 %v1148_v3 }
  0x44   :  { %1033 = vmatpush1.bf16.msra.mxu1 %v1148_v3  ;;  %754 = vmatprep.subr.bf16.mxu0 %v1153_v4 }
  0x45   :  { %1018 = vmatprep.subr.bf16.mxu1 %v1153_v4  ;;  %688 = vmatprep.mubr.bf16.mxu0 %v1187_v5 }
  0x46   :  { %741 = vmatprep.mubr.bf16.mxu1 %v1187_v5 }
  0x47   :  { %755 = vmatpush1.bf16.msra.mxu0 %v1151_v6 }
  0x48   :  { %1034 = vmatpush1.bf16.msra.mxu1 %v1151_v6  ;;  %756 = vmatprep.subr.bf16.mxu0 %v1156_v7 }
  0x49   :  { %1019 = vmatprep.subr.bf16.mxu1 %v1156_v7 }
  0x4a   :  { %689 = vmatmul.mubr.bf16.gmra.mxu0 %v1446_v8 }
  0x4b   :  { %742 = vmatmul.mubr.bf16.gmra.mxu1 %v1446_v8  ;;  %757 = vmatpush1.bf16.msra.mxu0 %v1154_v9 }
  0x4c   :  { %1035 = vmatpush1.bf16.msra.mxu1 %v1154_v9  ;;  %758 = vmatprep.subr.bf16.mxu0 %v1159_v10 }
  0x4d   :  { %1020 = vmatprep.subr.bf16.mxu1 %v1159_v10  ;;  %784 = vmatprep.mubr.bf16.mxu0 %v1366_v48  ;;  %v127_v48 = vrot.slane %v114_v39, %v126_v44 }
  0x4e   :  { %794 = vmatprep.mubr.bf16.mxu1 %v1187_v5 }
  0x4f   :  { %759 = vmatpush1.bf16.msra.mxu0 %v1157_v11 }
  0x50   :  { %1036 = vmatpush1.bf16.msra.mxu1 %v1157_v11  ;;  %760 = vmatprep.subr.bf16.mxu0 %v1162_v12 }
  0x51   :  { %1021 = vmatprep.subr.bf16.mxu1 %v1162_v12 }
  0x53   :  { %761 = vmatpush1.bf16.msra.mxu0 %v1160_v13 }
  0x54   :  { %1037 = vmatpush1.bf16.msra.mxu1 %v1160_v13  ;;  %762 = vmatprep.subr.bf16.mxu0 %v1165_v14 }
  0x55   :  { %1022 = vmatprep.subr.bf16.mxu1 %v1165_v14 }
  0x57   :  { %763 = vmatpush1.bf16.msra.mxu0 %v1163_v15 }
  0x58   :  { %1038 = vmatpush1.bf16.msra.mxu1 %v1163_v15  ;;  %764 = vmatprep.subr.bf16.mxu0 %v1168_v16 }
  0x59   :  { %1023 = vmatprep.subr.bf16.mxu1 %v1168_v16 }
  0x5b   :  { %765 = vmatpush1.bf16.msra.mxu0 %v1166_v17 }
  0x5c   :  { %1039 = vmatpush1.bf16.msra.mxu1 %v1166_v17  ;;  %766 = vmatprep.subr.bf16.mxu0 %v1171_v18 }
  0x5d   :  { %1024 = vmatprep.subr.bf16.mxu1 %v1171_v18 }
  0x5f   :  { %767 = vmatpush1.bf16.msra.mxu0 %v1169_v19 }
  0x60   :  { %1040 = vmatpush1.bf16.msra.mxu1 %v1169_v19  ;;  %768 = vmatprep.subr.bf16.mxu0 %v1174_v20 }
  0x61   :  { %1025 = vmatprep.subr.bf16.mxu1 %v1174_v20 }
  0x63   :  { %769 = vmatpush2.bf16.msra.mxu0 %v1172_v21 }
  0x64   :  { %1041 = vmatpush2.bf16.msra.mxu1 %v1172_v21  ;;  %770 = vmatprep.subr.bf16.mxu0 %v1177_v22 }
  0x65   :  { %1026 = vmatprep.subr.bf16.mxu1 %v1177_v22 }
  0x67   :  { %771 = vmatpush2.bf16.msra.mxu0 %v1175_v23 }
  0x68   :  { %1042 = vmatpush2.bf16.msra.mxu1 %v1175_v23  ;;  %772 = vmatprep.subr.bf16.mxu0 %v1180_v24 }
  0x69   :  { %1027 = vmatprep.subr.bf16.mxu1 %v1180_v24 }
  0x6b   :  { %773 = vmatpush2.bf16.msra.mxu0 %v1178_v25 }
  0x6c   :  { %1043 = vmatpush2.bf16.msra.mxu1 %v1178_v25  ;;  %774 = vmatprep.subr.bf16.mxu0 %v1183_v26 }
  0x6d   :  { %1028 = vmatprep.subr.bf16.mxu1 %v1183_v26 }
  0x6f   :  { %775 = vmatpush2.bf16.msra.mxu0 %v1181_v27 }
  0x70   :  { %1044 = vmatpush2.bf16.msra.mxu1 %v1181_v27  ;;  %776 = vmatprep.subr.bf16.mxu0 %v1186_v28 }
  0x71   :  { %1029 = vmatprep.subr.bf16.mxu1 %v1186_v28 }
  0x73   :  { %777 = vmatpush2.bf16.msra.mxu0 %v1184_v29 }
  0x74   :  { %1045 = vmatpush2.bf16.msra.mxu1 %v1184_v29  ;;  %778 = vmatprep.subr.bf16.mxu0 %v1192_v30 }
  0x75   :  { %1030 = vmatprep.subr.bf16.mxu1 %v1192_v30 }
  0x77   :  { %779 = vmatpush2.bf16.msra.mxu0 %v1190_v31 }
  0x78   :  { %1046 = vmatpush2.bf16.msra.mxu1 %v1190_v31  ;;  %780 = vmatprep.subr.bf16.mxu0 %v1195_v32 }
  0x79   :  { %1031 = vmatprep.subr.bf16.mxu1 %v1195_v32 }
  0x7b   :  { %781 = vmatpush2.bf16.msra.mxu0 %v1193_v33 }
  0x7c   :  { %1047 = vmatpush2.bf16.msra.mxu1 %v1193_v33  ;;  %782 = vmatprep.subr.bf16.mxu0 %v1198_v34 }
  0x7d   :  { %1032 = vmatprep.subr.bf16.mxu1 %v1198_v34 }
  0x7f   :  { %783 = vmatpush2.bf16.msra.mxu0 %v1196_v35 }
  0x80   :  { %1048 = vmatpush2.bf16.msra.mxu1 %v1196_v35 }
  0x82   :  { %785 = vmatmul.mubr.bf16.vlgmr.msra.gmra.mxu0 %v1424_v2 }
  0x83   :  { %795 = vmatmul.mubr.bf16.vlgmr.msra.gmra.mxu1 %v1446_v8 }
 0x102   :  { %v680_v51 = vpop.f32.mrf.mxu0 }
 0x103   :  { %v733_v52 = vpop.f32.mrf.mxu1  ;;  %v681_v53 = vadd.f32 %v680_v51, %v119_v47 }
 0x104   :  { %v734_v54 = vadd.f32 %v733_v52, %v127_v48  ;;  %v682_v55 = vpop.f32.mrf.mxu0 }
 0x105   :  { %v735_v56 = vpop.f32.mrf.mxu1  ;;  %v683_v57 = vadd.f32 %v682_v55, %v123_v49 }
 0x106   :  { %v736_v58 = vadd.f32 %v735_v56, %v131_v50  ;;  %v684_v59 = vpop.f32.mrf.mxu0 }
 0x107   :  { %v737_v60 = vpop.f32.mrf.mxu1  ;;  %v1005_v61 = vpack.c.bf16 %v683_v57, %v681_v53  ;;  %v685_v1 = vadd.f32 %v684_v59, %v119_v47 }
 0x108   :  { %v1006_v62 = vpack.c.bf16 %v736_v58, %v734_v54  ;;  %v686_v63 = vpop.f32.mrf.mxu0  ;;  %v738_v2 = vadd.f32 %v737_v60, %v127_v48 }
 0x109   :  { %v739_v0 = vpop.f32.mrf.mxu1  ;;  %877 = vst [vmem:[%s1588_s3] sm:$0xff] %v1005_v61  ;;  %v687_v3 = vadd.f32 %v686_v63, %v123_v49 }
 0x10a   :  { %878 = vst [vmem:[%s1588_s3 + $0x8] sm:$0xff] %v1006_v62  ;;  %v740_v4 = vadd.f32 %v739_v0, %v131_v50  ;;  %v690_v5 = vpop.f32.mrf.mxu0 }
 0x10b   :  { %v743_v6 = vpop.f32.mrf.mxu1  ;;  %v1008_v7 = vpack.c.bf16 %v687_v3, %v685_v1  ;;  %v691_v9 = vadd.f32 %v690_v5, %v119_v47 }
 0x10c   :  { %v1009_v8 = vpack.c.bf16 %v740_v4, %v738_v2  ;;  %v744_v10 = vadd.f32 %v743_v6, %v127_v48  ;;  %v692_v11 = vpop.f32.mrf.mxu0 }
 0x10d   :  { %v745_v12 = vpop.f32.mrf.mxu1  ;;  %880 = vst [vmem:[%s1588_s3 + $0x18] sm:$0xff] %v1008_v7  ;;  %v693_v13 = vadd.f32 %v692_v11, %v123_v49 }
 0x10e   :  { %881 = vst [vmem:[%s1588_s3 + $0x20] sm:$0xff] %v1009_v8  ;;  %v746_v14 = vadd.f32 %v745_v12, %v131_v50  ;;  %v694_v15 = vpop.f32.mrf.mxu0 }
 0x10f   :  { %v747_v16 = vpop.f32.mrf.mxu1  ;;  %v1011_v17 = vpack.c.bf16 %v693_v13, %v691_v9  ;;  %v695_v19 = vadd.f32 %v694_v15, %v119_v47 }
 0x110   :  { %v1012_v18 = vpack.c.bf16 %v746_v14, %v744_v10  ;;  %v748_v20 = vadd.f32 %v747_v16, %v127_v48  ;;  %v696_v21 = vpop.f32.mrf.mxu0 }
 0x111   :  { %v749_v22 = vpop.f32.mrf.mxu1  ;;  %883 = vst [vmem:[%s1588_s3 + $0x30] sm:$0xff] %v1011_v17  ;;  %v697_v23 = vadd.f32 %v696_v21, %v123_v49 }
 0x112   :  { %884 = vst [vmem:[%s1588_s3 + $0x38] sm:$0xff] %v1012_v18  ;;  %v750_v24 = vadd.f32 %v749_v22, %v131_v50 }
 0x113   :  { %v1014_v25 = vpack.c.bf16 %v697_v23, %v695_v19 }
 0x114   :  { %v1015_v26 = vpack.c.bf16 %v750_v24, %v748_v20 }
 0x115   :  { %886 = vst [vmem:[%s1588_s3 + $0x48] sm:$0xff] %v1014_v25 }
 0x116   :  { %887 = vst [vmem:[%s1588_s3 + $0x50] sm:$0xff] %v1015_v26 }
 0x142   :  { %v786_v27 = vpop.f32.mrf.mxu0 }
 0x143   :  { %v796_v28 = vpop.f32.mrf.mxu1  ;;  %v787_v31 = vadd.f32 %v786_v27, %v1537_v40 }
 0x144   :  { %v788_v29 = vpop.f32.mrf.mxu0  ;;  %v797_v32 = vadd.f32 %v796_v28, %v1537_v40 }
 0x145   :  { %v798_v30 = vpop.f32.mrf.mxu1  ;;  %v789_v33 = vadd.f32 %v788_v29, %v1539_v42 }
 0x146   :  { %v799_v34 = vadd.f32 %v798_v30, %v1539_v42  ;;  %v790_v35 = vpop.f32.mrf.mxu0 }
 0x147   :  { %v800_v36 = vpop.f32.mrf.mxu1  ;;  %v1007_v37 = vpack.c.bf16 %v789_v33, %v787_v31  ;;  %v791_v43 = vadd.f32 %v790_v35, %v1537_v40 }
 0x148   :  { %v1013_v38 = vpack.c.bf16 %v799_v34, %v797_v32  ;;  %v792_v39 = vpop.f32.mrf.mxu0  ;;  %v801_v44 = vadd.f32 %v800_v36, %v1537_v40 }
 0x149   :  { %v802_v41 = vpop.f32.mrf.mxu1  ;;  %879 = vst [vmem:[%s1588_s3 + $0x10] sm:$0xff] %v1007_v37  ;;  %v793_v45 = vadd.f32 %v792_v39, %v1539_v42 }
 0x14a   :  { %885 = vst [vmem:[%s1588_s3 + $0x40] sm:$0xff] %v1013_v38  ;;  %v803_v46 = vadd.f32 %v802_v41, %v1539_v42 }
 0x14b   :  { %v1010_v47 = vpack.c.bf16 %v793_v45, %v791_v43 }
 0x14c   :  { %v1016_v48 = vpack.c.bf16 %v803_v46, %v801_v44 }
 0x14d   :  { %882 = vst [vmem:[%s1588_s3 + $0x28] sm:$0xff] %v1010_v47 }
 0x14e   :  { %888 = vst [vmem:[%s1588_s3 + $0x58] sm:$0xff] %v1016_v48 }

// kernel: _lambda_.24
= control target key start
LH: loop header
LB: loop body
LE: loop exit
PB: predicated region body
PF: predicated region fallthrough
CT: control target
= control target key end

     0   :  { %v61_v36 = vlaneseq  ;;  %s787_s1 = inlined_call_operand.vmem [shape: bf16[256,256], index: 1, kind: input, shape index: {}]   ;;  %s788_s0 = inlined_call_operand.vmem [shape: bf16[32,256], index: 0, kind: input, shape index: {}]   ;;  %s789_s2 = inlined_call_operand.vmem [shape: f32[1,256], index: 2, kind: input, shape index: {}]   ;;  %s790_s3 = inlined_call_operand.vmem [shape: f32[32,256], index: 3, kind: input, shape index: {}]   ;;  %s791_s4 = inlined_call_operand.vmem [shape: f32[1,256], index: 4, kind: input, shape index: {}]   ;;  %s792_s5 = inlined_call_operand.vmem [shape: f32[1,256], index: 5, kind: input, shape index: {}]   ;;  %s793_s6 = inlined_call_operand.vmem [shape: f32[32,256], index: 6, kind: output, shape index: {}]  }
   0x1   :  { %v505_v0 = vld [vmem:[%s787_s1 + $0x74] ss:$8 sps:$4 sm:$0xff]   ;;  %v507_v1 = vld [vmem:[%s787_s1 + $0x70] ss:$8 sps:$4 sm:$0xff]   ;;  %v508_v2 = vld [vmem:[%s787_s1 + $0x64] ss:$8 sps:$4 sm:$0xff]  }
   0x2   :  { %251 = vmatprep.subr.bf16.mxu0 %v505_v0  ;;  %473 = vmatprep.subr.bf16.mxu1 %v505_v0  ;;  %v510_v3 = vld [vmem:[%s787_s1 + $0x60] ss:$8 sps:$4 sm:$0xff]   ;;  %v511_v4 = vld [vmem:[%s787_s1 + $0x54] ss:$8 sps:$4 sm:$0xff]   ;;  %v513_v5 = vld [vmem:[%s787_s1 + $0x50] ss:$8 sps:$4 sm:$0xff]  }
   0x3   :  { %252 = vmatpush1.bf16.msra.mxu0 %v507_v1  ;;  %489 = vmatpush1.bf16.msra.mxu1 %v507_v1  ;;  %v514_v6 = vld [vmem:[%s787_s1 + $0x44] ss:$8 sps:$4 sm:$0xff]   ;;  %v516_v7 = vld [vmem:[%s787_s1 + $0x40] ss:$8 sps:$4 sm:$0xff]   ;;  %v517_v8 = vld [vmem:[%s787_s1 + $0x34] ss:$8 sps:$4 sm:$0xff]  }
   0x4   :  { %253 = vmatprep.subr.bf16.mxu0 %v508_v2  ;;  %474 = vmatprep.subr.bf16.mxu1 %v508_v2  ;;  %v519_v9 = vld [vmem:[%s787_s1 + $0x30] ss:$8 sps:$4 sm:$0xff]   ;;  %v520_v10 = vld [vmem:[%s787_s1 + $0x24] ss:$8 sps:$4 sm:$0xff]   ;;  %v522_v11 = vld [vmem:[%s787_s1 + $0x20] ss:$8 sps:$4 sm:$0xff]  }
   0x5   :  { %v523_v12 = vld [vmem:[%s787_s1 + $0x14] ss:$8 sps:$4 sm:$0xff]   ;;  %v555_v13 = vld [vmem:[%s788_s0 + $0x4] ss:$8 sps:$4 sm:$0xff]   ;;  %v525_v14 = vld [vmem:[%s787_s1 + $0x10] ss:$8 sps:$4 sm:$0xff]  }
   0x6   :  { %v558_v15 = vld [vmem:[%s788_s0 + $0x14] ss:$8 sps:$4 sm:$0xff]   ;;  %v526_v16 = vld [vmem:[%s787_s1 + $0x4] ss:$8 sps:$4 sm:$0xff]   ;;  %283 = vmatprep.mubr.bf16.mxu0 %v555_v13  ;;  %v528_v17 = vld [vmem:[%s787_s1] ss:$8 sps:$4 sm:$0xff]  }
   0x7   :  { %254 = vmatpush1.bf16.msra.mxu0 %v510_v3  ;;  %490 = vmatpush1.bf16.msra.mxu1 %v510_v3  ;;  %v529_v18 = vld [vmem:[%s787_s1 + $0xf4] ss:$8 sps:$4 sm:$0xff]   ;;  %v531_v19 = vld [vmem:[%s787_s1 + $0xf0] ss:$8 sps:$4 sm:$0xff]   ;;  %v532_v20 = vld [vmem:[%s787_s1 + $0xe4] ss:$8 sps:$4 sm:$0xff]  }
   0x8   :  { %255 = vmatprep.subr.bf16.mxu0 %v511_v4  ;;  %475 = vmatprep.subr.bf16.mxu1 %v511_v4  ;;  %v534_v21 = vld [vmem:[%s787_s1 + $0xe0] ss:$8 sps:$4 sm:$0xff]   ;;  %v535_v22 = vld [vmem:[%s787_s1 + $0xd4] ss:$8 sps:$4 sm:$0xff]   ;;  %v537_v23 = vld [vmem:[%s787_s1 + $0xd0] ss:$8 sps:$4 sm:$0xff]  }
   0x9   :  { %293 = vmatprep.mubr.bf16.mxu1 %v558_v15  ;;  %v538_v24 = vld [vmem:[%s787_s1 + $0xc4] ss:$8 sps:$4 sm:$0xff]   ;;  %v540_v25 = vld [vmem:[%s787_s1 + $0xc0] ss:$8 sps:$4 sm:$0xff]   ;;  %v541_v26 = vld [vmem:[%s787_s1 + $0xb4] ss:$8 sps:$4 sm:$0xff]  }
   0xa   :  { %v543_v27 = vld [vmem:[%s787_s1 + $0xb0] ss:$8 sps:$4 sm:$0xff]   ;;  %v544_v28 = vld [vmem:[%s787_s1 + $0xa4] ss:$8 sps:$4 sm:$0xff]   ;;  %v546_v29 = vld [vmem:[%s787_s1 + $0xa0] ss:$8 sps:$4 sm:$0xff]  }
   0xb   :  { %256 = vmatpush1.bf16.msra.mxu0 %v513_v5  ;;  %491 = vmatpush1.bf16.msra.mxu1 %v513_v5  ;;  %v547_v30 = vld [vmem:[%s787_s1 + $0x94] ss:$8 sps:$4 sm:$0xff]   ;;  %v549_v31 = vld [vmem:[%s787_s1 + $0x90] ss:$8 sps:$4 sm:$0xff]   ;;  %v550_v32 = vld [vmem:[%s787_s1 + $0x84] ss:$8 sps:$4 sm:$0xff]  }
   0xc   :  { %257 = vmatprep.subr.bf16.mxu0 %v514_v6  ;;  %476 = vmatprep.subr.bf16.mxu1 %v514_v6  ;;  %v552_v33 = vld [vmem:[%s787_s1 + $0x80] ss:$8 sps:$4 sm:$0xff]   ;;  %v556_v35 = vld [vmem:[%s788_s0 + $0x10] ss:$8 sps:$4 sm:$0xff]   ;;  %v62_v37 = vshrl.u32 %v61_v36, 7 }
   0xd   :  { %v553_v34 = vld [vmem:[%s788_s0] ss:$8 sps:$4 sm:$0xff]   ;;  %v306_v59 = vld [vmem:[%s790_s3 + $0x10] sm:$0xff]  ;;  %v307_v1 = vld [vmem:[%s790_s3 + $0x18] sm:$0xff] }
   0xe   :  { %v710_v38 = vsub.s32 0, %v62_v37  ;;  %v59_v39 = vld [vmem:[%s789_s2] sm:$0x3]  ;;  %v715_v40 = vsub.s32 1, %v62_v37  ;;  %v309_v50 = vld [vmem:[%s790_s3 + $0x28] sm:$0xff]  ;;  %v310_v63 = vld [vmem:[%s790_s3 + $0x30] sm:$0xff] }
   0xf   :  { %258 = vmatpush1.bf16.msra.mxu0 %v516_v7  ;;  %492 = vmatpush1.bf16.msra.mxu1 %v516_v7  ;;  %v308_v46 = vld [vmem:[%s790_s3 + $0x20] sm:$0xff]  ;;  %v305_v51 = vld [vmem:[%s790_s3 + $0x8] sm:$0xff]  ;;  %v311_v3 = vld [vmem:[%s790_s3 + $0x38] sm:$0xff] }
  0x10   :  { %259 = vmatprep.subr.bf16.mxu0 %v517_v8  ;;  %477 = vmatprep.subr.bf16.mxu1 %v517_v8  ;;  %v64_v41 = vrot.slane %v59_v39, %v710_v38  ;;  %v68_v42 = vrot.slane %v59_v39, %v715_v40  ;;  %v304_v54 = vld [vmem:[%s790_s3] sm:$0xff] }
  0x13   :  { %260 = vmatpush1.bf16.msra.mxu0 %v519_v9  ;;  %493 = vmatpush1.bf16.msra.mxu1 %v519_v9 }
  0x14   :  { %261 = vmatprep.subr.bf16.mxu0 %v520_v10  ;;  %478 = vmatprep.subr.bf16.mxu1 %v520_v10 }
  0x17   :  { %262 = vmatpush1.bf16.msra.mxu0 %v522_v11  ;;  %494 = vmatpush1.bf16.msra.mxu1 %v522_v11 }
  0x18   :  { %263 = vmatprep.subr.bf16.mxu0 %v523_v12  ;;  %479 = vmatprep.subr.bf16.mxu1 %v523_v12 }
  0x1b   :  { %264 = vmatpush1.bf16.msra.mxu0 %v525_v14  ;;  %495 = vmatpush1.bf16.msra.mxu1 %v525_v14 }
  0x1c   :  { %265 = vmatprep.subr.bf16.mxu0 %v526_v16  ;;  %480 = vmatprep.subr.bf16.mxu1 %v526_v16 }
  0x1f   :  { %266 = vmatpush1.bf16.msra.mxu0 %v528_v17  ;;  %496 = vmatpush1.bf16.msra.mxu1 %v528_v17 }
  0x20   :  { %267 = vmatprep.subr.bf16.mxu0 %v529_v18  ;;  %481 = vmatprep.subr.bf16.mxu1 %v529_v18 }
  0x23   :  { %268 = vmatpush2.bf16.msra.mxu0 %v531_v19  ;;  %497 = vmatpush2.bf16.msra.mxu1 %v531_v19 }
  0x24   :  { %269 = vmatprep.subr.bf16.mxu0 %v532_v20  ;;  %482 = vmatprep.subr.bf16.mxu1 %v532_v20 }
  0x27   :  { %270 = vmatpush2.bf16.msra.mxu0 %v534_v21  ;;  %498 = vmatpush2.bf16.msra.mxu1 %v534_v21 }
  0x28   :  { %271 = vmatprep.subr.bf16.mxu0 %v535_v22  ;;  %483 = vmatprep.subr.bf16.mxu1 %v535_v22 }
  0x2b   :  { %272 = vmatpush2.bf16.msra.mxu0 %v537_v23  ;;  %499 = vmatpush2.bf16.msra.mxu1 %v537_v23 }
  0x2c   :  { %273 = vmatprep.subr.bf16.mxu0 %v538_v24  ;;  %484 = vmatprep.subr.bf16.mxu1 %v538_v24 }
  0x2f   :  { %274 = vmatpush2.bf16.msra.mxu0 %v540_v25  ;;  %500 = vmatpush2.bf16.msra.mxu1 %v540_v25 }
  0x30   :  { %275 = vmatprep.subr.bf16.mxu0 %v541_v26  ;;  %485 = vmatprep.subr.bf16.mxu1 %v541_v26 }
  0x33   :  { %276 = vmatpush2.bf16.msra.mxu0 %v543_v27  ;;  %501 = vmatpush2.bf16.msra.mxu1 %v543_v27 }
  0x34   :  { %277 = vmatprep.subr.bf16.mxu0 %v544_v28  ;;  %486 = vmatprep.subr.bf16.mxu1 %v544_v28 }
  0x37   :  { %278 = vmatpush2.bf16.msra.mxu0 %v546_v29  ;;  %502 = vmatpush2.bf16.msra.mxu1 %v546_v29 }
  0x38   :  { %279 = vmatprep.subr.bf16.mxu0 %v547_v30  ;;  %487 = vmatprep.subr.bf16.mxu1 %v547_v30 }
  0x3b   :  { %280 = vmatpush2.bf16.msra.mxu0 %v549_v31  ;;  %503 = vmatpush2.bf16.msra.mxu1 %v549_v31 }
  0x3c   :  { %281 = vmatprep.subr.bf16.mxu0 %v550_v32  ;;  %488 = vmatprep.subr.bf16.mxu1 %v550_v32 }
  0x3f   :  { %282 = vmatpush2.bf16.msra.mxu0 %v552_v33  ;;  %504 = vmatpush2.bf16.msra.mxu1 %v552_v33 }
  0x42   :  { %284 = vmatmul.mubr.bf16.vlgmr.msra.gmra.mxu0 %v553_v34  ;;  %294 = vmatmul.mubr.bf16.vlgmr.msra.gmra.mxu1 %v556_v35 }
 0x102   :  { %v285_v43 = vpop.f32.mrf.mxu0  ;;  %v295_v44 = vpop.f32.mrf.mxu1 }
 0x103   :  { %v296_v45 = vadd.f32 %v295_v44, %v64_v41  ;;  %v286_v47 = vadd.f32 %v285_v43, %v64_v41 }
 0x104   :  { %v287_v48 = vpop.f32.mrf.mxu0  ;;  %v297_v49 = vpop.f32.mrf.mxu1 }
 0x105   :  { %v288_v52 = vadd.f32 %v287_v48, %v68_v42  ;;  %v298_v53 = vadd.f32 %v297_v49, %v68_v42  ;;  %v316_v57 = vadd.f32 %v308_v46, %v296_v45  ;;  %v312_v4 = vadd.f32 %v304_v54, %v286_v47 }
 0x106   :  { %v289_v55 = vpop.f32.mrf.mxu0  ;;  %v299_v56 = vpop.f32.mrf.mxu1 }
 0x107   :  { %v290_v58 = vadd.f32 %v289_v55, %v64_v41  ;;  %v300_v60 = vadd.f32 %v299_v56, %v64_v41  ;;  %v317_v61 = vadd.f32 %v309_v50, %v298_v53  ;;  %v313_v62 = vadd.f32 %v305_v51, %v288_v52 }
 0x108   :  { %v291_v0 = vpop.f32.mrf.mxu0  ;;  %v301_v2 = vpop.f32.mrf.mxu1 }
 0x109   :  { %v292_v5 = vadd.f32 %v291_v0, %v68_v42  ;;  %v302_v6 = vadd.f32 %v301_v2, %v68_v42  ;;  %v326_v7 = vadd.f32 %v317_v61, %v316_v57  ;;  %v320_v8 = vadd.f32 %v313_v62, %v312_v4 }
 0x10a   :  { %v314_v9 = vadd.f32 %v306_v59, %v290_v58  ;;  %v318_v10 = vadd.f32 %v310_v63, %v300_v60  ;;  %v405_v58 = vld [vmem:[%s792_s5] sm:$0x3] }
 0x10b   :  { %v315_v11 = vadd.f32 %v307_v1, %v292_v5  ;;  %v319_v12 = vadd.f32 %v311_v3, %v302_v6  ;;  %327 = vadd.xlane.f32.xlu1 %v326_v7  ;;  %321 = vadd.xlane.f32.xlu0 %v320_v8  ;;  %v414_v63 = vrot.slane %v405_v58, %v715_v40 }
 0x10d   :  { %v329_v13 = vadd.f32 %v319_v12, %v318_v10  ;;  %v323_v14 = vadd.f32 %v315_v11, %v314_v9 }
 0x10f   :  { %330 = vadd.xlane.f32.xlu1 %v329_v13  ;;  %324 = vadd.xlane.f32.xlu0 %v323_v14 }
 0x194   :  { %v328_v15 = vpop.xlane.xlu1 %327  ;;  %v322_v16 = vpop.xlane.xlu0 %321 }
 0x195   :  { %v335_v17 = vmul.f32 0.00390625, %v328_v15  ;;  %v333_v18 = vmul.f32 0.00390625, %v322_v16 }
 0x197   :  { %v337_v19 = vsub.f32 %v312_v4, %v333_v18  ;;  %v338_v20 = vsub.f32 %v313_v62, %v333_v18  ;;  %v341_v21 = vsub.f32 %v316_v57, %v335_v17  ;;  %v342_v22 = vsub.f32 %v317_v61, %v335_v17  ;;  %v385_v57 = vld [vmem:[%s791_s4] sm:$0x3] }
 0x198   :  { %v331_v23 = vpop.xlane.xlu1 %330  ;;  %v325_v24 = vpop.xlane.xlu0 %324  ;;  %v390_v59 = vrot.slane %v385_v57, %v710_v38  ;;  %v394_v60 = vrot.slane %v385_v57, %v715_v40  ;;  %v410_v62 = vrot.slane %v405_v58, %v710_v38 }
 0x199   :  { %v336_v25 = vmul.f32 0.00390625, %v331_v23  ;;  %v334_v26 = vmul.f32 0.00390625, %v325_v24  ;;  %v345_v27 = vmul.f32 %v337_v19, %v337_v19  ;;  %v346_v28 = vmul.f32 %v338_v20, %v338_v20 }
 0x19a   :  { %v349_v34 = vmul.f32 %v341_v21, %v341_v21  ;;  %v350_v35 = vmul.f32 %v342_v22, %v342_v22 }
 0x19b   :  { %v743_v29 = vsub.f32 %v318_v10, %v336_v25  ;;  %v745_v30 = vsub.f32 %v319_v12, %v336_v25  ;;  %v339_v31 = vsub.f32 %v314_v9, %v334_v26  ;;  %v340_v32 = vsub.f32 %v315_v11, %v334_v26 }
 0x19c   :  { %v353_v33 = vadd.f32 %v346_v28, %v345_v27  ;;  %v359_v43 = vadd.f32 %v350_v35, %v349_v34 }
 0x19d   :  { %v347_v36 = vmul.f32 %v339_v31, %v339_v31  ;;  %v348_v37 = vmul.f32 %v340_v32, %v340_v32  ;;  %v351_v41 = vmul.f32 %v743_v29, %v743_v29  ;;  %v352_v42 = vmul.f32 %v745_v30, %v745_v30 }
 0x19e   :  { %354 = vadd.xlane.f32.xlu0 %v353_v33 }
 0x19f   :  { %v356_v39 = vadd.f32 %v348_v37, %v347_v36  ;;  %v362_v44 = vadd.f32 %v352_v42, %v351_v41 }
 0x1a1   :  { %357 = vadd.xlane.f32.xlu1 %v356_v39 }
 0x1a2   :  { %360 = vadd.xlane.f32.xlu0 %v359_v43 }
 0x1a5   :  { %363 = vadd.xlane.f32.xlu1 %v362_v44 }
 0x227   :  { %v355_v45 = vpop.xlane.xlu0 %354 }
 0x228   :  { %v365_v46 = vmul.f32 0.00390625, %v355_v45 }
 0x22a   :  { %v369_v47 = vadd.f32 1e-12, %v365_v46  ;;  %v358_v48 = vpop.xlane.xlu1 %357 }
 0x22b   :  { %v366_v49 = vmul.f32 0.00390625, %v358_v48  ;;  %v361_v50 = vpop.xlane.xlu0 %360 }
 0x22c   :  { %559 = vrsqrt.f32 %v369_v47  ;;  %v367_v51 = vmul.f32 0.00390625, %v361_v50 }
 0x22d   :  { %v370_v52 = vadd.f32 1e-12, %v366_v49 }
 0x22e   :  { %v371_v53 = vadd.f32 1e-12, %v367_v51  ;;  %v364_v54 = vpop.xlane.xlu1 %363 }
 0x22f   :  { %561 = vrsqrt.f32 %v370_v52  ;;  %v368_v55 = vmul.f32 0.00390625, %v364_v54 }
 0x230   :  { %563 = vrsqrt.f32 %v371_v53 }
 0x231   :  { %v372_v56 = vadd.f32 1e-12, %v368_v55 }
 0x233   :  { %565 = vrsqrt.f32 %v372_v56 }
 0x239   :  { %v560_v61 = vpop.eup %559 }
 0x23a   :  { %v377_v0 = vmul.f32 %v560_v61, %v337_v19  ;;  %v378_v1 = vmul.f32 %v560_v61, %v338_v20 }
 0x23c   :  { %v562_v2 = vpop.eup %561  ;;  %v397_v3 = vmul.f32 %v390_v59, %v377_v0  ;;  %v398_v4 = vmul.f32 %v394_v60, %v378_v1 }
 0x23d   :  { %v564_v5 = vpop.eup %563  ;;  %v379_v6 = vmul.f32 %v562_v2, %v339_v31  ;;  %v380_v7 = vmul.f32 %v562_v2, %v340_v32 }
 0x23e   :  { %v417_v8 = vadd.f32 %v410_v62, %v397_v3  ;;  %v418_v9 = vadd.f32 %v414_v63, %v398_v4  ;;  %v381_v10 = vmul.f32 %v564_v5, %v341_v21  ;;  %v382_v11 = vmul.f32 %v564_v5, %v342_v22 }
 0x23f   :  { %v399_v12 = vmul.f32 %v390_v59, %v379_v6  ;;  %v400_v13 = vmul.f32 %v394_v60, %v380_v7 }
 0x240   :  { %v566_v14 = vpop.eup %565  ;;  %425 = vst [vmem:[%s793_s6] sm:$0xff] %v417_v8  ;;  %426 = vst [vmem:[%s793_s6 + $0x8] sm:$0xff] %v418_v9  ;;  %v401_v38 = vmul.f32 %v390_v59, %v381_v10  ;;  %v402_v40 = vmul.f32 %v394_v60, %v382_v11 }
 0x241   :  { %v419_v15 = vadd.f32 %v410_v62, %v399_v12  ;;  %v420_v16 = vadd.f32 %v414_v63, %v400_v13  ;;  %v383_v17 = vmul.f32 %v566_v14, %v743_v29  ;;  %v384_v18 = vmul.f32 %v566_v14, %v745_v30 }
 0x242   :  { %v421_v19 = vadd.f32 %v410_v62, %v401_v38  ;;  %v422_v20 = vadd.f32 %v414_v63, %v402_v40 }
 0x243   :  { %427 = vst [vmem:[%s793_s6 + $0x10] sm:$0xff] %v419_v15  ;;  %428 = vst [vmem:[%s793_s6 + $0x18] sm:$0xff] %v420_v16  ;;  %v403_v21 = vmul.f32 %v390_v59, %v383_v17  ;;  %v404_v22 = vmul.f32 %v394_v60, %v384_v18 }
 0x244   :  { %429 = vst [vmem:[%s793_s6 + $0x20] sm:$0xff] %v421_v19  ;;  %430 = vst [vmem:[%s793_s6 + $0x28] sm:$0xff] %v422_v20 }
 0x245   :  { %v423_v23 = vadd.f32 %v410_v62, %v403_v21  ;;  %v424_v24 = vadd.f32 %v414_v63, %v404_v22 }
 0x247   :  { %431 = vst [vmem:[%s793_s6 + $0x30] sm:$0xff] %v423_v23  ;;  %432 = vst [vmem:[%s793_s6 + $0x38] sm:$0xff] %v424_v24 }

// kernel: _lambda_.25
= control target key start
LH: loop header
LB: loop body
LE: loop exit
PB: predicated region body
PF: predicated region fallthrough
CT: control target
= control target key end

     0   :  { %s1359_s1 = inlined_call_operand.vmem [shape: bf16[256,512], index: 1, kind: input, shape index: {}]   ;;  %s1360_s0 = inlined_call_operand.vmem [shape: bf16[32,256], index: 0, kind: input, shape index: {}]   ;;  %s1361_s2 = inlined_call_operand.vmem [shape: f32[1,512], index: 2, kind: input, shape index: {}]   ;;  %s1362_s3 = inlined_call_operand.vmem [shape: bf16[32,512], index: 3, kind: output, shape index: {}]  }
   0x1   :  { %v838_v0 = vld [vmem:[%s1359_s1 + $0xe4] ss:$16 sps:$4 sm:$0xff]   ;;  %v840_v1 = vld [vmem:[%s1359_s1 + $0xec] ss:$16 sps:$4 sm:$0xff]   ;;  %v842_v2 = vld [vmem:[%s1359_s1 + $0xe0] ss:$16 sps:$4 sm:$0xff]  }
   0x2   :  { %444 = vmatprep.subr.bf16.mxu0 %v838_v0  ;;  %v843_v3 = vld [vmem:[%s1359_s1 + $0xe8] ss:$16 sps:$4 sm:$0xff]   ;;  %497 = vmatprep.subr.bf16.mxu1 %v840_v1  ;;  %v844_v4 = vld [vmem:[%s1359_s1 + $0xc4] ss:$16 sps:$4 sm:$0xff]   ;;  %v846_v5 = vld [vmem:[%s1359_s1 + $0xcc] ss:$16 sps:$4 sm:$0xff]  }
   0x3   :  { %445 = vmatpush1.bf16.msra.mxu0 %v842_v2  ;;  %498 = vmatpush1.bf16.msra.mxu1 %v843_v3  ;;  %v848_v6 = vld [vmem:[%s1359_s1 + $0xc0] ss:$16 sps:$4 sm:$0xff]   ;;  %v849_v7 = vld [vmem:[%s1359_s1 + $0xc8] ss:$16 sps:$4 sm:$0xff]   ;;  %v850_v8 = vld [vmem:[%s1359_s1 + $0xa4] ss:$16 sps:$4 sm:$0xff]  }
   0x4   :  { %446 = vmatprep.subr.bf16.mxu0 %v844_v4  ;;  %499 = vmatprep.subr.bf16.mxu1 %v846_v5  ;;  %v852_v9 = vld [vmem:[%s1359_s1 + $0xac] ss:$16 sps:$4 sm:$0xff]   ;;  %v854_v10 = vld [vmem:[%s1359_s1 + $0xa0] ss:$16 sps:$4 sm:$0xff]   ;;  %v855_v11 = vld [vmem:[%s1359_s1 + $0xa8] ss:$16 sps:$4 sm:$0xff]   ;;  %v84_v4 = vlaneseq }
   0x5   :  { %v856_v12 = vld [vmem:[%s1359_s1 + $0x84] ss:$16 sps:$4 sm:$0xff]   ;;  %v858_v13 = vld [vmem:[%s1359_s1 + $0x8c] ss:$16 sps:$4 sm:$0xff]   ;;  %v860_v14 = vld [vmem:[%s1359_s1 + $0x80] ss:$16 sps:$4 sm:$0xff]  }
   0x6   :  { %v861_v15 = vld [vmem:[%s1359_s1 + $0x88] ss:$16 sps:$4 sm:$0xff]   ;;  %v862_v16 = vld [vmem:[%s1359_s1 + $0x64] ss:$16 sps:$4 sm:$0xff]   ;;  %v864_v17 = vld [vmem:[%s1359_s1 + $0x6c] ss:$16 sps:$4 sm:$0xff]  }
   0x7   :  { %447 = vmatpush1.bf16.msra.mxu0 %v848_v6  ;;  %500 = vmatpush1.bf16.msra.mxu1 %v849_v7  ;;  %v866_v18 = vld [vmem:[%s1359_s1 + $0x60] ss:$16 sps:$4 sm:$0xff]   ;;  %v867_v19 = vld [vmem:[%s1359_s1 + $0x68] ss:$16 sps:$4 sm:$0xff]   ;;  %v868_v20 = vld [vmem:[%s1359_s1 + $0x44] ss:$16 sps:$4 sm:$0xff]  }
   0x8   :  { %448 = vmatprep.subr.bf16.mxu0 %v850_v8  ;;  %501 = vmatprep.subr.bf16.mxu1 %v852_v9  ;;  %v870_v21 = vld [vmem:[%s1359_s1 + $0x4c] ss:$16 sps:$4 sm:$0xff]   ;;  %v872_v22 = vld [vmem:[%s1359_s1 + $0x40] ss:$16 sps:$4 sm:$0xff]   ;;  %v873_v23 = vld [vmem:[%s1359_s1 + $0x48] ss:$16 sps:$4 sm:$0xff]  }
   0x9   :  { %v874_v24 = vld [vmem:[%s1359_s1 + $0x24] ss:$16 sps:$4 sm:$0xff]   ;;  %v876_v25 = vld [vmem:[%s1359_s1 + $0x2c] ss:$16 sps:$4 sm:$0xff]   ;;  %v878_v26 = vld [vmem:[%s1359_s1 + $0x20] ss:$16 sps:$4 sm:$0xff]  }
   0xa   :  { %v879_v27 = vld [vmem:[%s1359_s1 + $0x28] ss:$16 sps:$4 sm:$0xff]   ;;  %v880_v28 = vld [vmem:[%s1359_s1 + $0x4] ss:$16 sps:$4 sm:$0xff]   ;;  %v882_v29 = vld [vmem:[%s1359_s1 + $0xc] ss:$16 sps:$4 sm:$0xff]  }
   0xb   :  { %449 = vmatpush1.bf16.msra.mxu0 %v854_v10  ;;  %502 = vmatpush1.bf16.msra.mxu1 %v855_v11  ;;  %v884_v30 = vld [vmem:[%s1359_s1] ss:$16 sps:$4 sm:$0xff]   ;;  %v885_v31 = vld [vmem:[%s1359_s1 + $0x8] ss:$16 sps:$4 sm:$0xff]   ;;  %v886_v32 = vld [vmem:[%s1359_s1 + $0x1e4] ss:$16 sps:$4 sm:$0xff]  }
   0xc   :  { %450 = vmatprep.subr.bf16.mxu0 %v856_v12  ;;  %503 = vmatprep.subr.bf16.mxu1 %v858_v13  ;;  %v888_v33 = vld [vmem:[%s1359_s1 + $0x1ec] ss:$16 sps:$4 sm:$0xff]   ;;  %v890_v34 = vld [vmem:[%s1359_s1 + $0x1e0] ss:$16 sps:$4 sm:$0xff]   ;;  %v891_v35 = vld [vmem:[%s1359_s1 + $0x1e8] ss:$16 sps:$4 sm:$0xff]  }
   0xd   :  { %v892_v36 = vld [vmem:[%s1359_s1 + $0x1c4] ss:$16 sps:$4 sm:$0xff]   ;;  %v894_v37 = vld [vmem:[%s1359_s1 + $0x1cc] ss:$16 sps:$4 sm:$0xff]   ;;  %v896_v38 = vld [vmem:[%s1359_s1 + $0x1c0] ss:$16 sps:$4 sm:$0xff]  }
   0xe   :  { %v897_v39 = vld [vmem:[%s1359_s1 + $0x1c8] ss:$16 sps:$4 sm:$0xff]   ;;  %v898_v40 = vld [vmem:[%s1359_s1 + $0x1a4] ss:$16 sps:$4 sm:$0xff]   ;;  %v900_v41 = vld [vmem:[%s1359_s1 + $0x1ac] ss:$16 sps:$4 sm:$0xff]  }
   0xf   :  { %451 = vmatpush1.bf16.msra.mxu0 %v860_v14  ;;  %504 = vmatpush1.bf16.msra.mxu1 %v861_v15  ;;  %v902_v42 = vld [vmem:[%s1359_s1 + $0x1a0] ss:$16 sps:$4 sm:$0xff]   ;;  %v903_v43 = vld [vmem:[%s1359_s1 + $0x1a8] ss:$16 sps:$4 sm:$0xff]   ;;  %v904_v44 = vld [vmem:[%s1359_s1 + $0x184] ss:$16 sps:$4 sm:$0xff]  }
  0x10   :  { %452 = vmatprep.subr.bf16.mxu0 %v862_v16  ;;  %505 = vmatprep.subr.bf16.mxu1 %v864_v17  ;;  %v906_v45 = vld [vmem:[%s1359_s1 + $0x18c] ss:$16 sps:$4 sm:$0xff]   ;;  %v908_v46 = vld [vmem:[%s1359_s1 + $0x180] ss:$16 sps:$4 sm:$0xff]   ;;  %v909_v48 = vld [vmem:[%s1359_s1 + $0x188] ss:$16 sps:$4 sm:$0xff]  }
  0x11   :  { %v936_v47 = vld [vmem:[%s1360_s0 + $0x4] ss:$8 sps:$4 sm:$0xff]   ;;  %v914_v51 = vld [vmem:[%s1359_s1 + $0x160] ss:$16 sps:$4 sm:$0xff]   ;;  %v915_v52 = vld [vmem:[%s1359_s1 + $0x168] ss:$16 sps:$4 sm:$0xff]  }
  0x12   :  { %v910_v49 = vld [vmem:[%s1359_s1 + $0x164] ss:$16 sps:$4 sm:$0xff]   ;;  %v912_v50 = vld [vmem:[%s1359_s1 + $0x16c] ss:$16 sps:$4 sm:$0xff]   ;;  %476 = vmatprep.mubr.bf16.mxu0 %v936_v47  ;;  %529 = vmatprep.mubr.bf16.mxu1 %v936_v47  ;;  %v920_v55 = vld [vmem:[%s1359_s1 + $0x140] ss:$16 sps:$4 sm:$0xff]  }
  0x13   :  { %453 = vmatpush1.bf16.msra.mxu0 %v866_v18  ;;  %506 = vmatpush1.bf16.msra.mxu1 %v867_v19  ;;  %v916_v53 = vld [vmem:[%s1359_s1 + $0x144] ss:$16 sps:$4 sm:$0xff]   ;;  %v918_v54 = vld [vmem:[%s1359_s1 + $0x14c] ss:$16 sps:$4 sm:$0xff]   ;;  %v921_v56 = vld [vmem:[%s1359_s1 + $0x148] ss:$16 sps:$4 sm:$0xff]  }
  0x14   :  { %454 = vmatprep.subr.bf16.mxu0 %v868_v20  ;;  %507 = vmatprep.subr.bf16.mxu1 %v870_v21  ;;  %v922_v57 = vld [vmem:[%s1359_s1 + $0x124] ss:$16 sps:$4 sm:$0xff]   ;;  %v924_v58 = vld [vmem:[%s1359_s1 + $0x12c] ss:$16 sps:$4 sm:$0xff]   ;;  %v926_v59 = vld [vmem:[%s1359_s1 + $0x120] ss:$16 sps:$4 sm:$0xff]  }
  0x15   :  { %v927_v60 = vld [vmem:[%s1359_s1 + $0x128] ss:$16 sps:$4 sm:$0xff]   ;;  %v928_v61 = vld [vmem:[%s1359_s1 + $0x104] ss:$16 sps:$4 sm:$0xff]   ;;  %v930_v62 = vld [vmem:[%s1359_s1 + $0x10c] ss:$16 sps:$4 sm:$0xff]  }
  0x16   :  { %v932_v63 = vld [vmem:[%s1359_s1 + $0x100] ss:$16 sps:$4 sm:$0xff]   ;;  %v933_v0 = vld [vmem:[%s1359_s1 + $0x108] ss:$16 sps:$4 sm:$0xff]   ;;  %v937_v2 = vld [vmem:[%s1360_s0 + $0x14] ss:$8 sps:$4 sm:$0xff]  }
  0x17   :  { %455 = vmatpush1.bf16.msra.mxu0 %v872_v22  ;;  %508 = vmatpush1.bf16.msra.mxu1 %v873_v23  ;;  %v934_v1 = vld [vmem:[%s1360_s0] ss:$8 sps:$4 sm:$0xff]   ;;  %v939_v3 = vld [vmem:[%s1360_s0 + $0x10] ss:$8 sps:$4 sm:$0xff]   ;;  %v85_v5 = vshrl.u32 %v84_v4, 7 }
  0x18   :  { %456 = vmatprep.subr.bf16.mxu0 %v874_v24  ;;  %509 = vmatprep.subr.bf16.mxu1 %v876_v25  ;;  %v82_v8 = vld [vmem:[%s1361_s2] sm:$0xf] }
  0x19   :  { %v86_v6 = vsub.s32 0, %v85_v5  ;;  %v94_v7 = vsub.s32 2, %v85_v5  ;;  %v90_v9 = vsub.s32 1, %v85_v5  ;;  %v98_v10 = vsub.s32 3, %v85_v5 }
  0x1b   :  { %457 = vmatpush1.bf16.msra.mxu0 %v878_v26  ;;  %510 = vmatpush1.bf16.msra.mxu1 %v879_v27  ;;  %v1199_v11 = vrot.slane %v82_v8, %v86_v6  ;;  %v1201_v12 = vrot.slane %v82_v8, %v94_v7  ;;  %v1203_v15 = vrot.slane %v82_v8, %v90_v9 }
  0x1c   :  { %458 = vmatprep.subr.bf16.mxu0 %v880_v28  ;;  %511 = vmatprep.subr.bf16.mxu1 %v882_v29  ;;  %v1205_v16 = vrot.slane %v82_v8, %v98_v10 }
  0x1f   :  { %459 = vmatpush1.bf16.msra.mxu0 %v884_v30  ;;  %512 = vmatpush1.bf16.msra.mxu1 %v885_v31 }
  0x20   :  { %460 = vmatprep.subr.bf16.mxu0 %v886_v32  ;;  %513 = vmatprep.subr.bf16.mxu1 %v888_v33 }
  0x23   :  { %461 = vmatpush2.bf16.msra.mxu0 %v890_v34  ;;  %514 = vmatpush2.bf16.msra.mxu1 %v891_v35 }
  0x24   :  { %462 = vmatprep.subr.bf16.mxu0 %v892_v36  ;;  %515 = vmatprep.subr.bf16.mxu1 %v894_v37 }
  0x27   :  { %463 = vmatpush2.bf16.msra.mxu0 %v896_v38  ;;  %516 = vmatpush2.bf16.msra.mxu1 %v897_v39 }
  0x28   :  { %464 = vmatprep.subr.bf16.mxu0 %v898_v40  ;;  %517 = vmatprep.subr.bf16.mxu1 %v900_v41 }
  0x2b   :  { %465 = vmatpush2.bf16.msra.mxu0 %v902_v42  ;;  %518 = vmatpush2.bf16.msra.mxu1 %v903_v43 }
  0x2c   :  { %466 = vmatprep.subr.bf16.mxu0 %v904_v44  ;;  %519 = vmatprep.subr.bf16.mxu1 %v906_v45 }
  0x2f   :  { %467 = vmatpush2.bf16.msra.mxu0 %v908_v46  ;;  %520 = vmatpush2.bf16.msra.mxu1 %v909_v48 }
  0x30   :  { %468 = vmatprep.subr.bf16.mxu0 %v910_v49  ;;  %521 = vmatprep.subr.bf16.mxu1 %v912_v50 }
  0x33   :  { %469 = vmatpush2.bf16.msra.mxu0 %v914_v51  ;;  %522 = vmatpush2.bf16.msra.mxu1 %v915_v52 }
  0x34   :  { %470 = vmatprep.subr.bf16.mxu0 %v916_v53  ;;  %523 = vmatprep.subr.bf16.mxu1 %v918_v54 }
  0x37   :  { %471 = vmatpush2.bf16.msra.mxu0 %v920_v55  ;;  %524 = vmatpush2.bf16.msra.mxu1 %v921_v56 }
  0x38   :  { %472 = vmatprep.subr.bf16.mxu0 %v922_v57  ;;  %525 = vmatprep.subr.bf16.mxu1 %v924_v58 }
  0x3b   :  { %473 = vmatpush2.bf16.msra.mxu0 %v926_v59  ;;  %526 = vmatpush2.bf16.msra.mxu1 %v927_v60 }
  0x3c   :  { %474 = vmatprep.subr.bf16.mxu0 %v928_v61  ;;  %527 = vmatprep.subr.bf16.mxu1 %v930_v62 }
  0x3f   :  { %475 = vmatpush2.bf16.msra.mxu0 %v932_v63  ;;  %528 = vmatpush2.bf16.msra.mxu1 %v933_v0 }
  0x42   :  { %477 = vmatmul.mubr.bf16.vlgmr.msra.gmra.mxu0 %v934_v1  ;;  %530 = vmatmul.mubr.bf16.vlgmr.msra.gmra.mxu1 %v934_v1 }
  0x43   :  { %486 = vmatprep.mubr.bf16.mxu0 %v937_v2  ;;  %539 = vmatprep.mubr.bf16.mxu1 %v937_v2 }
  0x4a   :  { %487 = vmatmul.mubr.bf16.gmra.mxu0 %v939_v3  ;;  %540 = vmatmul.mubr.bf16.gmra.mxu1 %v939_v3 }
 0x102   :  { %v478_v13 = vpop.f32.mrf.mxu0  ;;  %v531_v14 = vpop.f32.mrf.mxu1 }
 0x103   :  { %v1208_v17 = vadd.f32 %v478_v13, %v1199_v11  ;;  %v1211_v18 = vadd.f32 %v531_v14, %v1201_v12 }
 0x104   :  { %v480_v19 = vpop.f32.mrf.mxu0  ;;  %v533_v20 = vpop.f32.mrf.mxu1 }
 0x105   :  { %v566_v21 = vmul.f32 0.044715, %v1208_v17  ;;  %v568_v22 = vmul.f32 0.044715, %v1211_v18  ;;  %v1216_v23 = vadd.f32 %v480_v19, %v1203_v15  ;;  %v1219_v24 = vadd.f32 %v533_v20, %v1205_v16 }
 0x106   :  { %v482_v25 = vpop.f32.mrf.mxu0  ;;  %v535_v26 = vpop.f32.mrf.mxu1 }
 0x107   :  { %v582_v27 = vmul.f32 %v566_v21, %v1208_v17  ;;  %v584_v28 = vmul.f32 %v568_v22, %v1211_v18  ;;  %v1224_v29 = vadd.f32 %v482_v25, %v1199_v11  ;;  %v1227_v30 = vadd.f32 %v535_v26, %v1201_v12 }
 0x108   :  { %v567_v31 = vmul.f32 0.044715, %v1216_v23  ;;  %v569_v32 = vmul.f32 0.044715, %v1219_v24  ;;  %v484_v33 = vpop.f32.mrf.mxu0  ;;  %v537_v34 = vpop.f32.mrf.mxu1 }
 0x109   :  { %v598_v35 = vmul.f32 %v582_v27, %v1208_v17  ;;  %v600_v36 = vmul.f32 %v584_v28, %v1211_v18  ;;  %v570_v37 = vmul.f32 0.044715, %v1224_v29  ;;  %v572_v40 = vmul.f32 0.044715, %v1227_v30 }
 0x10a   :  { %v583_v38 = vmul.f32 %v567_v31, %v1216_v23  ;;  %v585_v39 = vmul.f32 %v569_v32, %v1219_v24  ;;  %v1241_v44 = vadd.f32 %v484_v33, %v1203_v15  ;;  %v488_v45 = vpop.f32.mrf.mxu0  ;;  %v1247_v49 = vadd.f32 %v537_v34, %v1205_v16  ;;  %v541_v50 = vpop.f32.mrf.mxu1 }
 0x10b   :  { %v614_v41 = vadd.f32 %v598_v35, %v1208_v17  ;;  %v616_v42 = vadd.f32 %v600_v36, %v1211_v18  ;;  %v586_v43 = vmul.f32 %v570_v37, %v1224_v29  ;;  %v588_v48 = vmul.f32 %v572_v40, %v1227_v30 }
 0x10c   :  { %v599_v46 = vmul.f32 %v583_v38, %v1216_v23  ;;  %v601_v47 = vmul.f32 %v585_v39, %v1219_v24  ;;  %v571_v57 = vmul.f32 0.044715, %v1241_v44  ;;  %v573_v59 = vmul.f32 0.044715, %v1247_v49  ;;  %v490_v60 = vpop.f32.mrf.mxu0  ;;  %v543_v0 = vpop.f32.mrf.mxu1 }
 0x10d   :  { %v630_v51 = vmul.f32 0.7978846, %v614_v41  ;;  %v632_v52 = vmul.f32 0.7978846, %v616_v42  ;;  %v602_v53 = vmul.f32 %v586_v43, %v1224_v29  ;;  %v604_v56 = vmul.f32 %v588_v48, %v1227_v30 }
 0x10e   :  { %v615_v54 = vadd.f32 %v599_v46, %v1216_v23  ;;  %v617_v55 = vadd.f32 %v601_v47, %v1219_v24  ;;  %v587_v2 = vmul.f32 %v571_v57, %v1241_v44  ;;  %v589_v3 = vmul.f32 %v573_v59, %v1247_v49  ;;  %v492_v14 = vpop.f32.mrf.mxu0  ;;  %v545_v19 = vpop.f32.mrf.mxu1 }
 0x10f   :  { %940 = vtanh.f32 %v630_v51  ;;  %v618_v58 = vadd.f32 %v602_v53, %v1224_v29  ;;  %v620_v63 = vadd.f32 %v604_v56, %v1227_v30  ;;  %v1260_v4 = vadd.f32 %v488_v45, %v1199_v11 }
 0x110   :  { %942 = vtanh.f32 %v632_v52  ;;  %v631_v61 = vmul.f32 0.7978846, %v615_v54  ;;  %v633_v62 = vmul.f32 0.7978846, %v617_v55  ;;  %v1263_v6 = vadd.f32 %v541_v50, %v1201_v12  ;;  %v494_v43 = vpop.f32.mrf.mxu0 }
 0x111   :  { %v634_v1 = vmul.f32 0.7978846, %v618_v58  ;;  %v636_v5 = vmul.f32 0.7978846, %v620_v63  ;;  %v1266_v7 = vadd.f32 %v490_v60, %v1203_v15  ;;  %v603_v8 = vmul.f32 %v587_v2, %v1241_v44 }
 0x112   :  { %944 = vtanh.f32 %v631_v61  ;;  %v605_v9 = vmul.f32 %v589_v3, %v1247_v49  ;;  %v574_v10 = vmul.f32 0.044715, %v1260_v4  ;;  %v576_v13 = vmul.f32 0.044715, %v1263_v6 }
 0x113   :  { %946 = vtanh.f32 %v633_v62  ;;  %v619_v20 = vadd.f32 %v603_v8, %v1241_v44  ;;  %v575_v26 = vmul.f32 0.044715, %v1266_v7  ;;  %v1278_v27 = vadd.f32 %v543_v0, %v1205_v16 }
 0x114   :  { %948 = vtanh.f32 %v634_v1  ;;  %v621_v21 = vadd.f32 %v605_v9, %v1247_v49  ;;  %v590_v22 = vmul.f32 %v574_v10, %v1260_v4  ;;  %v592_v25 = vmul.f32 %v576_v13, %v1263_v6 }
 0x115   :  { %950 = vtanh.f32 %v636_v5  ;;  %v635_v28 = vmul.f32 0.7978846, %v619_v20  ;;  %v1281_v32 = vadd.f32 %v492_v14, %v1199_v11  ;;  %v1284_v33 = vadd.f32 %v545_v19, %v1201_v12 }
 0x116   :  { %v637_v31 = vmul.f32 0.7978846, %v621_v21  ;;  %v606_v34 = vmul.f32 %v590_v22, %v1260_v4  ;;  %v608_v35 = vmul.f32 %v592_v25, %v1263_v6  ;;  %v591_v36 = vmul.f32 %v575_v26, %v1266_v7 }
 0x117   :  { %952 = vtanh.f32 %v635_v28  ;;  %v577_v37 = vmul.f32 0.044715, %v1278_v27  ;;  %v578_v38 = vmul.f32 0.044715, %v1281_v32  ;;  %v580_v42 = vmul.f32 0.044715, %v1284_v33 }
 0x118   :  { %954 = vtanh.f32 %v637_v31  ;;  %v622_v39 = vadd.f32 %v606_v34, %v1260_v4  ;;  %v624_v11 = vadd.f32 %v608_v35, %v1263_v6  ;;  %v607_v40 = vmul.f32 %v591_v36, %v1266_v7 }
 0x119   :  { %v593_v12 = vmul.f32 %v577_v37, %v1278_v27  ;;  %v594_v41 = vmul.f32 %v578_v38, %v1281_v32  ;;  %v550_v46 = vmul.f32 0.5, %v1208_v17  ;;  %v552_v52 = vmul.f32 0.5, %v1211_v18  ;;  %v547_v17 = vpop.f32.mrf.mxu1 }
 0x11a   :  { %v638_v47 = vmul.f32 0.7978846, %v622_v39  ;;  %v640_v48 = vmul.f32 0.7978846, %v624_v11  ;;  %v623_v50 = vadd.f32 %v607_v40, %v1266_v7  ;;  %v596_v55 = vmul.f32 %v580_v42, %v1284_v33 }
 0x11b   :  { %v609_v53 = vmul.f32 %v593_v12, %v1278_v27  ;;  %v610_v54 = vmul.f32 %v594_v41, %v1281_v32  ;;  %v1304_v58 = vadd.f32 %v494_v43, %v1203_v15  ;;  %v551_v61 = vmul.f32 0.5, %v1216_v23 }
 0x11c   :  { %v941_v45 = vpop.eup %940  ;;  %956 = vtanh.f32 %v638_v47  ;;  %v639_v57 = vmul.f32 0.7978846, %v623_v50  ;;  %v553_v0 = vmul.f32 0.5, %v1219_v24  ;;  %v612_v1 = vmul.f32 %v596_v55, %v1284_v33 }
 0x11d   :  { %v943_v51 = vpop.eup %942  ;;  %v662_v56 = vadd.f32 1.0, %v941_v45  ;;  %958 = vtanh.f32 %v640_v48  ;;  %v625_v18 = vadd.f32 %v609_v53, %v1278_v27  ;;  %v626_v15 = vadd.f32 %v610_v54, %v1281_v32 }
 0x11e   :  { %v664_v60 = vadd.f32 1.0, %v943_v51  ;;  %960 = vtanh.f32 %v639_v57  ;;  %v1312_v8 = vadd.f32 %v547_v17, %v1205_v16  ;;  %v579_v13 = vmul.f32 0.044715, %v1304_v58 }
 0x11f   :  { %v945_v59 = vpop.eup %944  ;;  %v641_v5 = vmul.f32 0.7978846, %v625_v18  ;;  %v678_v23 = vmul.f32 %v662_v56, %v550_v46  ;;  %v628_v24 = vadd.f32 %v612_v1, %v1284_v33  ;;  %v642_v25 = vmul.f32 0.7978846, %v626_v15 }
 0x120   :  { %v947_v62 = vpop.eup %946  ;;  %v663_v63 = vadd.f32 1.0, %v945_v59  ;;  %v680_v14 = vmul.f32 %v664_v60, %v552_v52  ;;  %v595_v26 = vmul.f32 %v579_v13, %v1304_v58  ;;  %v581_v28 = vmul.f32 0.044715, %v1312_v8 }
 0x121   :  { %v949_v2 = vpop.eup %948  ;;  %v665_v3 = vadd.f32 1.0, %v947_v62  ;;  %962 = vtanh.f32 %v641_v5  ;;  %v554_v31 = vmul.f32 0.5, %v1224_v29  ;;  %v555_v35 = vmul.f32 0.5, %v1241_v44 }
 0x122   :  { %v951_v9 = vpop.eup %950  ;;  %v679_v10 = vmul.f32 %v663_v63, %v551_v61  ;;  %v666_v21 = vadd.f32 1.0, %v949_v2  ;;  %v644_v38 = vmul.f32 0.7978846, %v628_v24  ;;  %v611_v39 = vmul.f32 %v595_v26, %v1304_v58 }
 0x123   :  { %v681_v19 = vmul.f32 %v665_v3, %v553_v0  ;;  %v668_v34 = vadd.f32 1.0, %v951_v9  ;;  %v597_v11 = vmul.f32 %v581_v28, %v1312_v8  ;;  %v556_v12 = vmul.f32 0.5, %v1227_v30 }
 0x124   :  { %v830_v20 = vpack.c.bf16 %v679_v10, %v678_v23  ;;  %v953_v16 = vpop.eup %952  ;;  %v682_v40 = vmul.f32 %v666_v21, %v554_v31  ;;  %v557_v41 = vmul.f32 0.5, %v1247_v49  ;;  %964 = vtanh.f32 %v642_v25 }
 0x125   :  { %v831_v22 = vpack.c.bf16 %v681_v19, %v680_v14  ;;  %v955_v36 = vpop.eup %954  ;;  %v667_v37 = vadd.f32 1.0, %v953_v16  ;;  %v627_v44 = vadd.f32 %v611_v39, %v1304_v58  ;;  %v613_v43 = vmul.f32 %v597_v11, %v1312_v8 }
 0x126   :  { %742 = vst [vmem:[%s1362_s3] sm:$0xff] %v830_v20  ;;  %v669_v29 = vadd.f32 1.0, %v955_v36  ;;  %v684_v45 = vmul.f32 %v668_v34, %v556_v12  ;;  %966 = vtanh.f32 %v644_v38  ;;  %v558_v55 = vmul.f32 0.5, %v1260_v4 }
 0x127   :  { %743 = vst [vmem:[%s1362_s3 + $0x8] sm:$0xff] %v831_v22  ;;  %v683_v42 = vmul.f32 %v667_v37, %v555_v35  ;;  %v643_v50 = vmul.f32 0.7978846, %v627_v44  ;;  %v629_v51 = vadd.f32 %v613_v43, %v1312_v8  ;;  %v559_v56 = vmul.f32 0.5, %v1266_v7 }
 0x128   :  { %v685_v46 = vmul.f32 %v669_v29, %v557_v41  ;;  %v560_v18 = vmul.f32 0.5, %v1263_v6  ;;  %v561_v62 = vmul.f32 0.5, %v1278_v27  ;;  %v562_v6 = vmul.f32 0.5, %v1281_v32 }
 0x129   :  { %v957_v47 = vpop.eup %956  ;;  %v832_v48 = vpack.c.bf16 %v683_v42, %v682_v40  ;;  %968 = vtanh.f32 %v643_v50  ;;  %v645_v49 = vmul.f32 0.7978846, %v629_v51  ;;  %v563_v9 = vmul.f32 0.5, %v1304_v58 }
 0x12a   :  { %v959_v52 = vpop.eup %958  ;;  %v833_v53 = vpack.c.bf16 %v685_v46, %v684_v45  ;;  %v670_v30 = vadd.f32 1.0, %v957_v47  ;;  %v564_v13 = vmul.f32 0.5, %v1284_v33  ;;  %v565_v24 = vmul.f32 0.5, %v1312_v8 }
 0x12b   :  { %v961_v54 = vpop.eup %960  ;;  %744 = vst [vmem:[%s1362_s3 + $0x10] sm:$0xff] %v832_v48  ;;  %v672_v17 = vadd.f32 1.0, %v959_v52  ;;  %970 = vtanh.f32 %v645_v49 }
 0x12c   :  { %745 = vst [vmem:[%s1362_s3 + $0x18] sm:$0xff] %v833_v53  ;;  %v671_v57 = vadd.f32 1.0, %v961_v54  ;;  %v686_v60 = vmul.f32 %v670_v30, %v558_v55 }
 0x12d   :  { %v688_v1 = vmul.f32 %v672_v17, %v560_v18 }
 0x12e   :  { %v963_v59 = vpop.eup %962  ;;  %v687_v61 = vmul.f32 %v671_v57, %v559_v56 }
 0x12f   :  { %v673_v63 = vadd.f32 1.0, %v963_v59 }
 0x130   :  { %v834_v0 = vpack.c.bf16 %v687_v61, %v686_v60 }
 0x131   :  { %v689_v2 = vmul.f32 %v673_v63, %v561_v62  ;;  %v965_v7 = vpop.eup %964 }
 0x132   :  { %746 = vst [vmem:[%s1362_s3 + $0x20] sm:$0xff] %v834_v0  ;;  %v674_v5 = vadd.f32 1.0, %v965_v7 }
 0x133   :  { %v835_v4 = vpack.c.bf16 %v689_v2, %v688_v1  ;;  %v967_v3 = vpop.eup %966 }
 0x134   :  { %v676_v27 = vadd.f32 1.0, %v967_v3  ;;  %v690_v14 = vmul.f32 %v674_v5, %v562_v6 }
 0x135   :  { %747 = vst [vmem:[%s1362_s3 + $0x28] sm:$0xff] %v835_v4 }
 0x136   :  { %v969_v15 = vpop.eup %968  ;;  %v692_v21 = vmul.f32 %v676_v27, %v564_v13 }
 0x137   :  { %v675_v23 = vadd.f32 1.0, %v969_v15 }
 0x138   :  { %v971_v10 = vpop.eup %970 }
 0x139   :  { %v691_v19 = vmul.f32 %v675_v23, %v563_v9  ;;  %v677_v20 = vadd.f32 1.0, %v971_v10 }
 0x13b   :  { %v836_v22 = vpack.c.bf16 %v691_v19, %v690_v14  ;;  %v693_v25 = vmul.f32 %v677_v20, %v565_v24 }
 0x13d   :  { %748 = vst [vmem:[%s1362_s3 + $0x30] sm:$0xff] %v836_v22  ;;  %v837_v32 = vpack.c.bf16 %v693_v25, %v692_v21 }
 0x13f   :  { %749 = vst [vmem:[%s1362_s3 + $0x38] sm:$0xff] %v837_v32 }

// kernel: _lambda_.26
= control target key start
LH: loop header
LB: loop body
LE: loop exit
PB: predicated region body
PF: predicated region fallthrough
CT: control target
= control target key end

     0   :  { %s1212_s1 = inlined_call_operand.vmem [shape: bf16[512,256], index: 1, kind: input, shape index: {}]   ;;  %s1213_s0 = inlined_call_operand.vmem [shape: bf16[32,512], index: 0, kind: input, shape index: {}]   ;;  %s1214_s2 = inlined_call_operand.vmem [shape: f32[1,256], index: 2, kind: input, shape index: {}]   ;;  %s1215_s3 = inlined_call_operand.vmem [shape: f32[32,256], index: 3, kind: input, shape index: {}]   ;;  %s1216_s4 = inlined_call_operand.vmem [shape: f32[1,256], index: 4, kind: input, shape index: {}]   ;;  %s1217_s5 = inlined_call_operand.vmem [shape: f32[1,256], index: 5, kind: input, shape index: {}]   ;;  %s1218_s6 = inlined_call_operand.vmem [shape: f32[32,256], index: 6, kind: output, shape index: {}]  }
   0x1   :  { %v778_v0 = vld [vmem:[%s1212_s1 + $0x74] ss:$8 sps:$4 sm:$0xff]   ;;  %v782_v2 = vld [vmem:[%s1212_s1 + $0x70] ss:$8 sps:$4 sm:$0xff]   ;;  %v784_v4 = vld [vmem:[%s1212_s1 + $0x64] ss:$8 sps:$4 sm:$0xff]  }
   0x2   :  { %v780_v1 = vld [vmem:[%s1212_s1 + $0x174] ss:$8 sps:$4 sm:$0xff]   ;;  %467 = vmatprep.subr.bf16.mxu0 %v778_v0  ;;  %v783_v3 = vld [vmem:[%s1212_s1 + $0x170] ss:$8 sps:$4 sm:$0xff]   ;;  %v786_v5 = vld [vmem:[%s1212_s1 + $0x164] ss:$8 sps:$4 sm:$0xff]  }
   0x3   :  { %520 = vmatprep.subr.bf16.mxu1 %v780_v1  ;;  %468 = vmatpush1.bf16.msra.mxu0 %v782_v2  ;;  %v788_v6 = vld [vmem:[%s1212_s1 + $0x60] ss:$8 sps:$4 sm:$0xff]   ;;  %v790_v8 = vld [vmem:[%s1212_s1 + $0x54] ss:$8 sps:$4 sm:$0xff]   ;;  %v794_v10 = vld [vmem:[%s1212_s1 + $0x50] ss:$8 sps:$4 sm:$0xff]  }
   0x4   :  { %521 = vmatpush1.bf16.msra.mxu1 %v783_v3  ;;  %469 = vmatprep.subr.bf16.mxu0 %v784_v4  ;;  %v789_v7 = vld [vmem:[%s1212_s1 + $0x160] ss:$8 sps:$4 sm:$0xff]   ;;  %v792_v9 = vld [vmem:[%s1212_s1 + $0x154] ss:$8 sps:$4 sm:$0xff]   ;;  %v795_v11 = vld [vmem:[%s1212_s1 + $0x150] ss:$8 sps:$4 sm:$0xff]  }
   0x5   :  { %522 = vmatprep.subr.bf16.mxu1 %v786_v5  ;;  %v796_v12 = vld [vmem:[%s1212_s1 + $0x44] ss:$8 sps:$4 sm:$0xff]   ;;  %v800_v14 = vld [vmem:[%s1212_s1 + $0x40] ss:$8 sps:$4 sm:$0xff]   ;;  %v802_v16 = vld [vmem:[%s1212_s1 + $0x34] ss:$8 sps:$4 sm:$0xff]  }
   0x6   :  { %v798_v13 = vld [vmem:[%s1212_s1 + $0x144] ss:$8 sps:$4 sm:$0xff]   ;;  %v801_v15 = vld [vmem:[%s1212_s1 + $0x140] ss:$8 sps:$4 sm:$0xff]   ;;  %v804_v17 = vld [vmem:[%s1212_s1 + $0x134] ss:$8 sps:$4 sm:$0xff]  }
   0x7   :  { %470 = vmatpush1.bf16.msra.mxu0 %v788_v6  ;;  %v806_v18 = vld [vmem:[%s1212_s1 + $0x30] ss:$8 sps:$4 sm:$0xff]   ;;  %v808_v20 = vld [vmem:[%s1212_s1 + $0x24] ss:$8 sps:$4 sm:$0xff]   ;;  %v812_v22 = vld [vmem:[%s1212_s1 + $0x20] ss:$8 sps:$4 sm:$0xff]  }
   0x8   :  { %523 = vmatpush1.bf16.msra.mxu1 %v789_v7  ;;  %471 = vmatprep.subr.bf16.mxu0 %v790_v8  ;;  %v807_v19 = vld [vmem:[%s1212_s1 + $0x130] ss:$8 sps:$4 sm:$0xff]   ;;  %v810_v21 = vld [vmem:[%s1212_s1 + $0x124] ss:$8 sps:$4 sm:$0xff]   ;;  %v813_v23 = vld [vmem:[%s1212_s1 + $0x120] ss:$8 sps:$4 sm:$0xff]   ;;  %v97_v8 = vlaneseq }
   0x9   :  { %524 = vmatprep.subr.bf16.mxu1 %v792_v9  ;;  %v814_v24 = vld [vmem:[%s1212_s1 + $0x14] ss:$8 sps:$4 sm:$0xff]   ;;  %v818_v26 = vld [vmem:[%s1212_s1 + $0x10] ss:$8 sps:$4 sm:$0xff]   ;;  %v820_v28 = vld [vmem:[%s1212_s1 + $0x4] ss:$8 sps:$4 sm:$0xff]  }
   0xa   :  { %v816_v25 = vld [vmem:[%s1212_s1 + $0x114] ss:$8 sps:$4 sm:$0xff]   ;;  %v819_v27 = vld [vmem:[%s1212_s1 + $0x110] ss:$8 sps:$4 sm:$0xff]   ;;  %v822_v29 = vld [vmem:[%s1212_s1 + $0x104] ss:$8 sps:$4 sm:$0xff]  }
   0xb   :  { %472 = vmatpush1.bf16.msra.mxu0 %v794_v10  ;;  %v824_v30 = vld [vmem:[%s1212_s1] ss:$8 sps:$4 sm:$0xff]   ;;  %v826_v32 = vld [vmem:[%s1212_s1 + $0xf4] ss:$8 sps:$4 sm:$0xff]   ;;  %v830_v34 = vld [vmem:[%s1212_s1 + $0xf0] ss:$8 sps:$4 sm:$0xff]  }
   0xc   :  { %525 = vmatpush1.bf16.msra.mxu1 %v795_v11  ;;  %473 = vmatprep.subr.bf16.mxu0 %v796_v12  ;;  %v825_v31 = vld [vmem:[%s1212_s1 + $0x100] ss:$8 sps:$4 sm:$0xff]   ;;  %v828_v33 = vld [vmem:[%s1212_s1 + $0x1f4] ss:$8 sps:$4 sm:$0xff]   ;;  %v831_v35 = vld [vmem:[%s1212_s1 + $0x1f0] ss:$8 sps:$4 sm:$0xff]  }
   0xd   :  { %526 = vmatprep.subr.bf16.mxu1 %v798_v13  ;;  %v832_v36 = vld [vmem:[%s1212_s1 + $0xe4] ss:$8 sps:$4 sm:$0xff]   ;;  %v836_v38 = vld [vmem:[%s1212_s1 + $0xe0] ss:$8 sps:$4 sm:$0xff]   ;;  %v838_v40 = vld [vmem:[%s1212_s1 + $0xd4] ss:$8 sps:$4 sm:$0xff]  }
   0xe   :  { %v834_v37 = vld [vmem:[%s1212_s1 + $0x1e4] ss:$8 sps:$4 sm:$0xff]   ;;  %v837_v39 = vld [vmem:[%s1212_s1 + $0x1e0] ss:$8 sps:$4 sm:$0xff]   ;;  %v840_v41 = vld [vmem:[%s1212_s1 + $0x1d4] ss:$8 sps:$4 sm:$0xff]  }
   0xf   :  { %474 = vmatpush1.bf16.msra.mxu0 %v800_v14  ;;  %v842_v42 = vld [vmem:[%s1212_s1 + $0xd0] ss:$8 sps:$4 sm:$0xff]   ;;  %v844_v44 = vld [vmem:[%s1212_s1 + $0xc4] ss:$8 sps:$4 sm:$0xff]   ;;  %v848_v46 = vld [vmem:[%s1212_s1 + $0xc0] ss:$8 sps:$4 sm:$0xff]  }
  0x10   :  { %527 = vmatpush1.bf16.msra.mxu1 %v801_v15  ;;  %475 = vmatprep.subr.bf16.mxu0 %v802_v16  ;;  %v843_v43 = vld [vmem:[%s1212_s1 + $0x1d0] ss:$8 sps:$4 sm:$0xff]   ;;  %v846_v45 = vld [vmem:[%s1212_s1 + $0x1c4] ss:$8 sps:$4 sm:$0xff]   ;;  %v849_v47 = vld [vmem:[%s1212_s1 + $0x1c0] ss:$8 sps:$4 sm:$0xff]  }
  0x11   :  { %528 = vmatprep.subr.bf16.mxu1 %v804_v17  ;;  %v850_v48 = vld [vmem:[%s1212_s1 + $0xb4] ss:$8 sps:$4 sm:$0xff]   ;;  %v854_v52 = vld [vmem:[%s1212_s1 + $0xb0] ss:$8 sps:$4 sm:$0xff]   ;;  %v856_v54 = vld [vmem:[%s1212_s1 + $0xa4] ss:$8 sps:$4 sm:$0xff]  }
  0x12   :  { %v876_v49 = vld [vmem:[%s1213_s0 + $0x4] ss:$16 sps:$4 sm:$0xff]   ;;  %v879_v51 = vld [vmem:[%s1213_s0 + $0xc] ss:$16 sps:$4 sm:$0xff]   ;;  %v855_v53 = vld [vmem:[%s1212_s1 + $0x1b0] ss:$8 sps:$4 sm:$0xff]  }
  0x13   :  { %476 = vmatpush1.bf16.msra.mxu0 %v806_v18  ;;  %v852_v50 = vld [vmem:[%s1212_s1 + $0x1b4] ss:$8 sps:$4 sm:$0xff]   ;;  %499 = vmatprep.mubr.bf16.mxu0 %v876_v49  ;;  %v858_v55 = vld [vmem:[%s1212_s1 + $0x1a4] ss:$8 sps:$4 sm:$0xff]   ;;  %v860_v56 = vld [vmem:[%s1212_s1 + $0xa0] ss:$8 sps:$4 sm:$0xff]  }
  0x14   :  { %529 = vmatpush1.bf16.msra.mxu1 %v807_v19  ;;  %477 = vmatprep.subr.bf16.mxu0 %v808_v20  ;;  %v861_v57 = vld [vmem:[%s1212_s1 + $0x1a0] ss:$8 sps:$4 sm:$0xff]   ;;  %v862_v58 = vld [vmem:[%s1212_s1 + $0x94] ss:$8 sps:$4 sm:$0xff]   ;;  %v866_v60 = vld [vmem:[%s1212_s1 + $0x90] ss:$8 sps:$4 sm:$0xff]  }
  0x15   :  { %530 = vmatprep.subr.bf16.mxu1 %v810_v21  ;;  %552 = vmatprep.mubr.bf16.mxu1 %v879_v51  ;;  %v864_v59 = vld [vmem:[%s1212_s1 + $0x194] ss:$8 sps:$4 sm:$0xff]   ;;  %v867_v61 = vld [vmem:[%s1212_s1 + $0x190] ss:$8 sps:$4 sm:$0xff]   ;;  %v868_v62 = vld [vmem:[%s1212_s1 + $0x84] ss:$8 sps:$4 sm:$0xff]  }
  0x16   :  { %v870_v63 = vld [vmem:[%s1212_s1 + $0x184] ss:$8 sps:$4 sm:$0xff]   ;;  %v872_v0 = vld [vmem:[%s1212_s1 + $0x80] ss:$8 sps:$4 sm:$0xff]   ;;  %v98_v9 = vshrl.u32 %v97_v8, 7 }
  0x17   :  { %478 = vmatpush1.bf16.msra.mxu0 %v812_v22  ;;  %v873_v1 = vld [vmem:[%s1212_s1 + $0x180] ss:$8 sps:$4 sm:$0xff]   ;;  %v880_v4 = vld [vmem:[%s1213_s0 + $0x24] ss:$16 sps:$4 sm:$0xff]   ;;  %v882_v5 = vld [vmem:[%s1213_s0 + $0x2c] ss:$16 sps:$4 sm:$0xff]  }
  0x18   :  { %531 = vmatpush1.bf16.msra.mxu1 %v813_v23  ;;  %479 = vmatprep.subr.bf16.mxu0 %v814_v24  ;;  %v874_v2 = vld [vmem:[%s1213_s0] ss:$16 sps:$4 sm:$0xff]   ;;  %v877_v3 = vld [vmem:[%s1213_s0 + $0x8] ss:$16 sps:$4 sm:$0xff]   ;;  %v1145_v10 = vsub.s32 0, %v98_v9  ;;  %v1150_v12 = vsub.s32 1, %v98_v9 }
  0x19   :  { %532 = vmatprep.subr.bf16.mxu1 %v816_v25  ;;  %v884_v6 = vld [vmem:[%s1213_s0 + $0x20] ss:$16 sps:$4 sm:$0xff]   ;;  %v885_v7 = vld [vmem:[%s1213_s0 + $0x28] ss:$16 sps:$4 sm:$0xff]  }
  0x1a   :  { %v95_v11 = vld [vmem:[%s1214_s2] sm:$0x3]  ;;  %v574_v25 = vld [vmem:[%s1215_s3 + $0x8] sm:$0xff] }
  0x1b   :  { %480 = vmatpush1.bf16.msra.mxu0 %v818_v26  ;;  %v100_v13 = vrot.slane %v95_v11, %v1145_v10  ;;  %v104_v14 = vrot.slane %v95_v11, %v1150_v12  ;;  %v573_v24 = vld [vmem:[%s1215_s3] sm:$0xff] }
  0x1c   :  { %533 = vmatpush1.bf16.msra.mxu1 %v819_v27  ;;  %481 = vmatprep.subr.bf16.mxu0 %v820_v28  ;;  %v577_v49 = vld [vmem:[%s1215_s3 + $0x20] sm:$0xff] }
  0x1d   :  { %534 = vmatprep.subr.bf16.mxu1 %v822_v29 }
  0x1f   :  { %482 = vmatpush1.bf16.msra.mxu0 %v824_v30 }
  0x20   :  { %535 = vmatpush1.bf16.msra.mxu1 %v825_v31  ;;  %483 = vmatprep.subr.bf16.mxu0 %v826_v32 }
  0x21   :  { %536 = vmatprep.subr.bf16.mxu1 %v828_v33 }
  0x23   :  { %484 = vmatpush2.bf16.msra.mxu0 %v830_v34  ;;  %v575_v34 = vld [vmem:[%s1215_s3 + $0x10] sm:$0xff] }
  0x24   :  { %537 = vmatpush2.bf16.msra.mxu1 %v831_v35  ;;  %485 = vmatprep.subr.bf16.mxu0 %v832_v36  ;;  %v576_v35 = vld [vmem:[%s1215_s3 + $0x18] sm:$0xff] }
  0x25   :  { %538 = vmatprep.subr.bf16.mxu1 %v834_v37 }
  0x27   :  { %486 = vmatpush2.bf16.msra.mxu0 %v836_v38 }
  0x28   :  { %539 = vmatpush2.bf16.msra.mxu1 %v837_v39  ;;  %487 = vmatprep.subr.bf16.mxu0 %v838_v40 }
  0x29   :  { %540 = vmatprep.subr.bf16.mxu1 %v840_v41 }
  0x2b   :  { %488 = vmatpush2.bf16.msra.mxu0 %v842_v42 }
  0x2c   :  { %541 = vmatpush2.bf16.msra.mxu1 %v843_v43  ;;  %489 = vmatprep.subr.bf16.mxu0 %v844_v44 }
  0x2d   :  { %542 = vmatprep.subr.bf16.mxu1 %v846_v45 }
  0x2f   :  { %490 = vmatpush2.bf16.msra.mxu0 %v848_v46 }
  0x30   :  { %543 = vmatpush2.bf16.msra.mxu1 %v849_v47  ;;  %491 = vmatprep.subr.bf16.mxu0 %v850_v48 }
  0x31   :  { %544 = vmatprep.subr.bf16.mxu1 %v852_v50  ;;  %v578_v50 = vld [vmem:[%s1215_s3 + $0x28] sm:$0xff] }
  0x33   :  { %492 = vmatpush2.bf16.msra.mxu0 %v854_v52 }
  0x34   :  { %545 = vmatpush2.bf16.msra.mxu1 %v855_v53  ;;  %493 = vmatprep.subr.bf16.mxu0 %v856_v54 }
  0x35   :  { %546 = vmatprep.subr.bf16.mxu1 %v858_v55 }
  0x37   :  { %494 = vmatpush2.bf16.msra.mxu0 %v860_v56 }
  0x38   :  { %547 = vmatpush2.bf16.msra.mxu1 %v861_v57  ;;  %495 = vmatprep.subr.bf16.mxu0 %v862_v58 }
  0x39   :  { %548 = vmatprep.subr.bf16.mxu1 %v864_v59  ;;  %v579_v59 = vld [vmem:[%s1215_s3 + $0x30] sm:$0xff] }
  0x3b   :  { %496 = vmatpush2.bf16.msra.mxu0 %v866_v60 }
  0x3c   :  { %549 = vmatpush2.bf16.msra.mxu1 %v867_v61  ;;  %497 = vmatprep.subr.bf16.mxu0 %v868_v62  ;;  %v580_v61 = vld [vmem:[%s1215_s3 + $0x38] sm:$0xff] }
  0x3d   :  { %550 = vmatprep.subr.bf16.mxu1 %v870_v63 }
  0x3f   :  { %498 = vmatpush2.bf16.msra.mxu0 %v872_v0 }
  0x40   :  { %551 = vmatpush2.bf16.msra.mxu1 %v873_v1 }
  0x42   :  { %500 = vmatmul.mubr.bf16.vlgmr.msra.gmra.mxu0 %v874_v2 }
  0x43   :  { %553 = vmatmul.mubr.bf16.vlgmr.msra.gmra.mxu1 %v877_v3  ;;  %509 = vmatprep.mubr.bf16.mxu0 %v880_v4 }
  0x44   :  { %562 = vmatprep.mubr.bf16.mxu1 %v882_v5 }
  0x4a   :  { %510 = vmatmul.mubr.bf16.gmra.mxu0 %v884_v6 }
  0x4b   :  { %563 = vmatmul.mubr.bf16.gmra.mxu1 %v885_v7 }
 0x102   :  { %v501_v15 = vpop.f32.mrf.mxu0 }
 0x103   :  { %v554_v16 = vpop.f32.mrf.mxu1  ;;  %v502_v17 = vadd.f32 %v501_v15, %v100_v13 }
 0x104   :  { %v503_v18 = vpop.f32.mrf.mxu0 }
 0x105   :  { %v556_v19 = vpop.f32.mrf.mxu1  ;;  %v555_v20 = vadd.f32 %v554_v16, %v502_v17  ;;  %v504_v21 = vadd.f32 %v503_v18, %v104_v14 }
 0x106   :  { %v505_v22 = vpop.f32.mrf.mxu0 }
 0x107   :  { %v558_v23 = vpop.f32.mrf.mxu1  ;;  %v557_v26 = vadd.f32 %v556_v19, %v504_v21  ;;  %v506_v27 = vadd.f32 %v505_v22, %v100_v13  ;;  %v581_v32 = vadd.f32 %v573_v24, %v555_v20 }
 0x108   :  { %v507_v28 = vpop.f32.mrf.mxu0 }
 0x109   :  { %v560_v29 = vpop.f32.mrf.mxu1  ;;  %v559_v30 = vadd.f32 %v558_v23, %v506_v27  ;;  %v508_v31 = vadd.f32 %v507_v28, %v104_v14  ;;  %v582_v33 = vadd.f32 %v574_v25, %v557_v26 }
 0x10a   :  { %v511_v36 = vpop.f32.mrf.mxu0 }
 0x10b   :  { %v564_v37 = vpop.f32.mrf.mxu1  ;;  %v561_v38 = vadd.f32 %v560_v29, %v508_v31  ;;  %v512_v39 = vadd.f32 %v511_v36, %v100_v13  ;;  %v589_v40 = vadd.f32 %v582_v33, %v581_v32  ;;  %v583_v43 = vadd.f32 %v575_v34, %v559_v30 }
 0x10c   :  { %v513_v41 = vpop.f32.mrf.mxu0 }
 0x10d   :  { %v566_v42 = vpop.f32.mrf.mxu1  ;;  %v584_v44 = vadd.f32 %v576_v35, %v561_v38  ;;  %v565_v45 = vadd.f32 %v564_v37, %v512_v39  ;;  %v514_v46 = vadd.f32 %v513_v41, %v104_v14  ;;  %590 = vadd.xlane.f32.xlu0 %v589_v40 }
 0x10e   :  { %v515_v47 = vpop.f32.mrf.mxu0 }
 0x10f   :  { %v568_v48 = vpop.f32.mrf.mxu1  ;;  %v567_v51 = vadd.f32 %v566_v42, %v514_v46  ;;  %v516_v52 = vadd.f32 %v515_v47, %v100_v13  ;;  %v592_v53 = vadd.f32 %v584_v44, %v583_v43  ;;  %v585_v57 = vadd.f32 %v577_v49, %v565_v45  ;;  %v674_v46 = vld [vmem:[%s1217_s5] sm:$0x3] }
 0x110   :  { %v517_v54 = vpop.f32.mrf.mxu0 }
 0x111   :  { %v569_v55 = vadd.f32 %v568_v48, %v516_v52  ;;  %v518_v56 = vadd.f32 %v517_v54, %v104_v14  ;;  %593 = vadd.xlane.f32.xlu0 %v592_v53  ;;  %v586_v58 = vadd.f32 %v578_v50, %v567_v51  ;;  %v570_v60 = vpop.f32.mrf.mxu1  ;;  %v679_v50 = vrot.slane %v674_v46, %v1145_v10 }
 0x112   :  { %v683_v51 = vrot.slane %v674_v46, %v1150_v12 }
 0x113   :  { %v571_v62 = vadd.f32 %v570_v60, %v518_v56  ;;  %v595_v63 = vadd.f32 %v586_v58, %v585_v57  ;;  %v587_v0 = vadd.f32 %v579_v59, %v569_v55 }
 0x115   :  { %v588_v1 = vadd.f32 %v580_v61, %v571_v62  ;;  %596 = vadd.xlane.f32.xlu1 %v595_v63 }
 0x117   :  { %v598_v2 = vadd.f32 %v588_v1, %v587_v0 }
 0x119   :  { %599 = vadd.xlane.f32.xlu1 %v598_v2 }
 0x196   :  { %v591_v3 = vpop.xlane.xlu0 %590 }
 0x197   :  { %v602_v4 = vmul.f32 0.00390625, %v591_v3 }
 0x199   :  { %v606_v5 = vsub.f32 %v581_v32, %v602_v4  ;;  %v607_v6 = vsub.f32 %v582_v33, %v602_v4 }
 0x19a   :  { %v594_v7 = vpop.xlane.xlu0 %593 }
 0x19b   :  { %v603_v8 = vmul.f32 0.00390625, %v594_v7  ;;  %v614_v9 = vmul.f32 %v606_v5, %v606_v5  ;;  %v615_v11 = vmul.f32 %v607_v6, %v607_v6 }
 0x19d   :  { %v608_v13 = vsub.f32 %v583_v43, %v603_v8  ;;  %v609_v14 = vsub.f32 %v584_v44, %v603_v8  ;;  %v622_v15 = vadd.f32 %v615_v11, %v614_v9  ;;  %v654_v44 = vld [vmem:[%s1216_s4] sm:$0x3] }
 0x19e   :  { %v597_v16 = vpop.xlane.xlu1 %596  ;;  %v659_v47 = vrot.slane %v654_v44, %v1145_v10  ;;  %v663_v48 = vrot.slane %v654_v44, %v1150_v12 }
 0x19f   :  { %v604_v17 = vmul.f32 0.00390625, %v597_v16  ;;  %623 = vadd.xlane.f32.xlu0 %v622_v15  ;;  %v616_v18 = vmul.f32 %v608_v13, %v608_v13  ;;  %v617_v19 = vmul.f32 %v609_v14, %v609_v14 }
 0x1a1   :  { %v610_v20 = vsub.f32 %v585_v57, %v604_v17  ;;  %v611_v21 = vsub.f32 %v586_v58, %v604_v17  ;;  %v625_v22 = vadd.f32 %v617_v19, %v616_v18 }
 0x1a2   :  { %v600_v23 = vpop.xlane.xlu1 %599 }
 0x1a3   :  { %v605_v24 = vmul.f32 0.00390625, %v600_v23  ;;  %626 = vadd.xlane.f32.xlu1 %v625_v22  ;;  %v618_v25 = vmul.f32 %v610_v20, %v610_v20  ;;  %v619_v26 = vmul.f32 %v611_v21, %v611_v21 }
 0x1a5   :  { %v612_v27 = vsub.f32 %v587_v0, %v605_v24  ;;  %v613_v28 = vsub.f32 %v588_v1, %v605_v24  ;;  %v628_v29 = vadd.f32 %v619_v26, %v618_v25 }
 0x1a7   :  { %629 = vadd.xlane.f32.xlu0 %v628_v29  ;;  %v620_v30 = vmul.f32 %v612_v27, %v612_v27  ;;  %v621_v31 = vmul.f32 %v613_v28, %v613_v28 }
 0x1a9   :  { %v631_v32 = vadd.f32 %v621_v31, %v620_v30 }
 0x1ab   :  { %632 = vadd.xlane.f32.xlu1 %v631_v32 }
 0x228   :  { %v624_v33 = vpop.xlane.xlu0 %623 }
 0x229   :  { %v634_v34 = vmul.f32 0.00390625, %v624_v33 }
 0x22b   :  { %v638_v35 = vadd.f32 1e-12, %v634_v34 }
 0x22c   :  { %v627_v36 = vpop.xlane.xlu1 %626 }
 0x22d   :  { %886 = vrsqrt.f32 %v638_v35  ;;  %v635_v37 = vmul.f32 0.00390625, %v627_v36 }
 0x22f   :  { %v639_v38 = vadd.f32 1e-12, %v635_v37 }
 0x230   :  { %v630_v39 = vpop.xlane.xlu0 %629 }
 0x231   :  { %888 = vrsqrt.f32 %v639_v38  ;;  %v636_v40 = vmul.f32 0.00390625, %v630_v39 }
 0x233   :  { %v640_v41 = vadd.f32 1e-12, %v636_v40 }
 0x234   :  { %v633_v42 = vpop.xlane.xlu1 %632 }
 0x235   :  { %890 = vrsqrt.f32 %v640_v41  ;;  %v637_v43 = vmul.f32 0.00390625, %v633_v42 }
 0x237   :  { %v641_v45 = vadd.f32 1e-12, %v637_v43 }
 0x239   :  { %892 = vrsqrt.f32 %v641_v45 }
 0x23a   :  { %v887_v49 = vpop.eup %886 }
 0x23b   :  { %v646_v52 = vmul.f32 %v887_v49, %v606_v5  ;;  %v647_v53 = vmul.f32 %v887_v49, %v607_v6 }
 0x23d   :  { %v666_v54 = vmul.f32 %v659_v47, %v646_v52  ;;  %v667_v55 = vmul.f32 %v663_v48, %v647_v53 }
 0x23e   :  { %v889_v56 = vpop.eup %888 }
 0x23f   :  { %v686_v57 = vadd.f32 %v679_v50, %v666_v54  ;;  %v687_v58 = vadd.f32 %v683_v51, %v667_v55  ;;  %v648_v59 = vmul.f32 %v889_v56, %v608_v13  ;;  %v649_v60 = vmul.f32 %v889_v56, %v609_v14 }
 0x241   :  { %694 = vst [vmem:[%s1218_s6] sm:$0xff] %v686_v57  ;;  %695 = vst [vmem:[%s1218_s6 + $0x8] sm:$0xff] %v687_v58  ;;  %v668_v10 = vmul.f32 %v659_v47, %v648_v59  ;;  %v669_v61 = vmul.f32 %v663_v48, %v649_v60 }
 0x242   :  { %v891_v12 = vpop.eup %890 }
 0x243   :  { %v688_v62 = vadd.f32 %v679_v50, %v668_v10  ;;  %v689_v63 = vadd.f32 %v683_v51, %v669_v61  ;;  %v650_v0 = vmul.f32 %v891_v12, %v610_v20  ;;  %v651_v1 = vmul.f32 %v891_v12, %v611_v21 }
 0x245   :  { %696 = vst [vmem:[%s1218_s6 + $0x10] sm:$0xff] %v688_v62  ;;  %697 = vst [vmem:[%s1218_s6 + $0x18] sm:$0xff] %v689_v63  ;;  %v670_v2 = vmul.f32 %v659_v47, %v650_v0  ;;  %v671_v3 = vmul.f32 %v663_v48, %v651_v1 }
 0x246   :  { %v893_v4 = vpop.eup %892 }
 0x247   :  { %v690_v5 = vadd.f32 %v679_v50, %v670_v2  ;;  %v691_v6 = vadd.f32 %v683_v51, %v671_v3  ;;  %v652_v7 = vmul.f32 %v893_v4, %v612_v27  ;;  %v653_v8 = vmul.f32 %v893_v4, %v613_v28 }
 0x249   :  { %698 = vst [vmem:[%s1218_s6 + $0x20] sm:$0xff] %v690_v5  ;;  %699 = vst [vmem:[%s1218_s6 + $0x28] sm:$0xff] %v691_v6  ;;  %v672_v9 = vmul.f32 %v659_v47, %v652_v7  ;;  %v673_v11 = vmul.f32 %v663_v48, %v653_v8 }
 0x24b   :  { %v692_v13 = vadd.f32 %v679_v50, %v672_v9  ;;  %v693_v14 = vadd.f32 %v683_v51, %v673_v11 }
 0x24d   :  { %700 = vst [vmem:[%s1218_s6 + $0x30] sm:$0xff] %v692_v13  ;;  %701 = vst [vmem:[%s1218_s6 + $0x38] sm:$0xff] %v693_v14 }

</bundles_post_ra>
